<compile_context>
chip_gen: v7x
topology: tpu7x:2x2x1
jax: 0.10.0
libtpu: 0.0.40
codegen_flags: <defaults>
</compile_context>

<pallas_src>
import jax
import jax.numpy as jnp
from jax.experimental import pallas as pl
from jax.experimental.pallas import tpu as pltpu

_EPS = 1e-5  # nn.BatchNorm1d default eps


# --------------------------- fused Pallas kernel -----------------------------

def _make_fused_kernel(conv_cfg, block_layout, pool_k, pool_s, n_conv):
    """Builds the fused forward kernel (one batch element per grid step).

    conv_cfg     : flat list of (ksize, cin, cout) in the same order as the
                   flattened (w, b) operands
    block_layout : list of dicts {"n_convs": int, "has_res_conv": bool}
    """

    def kernel(scal_ref, x_ref, *rest):
        wb_refs = rest[:2 * n_conv]
        o_ref = rest[2 * n_conv]
        pad_ref = rest[2 * n_conv + 1]   # (L0 + Kmax - 1 rounded, Cmax) halo scratch
        im_ref = rest[2 * n_conv + 2]    # (L0, max K*Cin) im2col scratch

        def conv_same(x, w_ref, b_ref, ksize, cin):
            """Conv1d(padding='same') with BN folded into w/b.

            x: (L, cin) value; w_ref: (ksize*cin, cout); b_ref: (1, cout).
            """
            ell = x.shape[0]
            if ksize == 1:
                y = jnp.dot(x, w_ref[...], preferred_element_type=jnp.float32)
            else:
                left = (ksize - 1) // 2              # PyTorch padding='same'
                right = ksize - 1 - left
                # zero halo rows + place x into the padded scratch
                pad_ref[0:left, 0:cin] = jnp.zeros((left, cin), jnp.float32)
                pad_ref[left:left + ell, 0:cin] = x
                if right > 0:
                    pad_ref[left + ell:ell + ksize - 1, 0:cin] = jnp.zeros(
                        (right, cin), jnp.float32)
                # im2col: column block k holds the input shifted by tap k
                for k in range(ksize):
                    im_ref[0:ell, k * cin:(k + 1) * cin] = pad_ref[k:k + ell, 0:cin]
                y = jnp.dot(im_ref[0:ell, 0:ksize * cin], w_ref[...],
                            preferred_element_type=jnp.float32)
            return y + b_ref[...]                    # (1, cout) broadcast

        def relu_pool(x):
            """AvgPool1d(pool_k, stride=pool_s)(ReLU(x)) as one dense matmul."""
            ell = x.shape[0]
            l_out = (ell - pool_k) // pool_s + 1
            s = jnp.maximum(x, 0.0)
            m = jax.lax.broadcasted_iota(jnp.int32, (l_out, ell), 0)
            j = jax.lax.broadcasted_iota(jnp.int32, (l_out, ell), 1)
            window = jnp.logical_and(j >= pool_s * m, j < pool_s * m + pool_k)
            pmat = jnp.where(window, jnp.float32(1.0 / pool_k), jnp.float32(0.0))
            return jnp.dot(pmat, s, preferred_element_type=jnp.float32)

        xb = x_ref[...].astype(jnp.float32)               # (L0, in_channel)
        # scal_ref: (1, 4) = [bn1 scale, bn1 shift, res0-bn scale, res0-bn shift]
        h = xb * scal_ref[0:1, 0:1] + scal_ref[0:1, 1:2]  # x = self.bn1(x)
        res = xb * scal_ref[0:1, 2:3] + scal_ref[0:1, 3:4]  # block-0 residue BN

        idx = 0
        for blk in block_layout:
            cur = h
            for j in range(blk["n_convs"]):               # conv chain
                ksize, cin, _ = conv_cfg[idx]
                cur = conv_same(cur, wb_refs[2 * idx], wb_refs[2 * idx + 1],
                                ksize, cin)
                idx += 1
                if j < blk["n_convs"] - 1:                # no ReLU after last conv
                    cur = jnp.maximum(cur, 0.0)
            if blk["has_res_conv"]:                       # residue 1x1 conv + BN
                ksize, cin, _ = conv_cfg[idx]
                res = conv_same(res, wb_refs[2 * idx], wb_refs[2 * idx + 1],
                                ksize, cin)
                idx += 1
            # x += residue (block 0 broadcasts the 1-channel residue, as PyTorch)
            h = relu_pool(cur + res)
            res = h
        o_ref[...] = h.astype(o_ref.dtype)

    return kernel


# --------------------------- BN folding helpers ------------------------------

def _fold_conv_bn(conv, bn):
    """Fold inference BN into conv; returns w as (K*Cin, Cout), b as (1, Cout)."""
    scale = bn["gamma"] * jax.lax.rsqrt(bn["var"] + _EPS)
    ksize, cin, cout = conv["w"].shape
    w = (conv["w"] * scale[None, None, :]).reshape(ksize * cin, cout)
    b = ((conv["b"] - bn["mean"]) * scale + bn["beta"]).reshape(1, cout)
    return w.astype(jnp.float32), b.astype(jnp.float32)


def _fold_bn_scale_shift(bn):
    s = bn["gamma"] * jax.lax.rsqrt(bn["var"] + _EPS)
    t = bn["beta"] - bn["mean"] * s
    return s, t


# --------------------------- parameters --------------------------------------

def init_params(key, in_channel=1, num_filters=32, num_res_blocks=4,
                cnn_per_res=3, kernel_sizes=(8, 5, 3), max_filters=64):
    keys = iter(jax.random.split(key, 256))

    def bn_params(c):
        return dict(
            gamma=jax.random.uniform(next(keys), (c,), jnp.float32, 0.5, 1.5),
            beta=jax.random.normal(next(keys), (c,), jnp.float32) * 0.1,
            mean=jax.random.normal(next(keys), (c,), jnp.float32) * 0.1,
            var=jax.random.uniform(next(keys), (c,), jnp.float32, 0.5, 1.5),
        )

    def conv_params(cin, cout, k):
        bound = float(cin * k) ** -0.5      # PyTorch Conv1d default init bound
        return dict(
            w=jax.random.uniform(next(keys), (k, cin, cout), jnp.float32, -bound, bound),
            b=jax.random.uniform(next(keys), (cout,), jnp.float32, -bound, bound),
        )

    params = {"bn1": bn_params(in_channel), "blocks": []}
    in_planes, planes = in_channel, num_filters
    for i in range(num_res_blocks):
        block = {"convs": []}
        cur_in = in_planes
        for j in range(cnn_per_res):
            block["convs"].append(dict(conv=conv_params(cur_in, planes, kernel_sizes[j]),
                                       bn=bn_params(planes)))
            cur_in = planes
        if i == 0:
            block["residue"] = dict(bn=bn_params(in_planes))
        else:
            block["residue"] = dict(conv=conv_params(in_planes, planes, 1),
                                    bn=bn_params(planes))
        params["blocks"].append(block)
        in_planes = planes
        planes *= 2
        if planes > max_filters:
            planes = max_filters
    return params


# --------------------------- forward (one pallas_call) -----------------------

def single_channel_resnet_forward(x_ncl, params, pool_size=3, pool_stride=2):
    """Returns (input, x) like the PyTorch module. x_ncl is (B, C, L)."""
    inp = x_ncl                                        # `input = x.clone()`
    bsz, cin0, l0 = x_ncl.shape
    x = jnp.transpose(x_ncl, (0, 2, 1)).astype(jnp.float32)   # (B, L, C)

    # fold all inference BatchNorms into scales / conv weights (trace-time, tiny)
    s1, t1 = _fold_bn_scale_shift(params["bn1"])
    sr, tr = _fold_bn_scale_shift(params["blocks"][0]["residue"]["bn"])
    scalars = jnp.stack([s1[0], t1[0], sr[0], tr[0]]).reshape(1, 4).astype(jnp.float32)

    flat_wb, conv_cfg, block_layout = [], [], []
    c_out = cin0
    for blk in params["blocks"]:
        for cp in blk["convs"]:
            ksize, ci, co = cp["conv"]["w"].shape
            w2, b2 = _fold_conv_bn(cp["conv"], cp["bn"])
            conv_cfg.append((ksize, ci, co))
            flat_wb += [w2, b2]
            c_out = co
        has_res_conv = "conv" in blk["residue"]
        if has_res_conv:
            ksize, ci, co = blk["residue"]["conv"]["w"].shape
            w2, b2 = _fold_conv_bn(blk["residue"]["conv"], blk["residue"]["bn"])
            conv_cfg.append((ksize, ci, co))
            flat_wb += [w2, b2]
        block_layout.append({"n_convs": len(blk["convs"]),
                             "has_res_conv": has_res_conv})

    l_out = l0
    for _ in params["blocks"]:
        l_out = (l_out - pool_size) // pool_stride + 1

    n_conv = len(conv_cfg)
    k_max = max(k for k, _, _ in conv_cfg)
    c_max = max(max(ci for _, ci, _ in conv_cfg), c_out)
    f_max = max([k * ci for k, ci, _ in conv_cfg if k > 1] + [128])
    pad_rows = ((l0 + k_max - 1 + 7) // 8) * 8

    kern = _make_fused_kernel(conv_cfg, block_layout, pool_size, pool_stride, n_conv)

    def _whole(ndim):
        return lambda b: (0,) * ndim

    in_specs = [pl.BlockSpec((1, 4), _whole(2)),                        # BN scalars
                pl.BlockSpec((None, l0, cin0), lambda b: (b, 0, 0))]    # x, per batch
    in_specs += [pl.BlockSpec(a.shape, _whole(a.ndim)) for a in flat_wb]

    out = pl.pallas_call(
        kern,
        out_shape=jax.ShapeDtypeStruct((bsz, l_out, c_out), jnp.float32),
        grid_spec=pltpu.PrefetchScalarGridSpec(
            num_scalar_prefetch=0,
            grid=(bsz,),
            in_specs=in_specs,
            out_specs=pl.BlockSpec((None, l_out, c_out), lambda b: (b, 0, 0)),
            scratch_shapes=[
                pltpu.VMEM((pad_rows, c_max), jnp.float32),   # padded-input scratch
                pltpu.VMEM((l0, f_max), jnp.float32),         # im2col scratch
            ]),
        compiler_params=pltpu.CompilerParams(
            dimension_semantics=("parallel",)),
    )(scalars, x, *flat_wb)

    return inp, jnp.transpose(out, (0, 2, 1))          # back to (B, C, L_out)


# --------------------------------- main --------------------------------------

if __name__ == "__main__":
    key = jax.random.PRNGKey(0)
    k_x, k_p = jax.random.split(key)

    B, C, L = 2, 1, 64                                  # in_channel=1 as in module
    x = jax.random.normal(k_x, (B, C, L), jnp.float32)
    params = init_params(k_p)

    fwd = jax.jit(single_channel_resnet_forward)
    inp, out = fwd(x, params)
    out = jax.block_until_ready(out)
    inp = jax.block_until_ready(inp)

    # length after 4 x AvgPool1d(3, stride=2): 64 -> 31 -> 15 -> 7 -> 3; channels -> 64
    assert inp.shape == (B, C, L), inp.shape
    assert out.shape == (B, 64, 3), out.shape
    assert bool(jnp.all(jnp.isfinite(out)))
    print("KERNEL_OK")
</pallas_src>

<mosaic_0001>
module attributes {stable_mosaic.version = 11 : i64} {
  func.func @kernel(%arg0: i32, %arg1: memref<1x4xf32, #tpu.memory_space<vmem>>, %arg2: memref<1x64x1xf32, #tpu.memory_space<vmem>>, %arg3: memref<8x32xf32, #tpu.memory_space<vmem>>, %arg4: memref<1x32xf32, #tpu.memory_space<vmem>>, %arg5: memref<160x32xf32, #tpu.memory_space<vmem>>, %arg6: memref<1x32xf32, #tpu.memory_space<vmem>>, %arg7: memref<96x32xf32, #tpu.memory_space<vmem>>, %arg8: memref<1x32xf32, #tpu.memory_space<vmem>>, %arg9: memref<256x64xf32, #tpu.memory_space<vmem>>, %arg10: memref<1x64xf32, #tpu.memory_space<vmem>>, %arg11: memref<320x64xf32, #tpu.memory_space<vmem>>, %arg12: memref<1x64xf32, #tpu.memory_space<vmem>>, %arg13: memref<192x64xf32, #tpu.memory_space<vmem>>, %arg14: memref<1x64xf32, #tpu.memory_space<vmem>>, %arg15: memref<32x64xf32, #tpu.memory_space<vmem>>, %arg16: memref<1x64xf32, #tpu.memory_space<vmem>>, %arg17: memref<512x64xf32, #tpu.memory_space<vmem>>, %arg18: memref<1x64xf32, #tpu.memory_space<vmem>>, %arg19: memref<320x64xf32, #tpu.memory_space<vmem>>, %arg20: memref<1x64xf32, #tpu.memory_space<vmem>>, %arg21: memref<192x64xf32, #tpu.memory_space<vmem>>, %arg22: memref<1x64xf32, #tpu.memory_space<vmem>>, %arg23: memref<64x64xf32, #tpu.memory_space<vmem>>, %arg24: memref<1x64xf32, #tpu.memory_space<vmem>>, %arg25: memref<512x64xf32, #tpu.memory_space<vmem>>, %arg26: memref<1x64xf32, #tpu.memory_space<vmem>>, %arg27: memref<320x64xf32, #tpu.memory_space<vmem>>, %arg28: memref<1x64xf32, #tpu.memory_space<vmem>>, %arg29: memref<192x64xf32, #tpu.memory_space<vmem>>, %arg30: memref<1x64xf32, #tpu.memory_space<vmem>>, %arg31: memref<64x64xf32, #tpu.memory_space<vmem>>, %arg32: memref<1x64xf32, #tpu.memory_space<vmem>>, %arg33: memref<1x3x64xf32, #tpu.memory_space<vmem>>, %arg34: memref<72x64xf32, #tpu.memory_space<vmem>>, %arg35: memref<64x512xf32, #tpu.memory_space<vmem>>) attributes {dimension_semantics = [#tpu.dimension_semantics<parallel>], iteration_bounds = array<i64: 2>, scalar_prefetch = 0 : i64, scratch_operands = 2 : i64, tpu.core_type = #tpu.core_type<tc>, window_params = [{pipeline_mode = #tpu.pipeline_mode<synchronous>, transform_indices = @transform_0, window_bounds = array<i64: 1, 4>}, {transform_indices = @transform_1, window_bounds = array<i64: 1, 64, 1>}, {pipeline_mode = #tpu.pipeline_mode<synchronous>, transform_indices = @transform_2, window_bounds = array<i64: 8, 32>}, {pipeline_mode = #tpu.pipeline_mode<synchronous>, transform_indices = @transform_3, window_bounds = array<i64: 1, 32>}, {pipeline_mode = #tpu.pipeline_mode<synchronous>, transform_indices = @transform_4, window_bounds = array<i64: 160, 32>}, {pipeline_mode = #tpu.pipeline_mode<synchronous>, transform_indices = @transform_5, window_bounds = array<i64: 1, 32>}, {pipeline_mode = #tpu.pipeline_mode<synchronous>, transform_indices = @transform_6, window_bounds = array<i64: 96, 32>}, {pipeline_mode = #tpu.pipeline_mode<synchronous>, transform_indices = @transform_7, window_bounds = array<i64: 1, 32>}, {pipeline_mode = #tpu.pipeline_mode<synchronous>, transform_indices = @transform_8, window_bounds = array<i64: 256, 64>}, {pipeline_mode = #tpu.pipeline_mode<synchronous>, transform_indices = @transform_9, window_bounds = array<i64: 1, 64>}, {pipeline_mode = #tpu.pipeline_mode<synchronous>, transform_indices = @transform_10, window_bounds = array<i64: 320, 64>}, {pipeline_mode = #tpu.pipeline_mode<synchronous>, transform_indices = @transform_11, window_bounds = array<i64: 1, 64>}, {pipeline_mode = #tpu.pipeline_mode<synchronous>, transform_indices = @transform_12, window_bounds = array<i64: 192, 64>}, {pipeline_mode = #tpu.pipeline_mode<synchronous>, transform_indices = @transform_13, window_bounds = array<i64: 1, 64>}, {pipeline_mode = #tpu.pipeline_mode<synchronous>, transform_indices = @transform_14, window_bounds = array<i64: 32, 64>}, {pipeline_mode = #tpu.pipeline_mode<synchronous>, transform_indices = @transform_15, window_bounds = array<i64: 1, 64>}, {pipeline_mode = #tpu.pipeline_mode<synchronous>, transform_indices = @transform_16, window_bounds = array<i64: 512, 64>}, {pipeline_mode = #tpu.pipeline_mode<synchronous>, transform_indices = @transform_17, window_bounds = array<i64: 1, 64>}, {pipeline_mode = #tpu.pipeline_mode<synchronous>, transform_indices = @transform_18, window_bounds = array<i64: 320, 64>}, {pipeline_mode = #tpu.pipeline_mode<synchronous>, transform_indices = @transform_19, window_bounds = array<i64: 1, 64>}, {pipeline_mode = #tpu.pipeline_mode<synchronous>, transform_indices = @transform_20, window_bounds = array<i64: 192, 64>}, {pipeline_mode = #tpu.pipeline_mode<synchronous>, transform_indices = @transform_21, window_bounds = array<i64: 1, 64>}, {pipeline_mode = #tpu.pipeline_mode<synchronous>, transform_indices = @transform_22, window_bounds = array<i64: 64, 64>}, {pipeline_mode = #tpu.pipeline_mode<synchronous>, transform_indices = @transform_23, window_bounds = array<i64: 1, 64>}, {pipeline_mode = #tpu.pipeline_mode<synchronous>, transform_indices = @transform_24, window_bounds = array<i64: 512, 64>}, {pipeline_mode = #tpu.pipeline_mode<synchronous>, transform_indices = @transform_25, window_bounds = array<i64: 1, 64>}, {pipeline_mode = #tpu.pipeline_mode<synchronous>, transform_indices = @transform_26, window_bounds = array<i64: 320, 64>}, {pipeline_mode = #tpu.pipeline_mode<synchronous>, transform_indices = @transform_27, window_bounds = array<i64: 1, 64>}, {pipeline_mode = #tpu.pipeline_mode<synchronous>, transform_indices = @transform_28, window_bounds = array<i64: 192, 64>}, {pipeline_mode = #tpu.pipeline_mode<synchronous>, transform_indices = @transform_29, window_bounds = array<i64: 1, 64>}, {pipeline_mode = #tpu.pipeline_mode<synchronous>, transform_indices = @transform_30, window_bounds = array<i64: 64, 64>}, {pipeline_mode = #tpu.pipeline_mode<synchronous>, transform_indices = @transform_31, window_bounds = array<i64: 1, 64>}, {transform_indices = @transform_32, window_bounds = array<i64: 1, 3, 64>}]} {
    %c0 = arith.constant 0 : index
    %c0_0 = arith.constant 0 : index
    %c0_1 = arith.constant 0 : index
    %0 = vector.load %arg2[%c0, %c0_0, %c0_1] : memref<1x64x1xf32, #tpu.memory_space<vmem>>, vector<1x64x1xf32>
    %1 = vector.shape_cast %0 : vector<1x64x1xf32> to vector<64x1xf32>
    %c0_2 = arith.constant 0 : index
    %c0_3 = arith.constant 0 : index
    %2 = vector.load %arg1[%c0_2, %c0_3] : memref<1x4xf32, #tpu.memory_space<vmem>>, vector<1x1xf32>
    %3 = vector.broadcast %2 : vector<1x1xf32> to vector<64x1xf32>
    %4 = arith.mulf %1, %3 : vector<64x1xf32>
    %c0_4 = arith.constant 0 : index
    %c1 = arith.constant 1 : index
    %5 = vector.load %arg1[%c0_4, %c1] : memref<1x4xf32, #tpu.memory_space<vmem>>, vector<1x1xf32>
    %6 = vector.broadcast %5 : vector<1x1xf32> to vector<64x1xf32>
    %7 = arith.addf %4, %6 : vector<64x1xf32>
    %c0_5 = arith.constant 0 : index
    %c2 = arith.constant 2 : index
    %8 = vector.load %arg1[%c0_5, %c2] : memref<1x4xf32, #tpu.memory_space<vmem>>, vector<1x1xf32>
    %9 = vector.broadcast %8 : vector<1x1xf32> to vector<64x1xf32>
    %10 = arith.mulf %1, %9 : vector<64x1xf32>
    %c0_6 = arith.constant 0 : index
    %c3 = arith.constant 3 : index
    %11 = vector.load %arg1[%c0_6, %c3] : memref<1x4xf32, #tpu.memory_space<vmem>>, vector<1x1xf32>
    %12 = vector.broadcast %11 : vector<1x1xf32> to vector<64x1xf32>
    %13 = arith.addf %10, %12 : vector<64x1xf32>
    %cst = arith.constant 0.000000e+00 : f32
    %14 = vector.broadcast %cst : f32 to vector<3x1xf32>
    %c0_7 = arith.constant 0 : index
    %c0_8 = arith.constant 0 : index
    %15 = vector.load %arg34[%c0_7, %c0_8] : memref<72x64xf32, #tpu.memory_space<vmem>>, vector<3x1xf32>
    tpu.vector_store %arg34[%c0_7, %c0_8], %14 {strides = array<i32>} : memref<72x64xf32, #tpu.memory_space<vmem>>, vector<3x1xf32>,
    %c3_9 = arith.constant 3 : index
    %c0_10 = arith.constant 0 : index
    %16 = vector.load %arg34[%c3_9, %c0_10] : memref<72x64xf32, #tpu.memory_space<vmem>>, vector<64x1xf32>
    tpu.vector_store %arg34[%c3_9, %c0_10], %7 {strides = array<i32>} : memref<72x64xf32, #tpu.memory_space<vmem>>, vector<64x1xf32>,
    %cst_11 = arith.constant 0.000000e+00 : f32
    %17 = vector.broadcast %cst_11 : f32 to vector<4x1xf32>
    %c67 = arith.constant 67 : index
    %c0_12 = arith.constant 0 : index
    %18 = vector.load %arg34[%c67, %c0_12] : memref<72x64xf32, #tpu.memory_space<vmem>>, vector<4x1xf32>
    tpu.vector_store %arg34[%c67, %c0_12], %17 {strides = array<i32>} : memref<72x64xf32, #tpu.memory_space<vmem>>, vector<4x1xf32>,
    %c0_13 = arith.constant 0 : index
    %c0_14 = arith.constant 0 : index
    %19 = vector.load %arg34[%c0_13, %c0_14] : memref<72x64xf32, #tpu.memory_space<vmem>>, vector<64x1xf32>
    %c0_15 = arith.constant 0 : index
    %c0_16 = arith.constant 0 : index
    %20 = vector.load %arg35[%c0_15, %c0_16] : memref<64x512xf32, #tpu.memory_space<vmem>>, vector<64x1xf32>
    tpu.vector_store %arg35[%c0_15, %c0_16], %19 {strides = array<i32>} : memref<64x512xf32, #tpu.memory_space<vmem>>, vector<64x1xf32>,
    %c1_17 = arith.constant 1 : index
    %c0_18 = arith.constant 0 : index
    %21 = vector.load %arg34[%c1_17, %c0_18] : memref<72x64xf32, #tpu.memory_space<vmem>>, vector<64x1xf32>
    %c0_19 = arith.constant 0 : index
    %c1_20 = arith.constant 1 : index
    %22 = vector.load %arg35[%c0_19, %c1_20] : memref<64x512xf32, #tpu.memory_space<vmem>>, vector<64x1xf32>
    tpu.vector_store %arg35[%c0_19, %c1_20], %21 {strides = array<i32>} : memref<64x512xf32, #tpu.memory_space<vmem>>, vector<64x1xf32>,
    %c2_21 = arith.constant 2 : index
    %c0_22 = arith.constant 0 : index
    %23 = vector.load %arg34[%c2_21, %c0_22] : memref<72x64xf32, #tpu.memory_space<vmem>>, vector<64x1xf32>
    %c0_23 = arith.constant 0 : index
    %c2_24 = arith.constant 2 : index
    %24 = vector.load %arg35[%c0_23, %c2_24] : memref<64x512xf32, #tpu.memory_space<vmem>>, vector<64x1xf32>
    tpu.vector_store %arg35[%c0_23, %c2_24], %23 {strides = array<i32>} : memref<64x512xf32, #tpu.memory_space<vmem>>, vector<64x1xf32>,
    %c3_25 = arith.constant 3 : index
    %c0_26 = arith.constant 0 : index
    %25 = vector.load %arg34[%c3_25, %c0_26] : memref<72x64xf32, #tpu.memory_space<vmem>>, vector<64x1xf32>
    %c0_27 = arith.constant 0 : index
    %c3_28 = arith.constant 3 : index
    %26 = vector.load %arg35[%c0_27, %c3_28] : memref<64x512xf32, #tpu.memory_space<vmem>>, vector<64x1xf32>
    tpu.vector_store %arg35[%c0_27, %c3_28], %25 {strides = array<i32>} : memref<64x512xf32, #tpu.memory_space<vmem>>, vector<64x1xf32>,
    %c4 = arith.constant 4 : index
    %c0_29 = arith.constant 0 : index
    %27 = vector.load %arg34[%c4, %c0_29] : memref<72x64xf32, #tpu.memory_space<vmem>>, vector<64x1xf32>
    %c0_30 = arith.constant 0 : index
    %c4_31 = arith.constant 4 : index
    %28 = vector.load %arg35[%c0_30, %c4_31] : memref<64x512xf32, #tpu.memory_space<vmem>>, vector<64x1xf32>
    tpu.vector_store %arg35[%c0_30, %c4_31], %27 {strides = array<i32>} : memref<64x512xf32, #tpu.memory_space<vmem>>, vector<64x1xf32>,
    %c5 = arith.constant 5 : index
    %c0_32 = arith.constant 0 : index
    %29 = vector.load %arg34[%c5, %c0_32] : memref<72x64xf32, #tpu.memory_space<vmem>>, vector<64x1xf32>
    %c0_33 = arith.constant 0 : index
    %c5_34 = arith.constant 5 : index
    %30 = vector.load %arg35[%c0_33, %c5_34] : memref<64x512xf32, #tpu.memory_space<vmem>>, vector<64x1xf32>
    tpu.vector_store %arg35[%c0_33, %c5_34], %29 {strides = array<i32>} : memref<64x512xf32, #tpu.memory_space<vmem>>, vector<64x1xf32>,
    %c6 = arith.constant 6 : index
    %c0_35 = arith.constant 0 : index
    %31 = vector.load %arg34[%c6, %c0_35] : memref<72x64xf32, #tpu.memory_space<vmem>>, vector<64x1xf32>
    %c0_36 = arith.constant 0 : index
    %c6_37 = arith.constant 6 : index
    %32 = vector.load %arg35[%c0_36, %c6_37] : memref<64x512xf32, #tpu.memory_space<vmem>>, vector<64x1xf32>
    tpu.vector_store %arg35[%c0_36, %c6_37], %31 {strides = array<i32>} : memref<64x512xf32, #tpu.memory_space<vmem>>, vector<64x1xf32>,
    %c7 = arith.constant 7 : index
    %c0_38 = arith.constant 0 : index
    %33 = vector.load %arg34[%c7, %c0_38] : memref<72x64xf32, #tpu.memory_space<vmem>>, vector<64x1xf32>
    %c0_39 = arith.constant 0 : index
    %c7_40 = arith.constant 7 : index
    %34 = vector.load %arg35[%c0_39, %c7_40] : memref<64x512xf32, #tpu.memory_space<vmem>>, vector<64x1xf32>
    tpu.vector_store %arg35[%c0_39, %c7_40], %33 {strides = array<i32>} : memref<64x512xf32, #tpu.memory_space<vmem>>, vector<64x1xf32>,
    %c0_41 = arith.constant 0 : index
    %c0_42 = arith.constant 0 : index
    %35 = vector.load %arg35[%c0_41, %c0_42] : memref<64x512xf32, #tpu.memory_space<vmem>>, vector<64x8xf32>
    %c0_43 = arith.constant 0 : index
    %c0_44 = arith.constant 0 : index
    %36 = vector.load %arg3[%c0_43, %c0_44] : memref<8x32xf32, #tpu.memory_space<vmem>>, vector<8x32xf32>
    %cst_45 = arith.constant dense<0.000000e+00> : vector<64x32xf32>
    %37 = tpu.matmul %35, %36, %cst_45 {dimension_numbers = #tpu.dot_dimension_numbers<[1], [0], [0], [1], [0, 0, 1, 1], [], []>} : vector<64x8xf32>, vector<8x32xf32>, vector<64x32xf32> -> vector<64x32xf32>
    %c0_46 = arith.constant 0 : index
    %c0_47 = arith.constant 0 : index
    %38 = vector.load %arg4[%c0_46, %c0_47] : memref<1x32xf32, #tpu.memory_space<vmem>>, vector<1x32xf32>
    %39 = vector.broadcast %38 : vector<1x32xf32> to vector<64x32xf32>
    %40 = arith.addf %37, %39 : vector<64x32xf32>
    %cst_48 = arith.constant 0.000000e+00 : f32
    %41 = vector.broadcast %cst_48 : f32 to vector<64x32xf32>
    %42 = arith.maximumf %40, %41 : vector<64x32xf32>
    %cst_49 = arith.constant 0.000000e+00 : f32
    %43 = vector.broadcast %cst_49 : f32 to vector<2x32xf32>
    %c0_50 = arith.constant 0 : index
    %c0_51 = arith.constant 0 : index
    %44 = vector.load %arg34[%c0_50, %c0_51] : memref<72x64xf32, #tpu.memory_space<vmem>>, vector<2x32xf32>
    tpu.vector_store %arg34[%c0_50, %c0_51], %43 {strides = array<i32>} : memref<72x64xf32, #tpu.memory_space<vmem>>, vector<2x32xf32>,
    %c2_52 = arith.constant 2 : index
    %c0_53 = arith.constant 0 : index
    %45 = vector.load %arg34[%c2_52, %c0_53] : memref<72x64xf32, #tpu.memory_space<vmem>>, vector<64x32xf32>
    tpu.vector_store %arg34[%c2_52, %c0_53], %42 {strides = array<i32>} : memref<72x64xf32, #tpu.memory_space<vmem>>, vector<64x32xf32>,
    %cst_54 = arith.constant 0.000000e+00 : f32
    %46 = vector.broadcast %cst_54 : f32 to vector<2x32xf32>
    %c66 = arith.constant 66 : index
    %c0_55 = arith.constant 0 : index
    %47 = vector.load %arg34[%c66, %c0_55] : memref<72x64xf32, #tpu.memory_space<vmem>>, vector<2x32xf32>
    tpu.vector_store %arg34[%c66, %c0_55], %46 {strides = array<i32>} : memref<72x64xf32, #tpu.memory_space<vmem>>, vector<2x32xf32>,
    %c0_56 = arith.constant 0 : index
    %c0_57 = arith.constant 0 : index
    %48 = vector.load %arg34[%c0_56, %c0_57] : memref<72x64xf32, #tpu.memory_space<vmem>>, vector<64x32xf32>
    %c0_58 = arith.constant 0 : index
    %c0_59 = arith.constant 0 : index
    %49 = vector.load %arg35[%c0_58, %c0_59] : memref<64x512xf32, #tpu.memory_space<vmem>>, vector<64x32xf32>
    tpu.vector_store %arg35[%c0_58, %c0_59], %48 {strides = array<i32>} : memref<64x512xf32, #tpu.memory_space<vmem>>, vector<64x32xf32>,
    %c1_60 = arith.constant 1 : index
    %c0_61 = arith.constant 0 : index
    %50 = vector.load %arg34[%c1_60, %c0_61] : memref<72x64xf32, #tpu.memory_space<vmem>>, vector<64x32xf32>
    %c0_62 = arith.constant 0 : index
    %c32 = arith.constant 32 : index
    %51 = vector.load %arg35[%c0_62, %c32] : memref<64x512xf32, #tpu.memory_space<vmem>>, vector<64x32xf32>
    tpu.vector_store %arg35[%c0_62, %c32], %50 {strides = array<i32>} : memref<64x512xf32, #tpu.memory_space<vmem>>, vector<64x32xf32>,
    %c2_63 = arith.constant 2 : index
    %c0_64 = arith.constant 0 : index
    %52 = vector.load %arg34[%c2_63, %c0_64] : memref<72x64xf32, #tpu.memory_space<vmem>>, vector<64x32xf32>
    %c0_65 = arith.constant 0 : index
    %c64 = arith.constant 64 : index
    %53 = vector.load %arg35[%c0_65, %c64] : memref<64x512xf32, #tpu.memory_space<vmem>>, vector<64x32xf32>
    tpu.vector_store %arg35[%c0_65, %c64], %52 {strides = array<i32>} : memref<64x512xf32, #tpu.memory_space<vmem>>, vector<64x32xf32>,
    %c3_66 = arith.constant 3 : index
    %c0_67 = arith.constant 0 : index
    %54 = vector.load %arg34[%c3_66, %c0_67] : memref<72x64xf32, #tpu.memory_space<vmem>>, vector<64x32xf32>
    %c0_68 = arith.constant 0 : index
    %c96 = arith.constant 96 : index
    %55 = vector.load %arg35[%c0_68, %c96] : memref<64x512xf32, #tpu.memory_space<vmem>>, vector<64x32xf32>
    tpu.vector_store %arg35[%c0_68, %c96], %54 {strides = array<i32>} : memref<64x512xf32, #tpu.memory_space<vmem>>, vector<64x32xf32>,
    %c4_69 = arith.constant 4 : index
    %c0_70 = arith.constant 0 : index
    %56 = vector.load %arg34[%c4_69, %c0_70] : memref<72x64xf32, #tpu.memory_space<vmem>>, vector<64x32xf32>
    %c0_71 = arith.constant 0 : index
    %c128 = arith.constant 128 : index
    %57 = vector.load %arg35[%c0_71, %c128] : memref<64x512xf32, #tpu.memory_space<vmem>>, vector<64x32xf32>
    tpu.vector_store %arg35[%c0_71, %c128], %56 {strides = array<i32>} : memref<64x512xf32, #tpu.memory_space<vmem>>, vector<64x32xf32>,
    %c0_72 = arith.constant 0 : index
    %c0_73 = arith.constant 0 : index
    %58 = vector.load %arg35[%c0_72, %c0_73] : memref<64x512xf32, #tpu.memory_space<vmem>>, vector<64x160xf32>
    %c0_74 = arith.constant 0 : index
    %c0_75 = arith.constant 0 : index
    %59 = vector.load %arg5[%c0_74, %c0_75] : memref<160x32xf32, #tpu.memory_space<vmem>>, vector<160x32xf32>
    %cst_76 = arith.constant dense<0.000000e+00> : vector<64x32xf32>
    %60 = tpu.matmul %58, %59, %cst_76 {dimension_numbers = #tpu.dot_dimension_numbers<[1], [0], [0], [1], [0, 0, 1, 1], [], []>} : vector<64x160xf32>, vector<160x32xf32>, vector<64x32xf32> -> vector<64x32xf32>
    %c0_77 = arith.constant 0 : index
    %c0_78 = arith.constant 0 : index
    %61 = vector.load %arg6[%c0_77, %c0_78] : memref<1x32xf32, #tpu.memory_space<vmem>>, vector<1x32xf32>
    %62 = vector.broadcast %61 : vector<1x32xf32> to vector<64x32xf32>
    %63 = arith.addf %60, %62 : vector<64x32xf32>
    %cst_79 = arith.constant 0.000000e+00 : f32
    %64 = vector.broadcast %cst_79 : f32 to vector<64x32xf32>
    %65 = arith.maximumf %63, %64 : vector<64x32xf32>
    %cst_80 = arith.constant 0.000000e+00 : f32
    %66 = vector.broadcast %cst_80 : f32 to vector<1x32xf32>
    %c0_81 = arith.constant 0 : index
    %c0_82 = arith.constant 0 : index
    %67 = vector.load %arg34[%c0_81, %c0_82] : memref<72x64xf32, #tpu.memory_space<vmem>>, vector<1x32xf32>
    tpu.vector_store %arg34[%c0_81, %c0_82], %66 {strides = array<i32>} : memref<72x64xf32, #tpu.memory_space<vmem>>, vector<1x32xf32>,
    %c1_83 = arith.constant 1 : index
    %c0_84 = arith.constant 0 : index
    %68 = vector.load %arg34[%c1_83, %c0_84] : memref<72x64xf32, #tpu.memory_space<vmem>>, vector<64x32xf32>
    tpu.vector_store %arg34[%c1_83, %c0_84], %65 {strides = array<i32>} : memref<72x64xf32, #tpu.memory_space<vmem>>, vector<64x32xf32>,
    %cst_85 = arith.constant 0.000000e+00 : f32
    %69 = vector.broadcast %cst_85 : f32 to vector<1x32xf32>
    %c65 = arith.constant 65 : index
    %c0_86 = arith.constant 0 : index
    %70 = vector.load %arg34[%c65, %c0_86] : memref<72x64xf32, #tpu.memory_space<vmem>>, vector<1x32xf32>
    tpu.vector_store %arg34[%c65, %c0_86], %69 {strides = array<i32>} : memref<72x64xf32, #tpu.memory_space<vmem>>, vector<1x32xf32>,
    %c0_87 = arith.constant 0 : index
    %c0_88 = arith.constant 0 : index
    %71 = vector.load %arg34[%c0_87, %c0_88] : memref<72x64xf32, #tpu.memory_space<vmem>>, vector<64x32xf32>
    %c0_89 = arith.constant 0 : index
    %c0_90 = arith.constant 0 : index
    %72 = vector.load %arg35[%c0_89, %c0_90] : memref<64x512xf32, #tpu.memory_space<vmem>>, vector<64x32xf32>
    tpu.vector_store %arg35[%c0_89, %c0_90], %71 {strides = array<i32>} : memref<64x512xf32, #tpu.memory_space<vmem>>, vector<64x32xf32>,
    %c1_91 = arith.constant 1 : index
    %c0_92 = arith.constant 0 : index
    %73 = vector.load %arg34[%c1_91, %c0_92] : memref<72x64xf32, #tpu.memory_space<vmem>>, vector<64x32xf32>
    %c0_93 = arith.constant 0 : index
    %c32_94 = arith.constant 32 : index
    %74 = vector.load %arg35[%c0_93, %c32_94] : memref<64x512xf32, #tpu.memory_space<vmem>>, vector<64x32xf32>
    tpu.vector_store %arg35[%c0_93, %c32_94], %73 {strides = array<i32>} : memref<64x512xf32, #tpu.memory_space<vmem>>, vector<64x32xf32>,
    %c2_95 = arith.constant 2 : index
    %c0_96 = arith.constant 0 : index
    %75 = vector.load %arg34[%c2_95, %c0_96] : memref<72x64xf32, #tpu.memory_space<vmem>>, vector<64x32xf32>
    %c0_97 = arith.constant 0 : index
    %c64_98 = arith.constant 64 : index
    %76 = vector.load %arg35[%c0_97, %c64_98] : memref<64x512xf32, #tpu.memory_space<vmem>>, vector<64x32xf32>
    tpu.vector_store %arg35[%c0_97, %c64_98], %75 {strides = array<i32>} : memref<64x512xf32, #tpu.memory_space<vmem>>, vector<64x32xf32>,
    %c0_99 = arith.constant 0 : index
    %c0_100 = arith.constant 0 : index
    %77 = vector.load %arg35[%c0_99, %c0_100] : memref<64x512xf32, #tpu.memory_space<vmem>>, vector<64x96xf32>
    %c0_101 = arith.constant 0 : index
    %c0_102 = arith.constant 0 : index
    %78 = vector.load %arg7[%c0_101, %c0_102] : memref<96x32xf32, #tpu.memory_space<vmem>>, vector<96x32xf32>
    %cst_103 = arith.constant dense<0.000000e+00> : vector<64x32xf32>
    %79 = tpu.matmul %77, %78, %cst_103 {dimension_numbers = #tpu.dot_dimension_numbers<[1], [0], [0], [1], [0, 0, 1, 1], [], []>} : vector<64x96xf32>, vector<96x32xf32>, vector<64x32xf32> -> vector<64x32xf32>
    %c0_104 = arith.constant 0 : index
    %c0_105 = arith.constant 0 : index
    %80 = vector.load %arg8[%c0_104, %c0_105] : memref<1x32xf32, #tpu.memory_space<vmem>>, vector<1x32xf32>
    %81 = vector.broadcast %80 : vector<1x32xf32> to vector<64x32xf32>
    %82 = arith.addf %79, %81 : vector<64x32xf32>
    %83 = vector.broadcast %13 : vector<64x1xf32> to vector<64x32xf32>
    %84 = arith.addf %82, %83 : vector<64x32xf32>
    %cst_106 = arith.constant 0.000000e+00 : f32
    %85 = vector.broadcast %cst_106 : f32 to vector<64x32xf32>
    %86 = arith.maximumf %84, %85 : vector<64x32xf32>
    %87 = tpu.iota {dimensions = array<i32: 0>} : vector<31x64xi32>
    %88 = tpu.iota {dimensions = array<i32: 1>} : vector<31x64xi32>
    %c2_i32 = arith.constant 2 : i32
    %89 = vector.broadcast %c2_i32 : i32 to vector<31x64xi32>
    %90 = arith.muli %89, %87 : vector<31x64xi32>
    %91 = arith.cmpi sge, %88, %90 : vector<31x64xi32>
    %c2_i32_107 = arith.constant 2 : i32
    %92 = vector.broadcast %c2_i32_107 : i32 to vector<31x64xi32>
    %93 = arith.muli %92, %87 : vector<31x64xi32>
    %c3_i32 = arith.constant 3 : i32
    %94 = vector.broadcast %c3_i32 : i32 to vector<31x64xi32>
    %95 = arith.addi %93, %94 : vector<31x64xi32>
    %96 = arith.cmpi slt, %88, %95 : vector<31x64xi32>
    %97 = arith.andi %91, %96 : vector<31x64xi1>
    %cst_108 = arith.constant 0.333333343 : f32
    %cst_109 = arith.constant 0.000000e+00 : f32
    %98 = vector.broadcast %cst_108 : f32 to vector<31x64xf32>
    %99 = vector.broadcast %cst_109 : f32 to vector<31x64xf32>
    %100 = arith.select %97, %98, %99 : vector<31x64xi1>, vector<31x64xf32>
    %cst_110 = arith.constant dense<0.000000e+00> : vector<31x32xf32>
    %101 = tpu.matmul %100, %86, %cst_110 {dimension_numbers = #tpu.dot_dimension_numbers<[1], [0], [0], [1], [0, 0, 1, 1], [], []>} : vector<31x64xf32>, vector<64x32xf32>, vector<31x32xf32> -> vector<31x32xf32>
    %cst_111 = arith.constant 0.000000e+00 : f32
    %102 = vector.broadcast %cst_111 : f32 to vector<3x32xf32>
    %c0_112 = arith.constant 0 : index
    %c0_113 = arith.constant 0 : index
    %103 = vector.load %arg34[%c0_112, %c0_113] : memref<72x64xf32, #tpu.memory_space<vmem>>, vector<3x32xf32>
    tpu.vector_store %arg34[%c0_112, %c0_113], %102 {strides = array<i32>} : memref<72x64xf32, #tpu.memory_space<vmem>>, vector<3x32xf32>,
    %c3_114 = arith.constant 3 : index
    %c0_115 = arith.constant 0 : index
    %104 = vector.load %arg34[%c3_114, %c0_115] : memref<72x64xf32, #tpu.memory_space<vmem>>, vector<31x32xf32>
    tpu.vector_store %arg34[%c3_114, %c0_115], %101 {strides = array<i32>} : memref<72x64xf32, #tpu.memory_space<vmem>>, vector<31x32xf32>,
    %cst_116 = arith.constant 0.000000e+00 : f32
    %105 = vector.broadcast %cst_116 : f32 to vector<4x32xf32>
    %c34 = arith.constant 34 : index
    %c0_117 = arith.constant 0 : index
    %106 = vector.load %arg34[%c34, %c0_117] : memref<72x64xf32, #tpu.memory_space<vmem>>, vector<4x32xf32>
    tpu.vector_store %arg34[%c34, %c0_117], %105 {strides = array<i32>} : memref<72x64xf32, #tpu.memory_space<vmem>>, vector<4x32xf32>,
    %c0_118 = arith.constant 0 : index
    %c0_119 = arith.constant 0 : index
    %107 = vector.load %arg34[%c0_118, %c0_119] : memref<72x64xf32, #tpu.memory_space<vmem>>, vector<31x32xf32>
    %c0_120 = arith.constant 0 : index
    %c0_121 = arith.constant 0 : index
    %108 = vector.load %arg35[%c0_120, %c0_121] : memref<64x512xf32, #tpu.memory_space<vmem>>, vector<31x32xf32>
    tpu.vector_store %arg35[%c0_120, %c0_121], %107 {strides = array<i32>} : memref<64x512xf32, #tpu.memory_space<vmem>>, vector<31x32xf32>,
    %c1_122 = arith.constant 1 : index
    %c0_123 = arith.constant 0 : index
    %109 = vector.load %arg34[%c1_122, %c0_123] : memref<72x64xf32, #tpu.memory_space<vmem>>, vector<31x32xf32>
    %c0_124 = arith.constant 0 : index
    %c32_125 = arith.constant 32 : index
    %110 = vector.load %arg35[%c0_124, %c32_125] : memref<64x512xf32, #tpu.memory_space<vmem>>, vector<31x32xf32>
    tpu.vector_store %arg35[%c0_124, %c32_125], %109 {strides = array<i32>} : memref<64x512xf32, #tpu.memory_space<vmem>>, vector<31x32xf32>,
    %c2_126 = arith.constant 2 : index
    %c0_127 = arith.constant 0 : index
    %111 = vector.load %arg34[%c2_126, %c0_127] : memref<72x64xf32, #tpu.memory_space<vmem>>, vector<31x32xf32>
    %c0_128 = arith.constant 0 : index
    %c64_129 = arith.constant 64 : index
    %112 = vector.load %arg35[%c0_128, %c64_129] : memref<64x512xf32, #tpu.memory_space<vmem>>, vector<31x32xf32>
    tpu.vector_store %arg35[%c0_128, %c64_129], %111 {strides = array<i32>} : memref<64x512xf32, #tpu.memory_space<vmem>>, vector<31x32xf32>,
    %c3_130 = arith.constant 3 : index
    %c0_131 = arith.constant 0 : index
    %113 = vector.load %arg34[%c3_130, %c0_131] : memref<72x64xf32, #tpu.memory_space<vmem>>, vector<31x32xf32>
    %c0_132 = arith.constant 0 : index
    %c96_133 = arith.constant 96 : index
    %114 = vector.load %arg35[%c0_132, %c96_133] : memref<64x512xf32, #tpu.memory_space<vmem>>, vector<31x32xf32>
    tpu.vector_store %arg35[%c0_132, %c96_133], %113 {strides = array<i32>} : memref<64x512xf32, #tpu.memory_space<vmem>>, vector<31x32xf32>,
    %c4_134 = arith.constant 4 : index
    %c0_135 = arith.constant 0 : index
    %115 = vector.load %arg34[%c4_134, %c0_135] : memref<72x64xf32, #tpu.memory_space<vmem>>, vector<31x32xf32>
    %c0_136 = arith.constant 0 : index
    %c128_137 = arith.constant 128 : index
    %116 = vector.load %arg35[%c0_136, %c128_137] : memref<64x512xf32, #tpu.memory_space<vmem>>, vector<31x32xf32>
    tpu.vector_store %arg35[%c0_136, %c128_137], %115 {strides = array<i32>} : memref<64x512xf32, #tpu.memory_space<vmem>>, vector<31x32xf32>,
    %c5_138 = arith.constant 5 : index
    %c0_139 = arith.constant 0 : index
    %117 = vector.load %arg34[%c5_138, %c0_139] : memref<72x64xf32, #tpu.memory_space<vmem>>, vector<31x32xf32>
    %c0_140 = arith.constant 0 : index
    %c160 = arith.constant 160 : index
    %118 = vector.load %arg35[%c0_140, %c160] : memref<64x512xf32, #tpu.memory_space<vmem>>, vector<31x32xf32>
    tpu.vector_store %arg35[%c0_140, %c160], %117 {strides = array<i32>} : memref<64x512xf32, #tpu.memory_space<vmem>>, vector<31x32xf32>,
    %c6_141 = arith.constant 6 : index
    %c0_142 = arith.constant 0 : index
    %119 = vector.load %arg34[%c6_141, %c0_142] : memref<72x64xf32, #tpu.memory_space<vmem>>, vector<31x32xf32>
    %c0_143 = arith.constant 0 : index
    %c192 = arith.constant 192 : index
    %120 = vector.load %arg35[%c0_143, %c192] : memref<64x512xf32, #tpu.memory_space<vmem>>, vector<31x32xf32>
    tpu.vector_store %arg35[%c0_143, %c192], %119 {strides = array<i32>} : memref<64x512xf32, #tpu.memory_space<vmem>>, vector<31x32xf32>,
    %c7_144 = arith.constant 7 : index
    %c0_145 = arith.constant 0 : index
    %121 = vector.load %arg34[%c7_144, %c0_145] : memref<72x64xf32, #tpu.memory_space<vmem>>, vector<31x32xf32>
    %c0_146 = arith.constant 0 : index
    %c224 = arith.constant 224 : index
    %122 = vector.load %arg35[%c0_146, %c224] : memref<64x512xf32, #tpu.memory_space<vmem>>, vector<31x32xf32>
    tpu.vector_store %arg35[%c0_146, %c224], %121 {strides = array<i32>} : memref<64x512xf32, #tpu.memory_space<vmem>>, vector<31x32xf32>,
    %c0_147 = arith.constant 0 : index
    %c0_148 = arith.constant 0 : index
    %123 = vector.load %arg35[%c0_147, %c0_148] : memref<64x512xf32, #tpu.memory_space<vmem>>, vector<31x256xf32>
    %c0_149 = arith.constant 0 : index
    %c0_150 = arith.constant 0 : index
    %124 = vector.load %arg9[%c0_149, %c0_150] : memref<256x64xf32, #tpu.memory_space<vmem>>, vector<256x64xf32>
    %cst_151 = arith.constant dense<0.000000e+00> : vector<31x64xf32>
    %125 = tpu.matmul %123, %124, %cst_151 {dimension_numbers = #tpu.dot_dimension_numbers<[1], [0], [0], [1], [0, 0, 1, 1], [], []>} : vector<31x256xf32>, vector<256x64xf32>, vector<31x64xf32> -> vector<31x64xf32>
    %c0_152 = arith.constant 0 : index
    %c0_153 = arith.constant 0 : index
    %126 = vector.load %arg10[%c0_152, %c0_153] : memref<1x64xf32, #tpu.memory_space<vmem>>, vector<1x64xf32>
    %127 = vector.broadcast %126 : vector<1x64xf32> to vector<31x64xf32>
    %128 = arith.addf %125, %127 : vector<31x64xf32>
    %cst_154 = arith.constant 0.000000e+00 : f32
    %129 = vector.broadcast %cst_154 : f32 to vector<31x64xf32>
    %130 = arith.maximumf %128, %129 : vector<31x64xf32>
    %cst_155 = arith.constant 0.000000e+00 : f32
    %131 = vector.broadcast %cst_155 : f32 to vector<2x64xf32>
    %c0_156 = arith.constant 0 : index
    %c0_157 = arith.constant 0 : index
    %132 = vector.load %arg34[%c0_156, %c0_157] : memref<72x64xf32, #tpu.memory_space<vmem>>, vector<2x64xf32>
    tpu.vector_store %arg34[%c0_156, %c0_157], %131 {strides = array<i32>} : memref<72x64xf32, #tpu.memory_space<vmem>>, vector<2x64xf32>,
    %c2_158 = arith.constant 2 : index
    %c0_159 = arith.constant 0 : index
    %133 = vector.load %arg34[%c2_158, %c0_159] : memref<72x64xf32, #tpu.memory_space<vmem>>, vector<31x64xf32>
    tpu.vector_store %arg34[%c2_158, %c0_159], %130 {strides = array<i32>} : memref<72x64xf32, #tpu.memory_space<vmem>>, vector<31x64xf32>,
    %cst_160 = arith.constant 0.000000e+00 : f32
    %134 = vector.broadcast %cst_160 : f32 to vector<2x64xf32>
    %c33 = arith.constant 33 : index
    %c0_161 = arith.constant 0 : index
    %135 = vector.load %arg34[%c33, %c0_161] : memref<72x64xf32, #tpu.memory_space<vmem>>, vector<2x64xf32>
    tpu.vector_store %arg34[%c33, %c0_161], %134 {strides = array<i32>} : memref<72x64xf32, #tpu.memory_space<vmem>>, vector<2x64xf32>,
    %c0_162 = arith.constant 0 : index
    %c0_163 = arith.constant 0 : index
    %136 = vector.load %arg34[%c0_162, %c0_163] : memref<72x64xf32, #tpu.memory_space<vmem>>, vector<31x64xf32>
    %c0_164 = arith.constant 0 : index
    %c0_165 = arith.constant 0 : index
    %137 = vector.load %arg35[%c0_164, %c0_165] : memref<64x512xf32, #tpu.memory_space<vmem>>, vector<31x64xf32>
    tpu.vector_store %arg35[%c0_164, %c0_165], %136 {strides = array<i32>} : memref<64x512xf32, #tpu.memory_space<vmem>>, vector<31x64xf32>,
    %c1_166 = arith.constant 1 : index
    %c0_167 = arith.constant 0 : index
    %138 = vector.load %arg34[%c1_166, %c0_167] : memref<72x64xf32, #tpu.memory_space<vmem>>, vector<31x64xf32>
    %c0_168 = arith.constant 0 : index
    %c64_169 = arith.constant 64 : index
    %139 = vector.load %arg35[%c0_168, %c64_169] : memref<64x512xf32, #tpu.memory_space<vmem>>, vector<31x64xf32>
    tpu.vector_store %arg35[%c0_168, %c64_169], %138 {strides = array<i32>} : memref<64x512xf32, #tpu.memory_space<vmem>>, vector<31x64xf32>,
    %c2_170 = arith.constant 2 : index
    %c0_171 = arith.constant 0 : index
    %140 = vector.load %arg34[%c2_170, %c0_171] : memref<72x64xf32, #tpu.memory_space<vmem>>, vector<31x64xf32>
    %c0_172 = arith.constant 0 : index
    %c128_173 = arith.constant 128 : index
    %141 = vector.load %arg35[%c0_172, %c128_173] : memref<64x512xf32, #tpu.memory_space<vmem>>, vector<31x64xf32>
    tpu.vector_store %arg35[%c0_172, %c128_173], %140 {strides = array<i32>} : memref<64x512xf32, #tpu.memory_space<vmem>>, vector<31x64xf32>,
    %c3_174 = arith.constant 3 : index
    %c0_175 = arith.constant 0 : index
    %142 = vector.load %arg34[%c3_174, %c0_175] : memref<72x64xf32, #tpu.memory_space<vmem>>, vector<31x64xf32>
    %c0_176 = arith.constant 0 : index
    %c192_177 = arith.constant 192 : index
    %143 = vector.load %arg35[%c0_176, %c192_177] : memref<64x512xf32, #tpu.memory_space<vmem>>, vector<31x64xf32>
    tpu.vector_store %arg35[%c0_176, %c192_177], %142 {strides = array<i32>} : memref<64x512xf32, #tpu.memory_space<vmem>>, vector<31x64xf32>,
    %c4_178 = arith.constant 4 : index
    %c0_179 = arith.constant 0 : index
    %144 = vector.load %arg34[%c4_178, %c0_179] : memref<72x64xf32, #tpu.memory_space<vmem>>, vector<31x64xf32>
    %c0_180 = arith.constant 0 : index
    %c256 = arith.constant 256 : index
    %145 = vector.load %arg35[%c0_180, %c256] : memref<64x512xf32, #tpu.memory_space<vmem>>, vector<31x64xf32>
    tpu.vector_store %arg35[%c0_180, %c256], %144 {strides = array<i32>} : memref<64x512xf32, #tpu.memory_space<vmem>>, vector<31x64xf32>,
    %c0_181 = arith.constant 0 : index
    %c0_182 = arith.constant 0 : index
    %146 = vector.load %arg35[%c0_181, %c0_182] : memref<64x512xf32, #tpu.memory_space<vmem>>, vector<31x320xf32>
    %c0_183 = arith.constant 0 : index
    %c0_184 = arith.constant 0 : index
    %147 = vector.load %arg11[%c0_183, %c0_184] : memref<320x64xf32, #tpu.memory_space<vmem>>, vector<320x64xf32>
    %cst_185 = arith.constant dense<0.000000e+00> : vector<31x64xf32>
    %148 = tpu.matmul %146, %147, %cst_185 {dimension_numbers = #tpu.dot_dimension_numbers<[1], [0], [0], [1], [0, 0, 1, 1], [], []>} : vector<31x320xf32>, vector<320x64xf32>, vector<31x64xf32> -> vector<31x64xf32>
    %c0_186 = arith.constant 0 : index
    %c0_187 = arith.constant 0 : index
    %149 = vector.load %arg12[%c0_186, %c0_187] : memref<1x64xf32, #tpu.memory_space<vmem>>, vector<1x64xf32>
    %150 = vector.broadcast %149 : vector<1x64xf32> to vector<31x64xf32>
    %151 = arith.addf %148, %150 : vector<31x64xf32>
    %cst_188 = arith.constant 0.000000e+00 : f32
    %152 = vector.broadcast %cst_188 : f32 to vector<31x64xf32>
    %153 = arith.maximumf %151, %152 : vector<31x64xf32>
    %cst_189 = arith.constant 0.000000e+00 : f32
    %154 = vector.broadcast %cst_189 : f32 to vector<1x64xf32>
    %c0_190 = arith.constant 0 : index
    %c0_191 = arith.constant 0 : index
    %155 = vector.load %arg34[%c0_190, %c0_191] : memref<72x64xf32, #tpu.memory_space<vmem>>, vector<1x64xf32>
    tpu.vector_store %arg34[%c0_190, %c0_191], %154 {strides = array<i32>} : memref<72x64xf32, #tpu.memory_space<vmem>>, vector<1x64xf32>,
    %c1_192 = arith.constant 1 : index
    %c0_193 = arith.constant 0 : index
    %156 = vector.load %arg34[%c1_192, %c0_193] : memref<72x64xf32, #tpu.memory_space<vmem>>, vector<31x64xf32>
    tpu.vector_store %arg34[%c1_192, %c0_193], %153 {strides = array<i32>} : memref<72x64xf32, #tpu.memory_space<vmem>>, vector<31x64xf32>,
    %cst_194 = arith.constant 0.000000e+00 : f32
    %157 = vector.broadcast %cst_194 : f32 to vector<1x64xf32>
    %c32_195 = arith.constant 32 : index
    %c0_196 = arith.constant 0 : index
    %158 = vector.load %arg34[%c32_195, %c0_196] : memref<72x64xf32, #tpu.memory_space<vmem>>, vector<1x64xf32>
    tpu.vector_store %arg34[%c32_195, %c0_196], %157 {strides = array<i32>} : memref<72x64xf32, #tpu.memory_space<vmem>>, vector<1x64xf32>,
    %c0_197 = arith.constant 0 : index
    %c0_198 = arith.constant 0 : index
    %159 = vector.load %arg34[%c0_197, %c0_198] : memref<72x64xf32, #tpu.memory_space<vmem>>, vector<31x64xf32>
    %c0_199 = arith.constant 0 : index
    %c0_200 = arith.constant 0 : index
    %160 = vector.load %arg35[%c0_199, %c0_200] : memref<64x512xf32, #tpu.memory_space<vmem>>, vector<31x64xf32>
    tpu.vector_store %arg35[%c0_199, %c0_200], %159 {strides = array<i32>} : memref<64x512xf32, #tpu.memory_space<vmem>>, vector<31x64xf32>,
    %c1_201 = arith.constant 1 : index
    %c0_202 = arith.constant 0 : index
    %161 = vector.load %arg34[%c1_201, %c0_202] : memref<72x64xf32, #tpu.memory_space<vmem>>, vector<31x64xf32>
    %c0_203 = arith.constant 0 : index
    %c64_204 = arith.constant 64 : index
    %162 = vector.load %arg35[%c0_203, %c64_204] : memref<64x512xf32, #tpu.memory_space<vmem>>, vector<31x64xf32>
    tpu.vector_store %arg35[%c0_203, %c64_204], %161 {strides = array<i32>} : memref<64x512xf32, #tpu.memory_space<vmem>>, vector<31x64xf32>,
    %c2_205 = arith.constant 2 : index
    %c0_206 = arith.constant 0 : index
    %163 = vector.load %arg34[%c2_205, %c0_206] : memref<72x64xf32, #tpu.memory_space<vmem>>, vector<31x64xf32>
    %c0_207 = arith.constant 0 : index
    %c128_208 = arith.constant 128 : index
    %164 = vector.load %arg35[%c0_207, %c128_208] : memref<64x512xf32, #tpu.memory_space<vmem>>, vector<31x64xf32>
    tpu.vector_store %arg35[%c0_207, %c128_208], %163 {strides = array<i32>} : memref<64x512xf32, #tpu.memory_space<vmem>>, vector<31x64xf32>,
    %c0_209 = arith.constant 0 : index
    %c0_210 = arith.constant 0 : index
    %165 = vector.load %arg35[%c0_209, %c0_210] : memref<64x512xf32, #tpu.memory_space<vmem>>, vector<31x192xf32>
    %c0_211 = arith.constant 0 : index
    %c0_212 = arith.constant 0 : index
    %166 = vector.load %arg13[%c0_211, %c0_212] : memref<192x64xf32, #tpu.memory_space<vmem>>, vector<192x64xf32>
    %cst_213 = arith.constant dense<0.000000e+00> : vector<31x64xf32>
    %167 = tpu.matmul %165, %166, %cst_213 {dimension_numbers = #tpu.dot_dimension_numbers<[1], [0], [0], [1], [0, 0, 1, 1], [], []>} : vector<31x192xf32>, vector<192x64xf32>, vector<31x64xf32> -> vector<31x64xf32>
    %c0_214 = arith.constant 0 : index
    %c0_215 = arith.constant 0 : index
    %168 = vector.load %arg14[%c0_214, %c0_215] : memref<1x64xf32, #tpu.memory_space<vmem>>, vector<1x64xf32>
    %169 = vector.broadcast %168 : vector<1x64xf32> to vector<31x64xf32>
    %170 = arith.addf %167, %169 : vector<31x64xf32>
    %c0_216 = arith.constant 0 : index
    %c0_217 = arith.constant 0 : index
    %171 = vector.load %arg15[%c0_216, %c0_217] : memref<32x64xf32, #tpu.memory_space<vmem>>, vector<32x64xf32>
    %cst_218 = arith.constant dense<0.000000e+00> : vector<31x64xf32>
    %172 = tpu.matmul %101, %171, %cst_218 {dimension_numbers = #tpu.dot_dimension_numbers<[1], [0], [0], [1], [0, 0, 1, 1], [], []>} : vector<31x32xf32>, vector<32x64xf32>, vector<31x64xf32> -> vector<31x64xf32>
    %c0_219 = arith.constant 0 : index
    %c0_220 = arith.constant 0 : index
    %173 = vector.load %arg16[%c0_219, %c0_220] : memref<1x64xf32, #tpu.memory_space<vmem>>, vector<1x64xf32>
    %174 = vector.broadcast %173 : vector<1x64xf32> to vector<31x64xf32>
    %175 = arith.addf %172, %174 : vector<31x64xf32>
    %176 = arith.addf %170, %175 : vector<31x64xf32>
    %cst_221 = arith.constant 0.000000e+00 : f32
    %177 = vector.broadcast %cst_221 : f32 to vector<31x64xf32>
    %178 = arith.maximumf %176, %177 : vector<31x64xf32>
    %179 = tpu.iota {dimensions = array<i32: 0>} : vector<15x31xi32>
    %180 = tpu.iota {dimensions = array<i32: 1>} : vector<15x31xi32>
    %c2_i32_222 = arith.constant 2 : i32
    %181 = vector.broadcast %c2_i32_222 : i32 to vector<15x31xi32>
    %182 = arith.muli %181, %179 : vector<15x31xi32>
    %183 = arith.cmpi sge, %180, %182 : vector<15x31xi32>
    %c2_i32_223 = arith.constant 2 : i32
    %184 = vector.broadcast %c2_i32_223 : i32 to vector<15x31xi32>
    %185 = arith.muli %184, %179 : vector<15x31xi32>
    %c3_i32_224 = arith.constant 3 : i32
    %186 = vector.broadcast %c3_i32_224 : i32 to vector<15x31xi32>
    %187 = arith.addi %185, %186 : vector<15x31xi32>
    %188 = arith.cmpi slt, %180, %187 : vector<15x31xi32>
    %189 = arith.andi %183, %188 : vector<15x31xi1>
    %cst_225 = arith.constant 0.333333343 : f32
    %cst_226 = arith.constant 0.000000e+00 : f32
    %190 = vector.broadcast %cst_225 : f32 to vector<15x31xf32>
    %191 = vector.broadcast %cst_226 : f32 to vector<15x31xf32>
    %192 = arith.select %189, %190, %191 : vector<15x31xi1>, vector<15x31xf32>
    %cst_227 = arith.constant dense<0.000000e+00> : vector<15x64xf32>
    %193 = tpu.matmul %192, %178, %cst_227 {dimension_numbers = #tpu.dot_dimension_numbers<[1], [0], [0], [1], [0, 0, 1, 1], [], []>} : vector<15x31xf32>, vector<31x64xf32>, vector<15x64xf32> -> vector<15x64xf32>
    %cst_228 = arith.constant 0.000000e+00 : f32
    %194 = vector.broadcast %cst_228 : f32 to vector<3x64xf32>
    %c0_229 = arith.constant 0 : index
    %c0_230 = arith.constant 0 : index
    %195 = vector.load %arg34[%c0_229, %c0_230] : memref<72x64xf32, #tpu.memory_space<vmem>>, vector<3x64xf32>
    tpu.vector_store %arg34[%c0_229, %c0_230], %194 {strides = array<i32>} : memref<72x64xf32, #tpu.memory_space<vmem>>, vector<3x64xf32>,
    %c3_231 = arith.constant 3 : index
    %c0_232 = arith.constant 0 : index
    %196 = vector.load %arg34[%c3_231, %c0_232] : memref<72x64xf32, #tpu.memory_space<vmem>>, vector<15x64xf32>
    tpu.vector_store %arg34[%c3_231, %c0_232], %193 {strides = array<i32>} : memref<72x64xf32, #tpu.memory_space<vmem>>, vector<15x64xf32>,
    %cst_233 = arith.constant 0.000000e+00 : f32
    %197 = vector.broadcast %cst_233 : f32 to vector<4x64xf32>
    %c18 = arith.constant 18 : index
    %c0_234 = arith.constant 0 : index
    %198 = vector.load %arg34[%c18, %c0_234] : memref<72x64xf32, #tpu.memory_space<vmem>>, vector<4x64xf32>
    tpu.vector_store %arg34[%c18, %c0_234], %197 {strides = array<i32>} : memref<72x64xf32, #tpu.memory_space<vmem>>, vector<4x64xf32>,
    %c0_235 = arith.constant 0 : index
    %c0_236 = arith.constant 0 : index
    %199 = vector.load %arg34[%c0_235, %c0_236] : memref<72x64xf32, #tpu.memory_space<vmem>>, vector<15x64xf32>
    %c0_237 = arith.constant 0 : index
    %c0_238 = arith.constant 0 : index
    %200 = vector.load %arg35[%c0_237, %c0_238] : memref<64x512xf32, #tpu.memory_space<vmem>>, vector<15x64xf32>
    tpu.vector_store %arg35[%c0_237, %c0_238], %199 {strides = array<i32>} : memref<64x512xf32, #tpu.memory_space<vmem>>, vector<15x64xf32>,
    %c1_239 = arith.constant 1 : index
    %c0_240 = arith.constant 0 : index
    %201 = vector.load %arg34[%c1_239, %c0_240] : memref<72x64xf32, #tpu.memory_space<vmem>>, vector<15x64xf32>
    %c0_241 = arith.constant 0 : index
    %c64_242 = arith.constant 64 : index
    %202 = vector.load %arg35[%c0_241, %c64_242] : memref<64x512xf32, #tpu.memory_space<vmem>>, vector<15x64xf32>
    tpu.vector_store %arg35[%c0_241, %c64_242], %201 {strides = array<i32>} : memref<64x512xf32, #tpu.memory_space<vmem>>, vector<15x64xf32>,
    %c2_243 = arith.constant 2 : index
    %c0_244 = arith.constant 0 : index
    %203 = vector.load %arg34[%c2_243, %c0_244] : memref<72x64xf32, #tpu.memory_space<vmem>>, vector<15x64xf32>
    %c0_245 = arith.constant 0 : index
    %c128_246 = arith.constant 128 : index
    %204 = vector.load %arg35[%c0_245, %c128_246] : memref<64x512xf32, #tpu.memory_space<vmem>>, vector<15x64xf32>
    tpu.vector_store %arg35[%c0_245, %c128_246], %203 {strides = array<i32>} : memref<64x512xf32, #tpu.memory_space<vmem>>, vector<15x64xf32>,
    %c3_247 = arith.constant 3 : index
    %c0_248 = arith.constant 0 : index
    %205 = vector.load %arg34[%c3_247, %c0_248] : memref<72x64xf32, #tpu.memory_space<vmem>>, vector<15x64xf32>
    %c0_249 = arith.constant 0 : index
    %c192_250 = arith.constant 192 : index
    %206 = vector.load %arg35[%c0_249, %c192_250] : memref<64x512xf32, #tpu.memory_space<vmem>>, vector<15x64xf32>
    tpu.vector_store %arg35[%c0_249, %c192_250], %205 {strides = array<i32>} : memref<64x512xf32, #tpu.memory_space<vmem>>, vector<15x64xf32>,
    %c4_251 = arith.constant 4 : index
    %c0_252 = arith.constant 0 : index
    %207 = vector.load %arg34[%c4_251, %c0_252] : memref<72x64xf32, #tpu.memory_space<vmem>>, vector<15x64xf32>
    %c0_253 = arith.constant 0 : index
    %c256_254 = arith.constant 256 : index
    %208 = vector.load %arg35[%c0_253, %c256_254] : memref<64x512xf32, #tpu.memory_space<vmem>>, vector<15x64xf32>
    tpu.vector_store %arg35[%c0_253, %c256_254], %207 {strides = array<i32>} : memref<64x512xf32, #tpu.memory_space<vmem>>, vector<15x64xf32>,
    %c5_255 = arith.constant 5 : index
    %c0_256 = arith.constant 0 : index
    %209 = vector.load %arg34[%c5_255, %c0_256] : memref<72x64xf32, #tpu.memory_space<vmem>>, vector<15x64xf32>
    %c0_257 = arith.constant 0 : index
    %c320 = arith.constant 320 : index
    %210 = vector.load %arg35[%c0_257, %c320] : memref<64x512xf32, #tpu.memory_space<vmem>>, vector<15x64xf32>
    tpu.vector_store %arg35[%c0_257, %c320], %209 {strides = array<i32>} : memref<64x512xf32, #tpu.memory_space<vmem>>, vector<15x64xf32>,
    %c6_258 = arith.constant 6 : index
    %c0_259 = arith.constant 0 : index
    %211 = vector.load %arg34[%c6_258, %c0_259] : memref<72x64xf32, #tpu.memory_space<vmem>>, vector<15x64xf32>
    %c0_260 = arith.constant 0 : index
    %c384 = arith.constant 384 : index
    %212 = vector.load %arg35[%c0_260, %c384] : memref<64x512xf32, #tpu.memory_space<vmem>>, vector<15x64xf32>
    tpu.vector_store %arg35[%c0_260, %c384], %211 {strides = array<i32>} : memref<64x512xf32, #tpu.memory_space<vmem>>, vector<15x64xf32>,
    %c7_261 = arith.constant 7 : index
    %c0_262 = arith.constant 0 : index
    %213 = vector.load %arg34[%c7_261, %c0_262] : memref<72x64xf32, #tpu.memory_space<vmem>>, vector<15x64xf32>
    %c0_263 = arith.constant 0 : index
    %c448 = arith.constant 448 : index
    %214 = vector.load %arg35[%c0_263, %c448] : memref<64x512xf32, #tpu.memory_space<vmem>>, vector<15x64xf32>
    tpu.vector_store %arg35[%c0_263, %c448], %213 {strides = array<i32>} : memref<64x512xf32, #tpu.memory_space<vmem>>, vector<15x64xf32>,
    %c0_264 = arith.constant 0 : index
    %c0_265 = arith.constant 0 : index
    %215 = vector.load %arg35[%c0_264, %c0_265] : memref<64x512xf32, #tpu.memory_space<vmem>>, vector<15x512xf32>
    %c0_266 = arith.constant 0 : index
    %c0_267 = arith.constant 0 : index
    %216 = vector.load %arg17[%c0_266, %c0_267] : memref<512x64xf32, #tpu.memory_space<vmem>>, vector<512x64xf32>
    %cst_268 = arith.constant dense<0.000000e+00> : vector<15x64xf32>
    %217 = tpu.matmul %215, %216, %cst_268 {dimension_numbers = #tpu.dot_dimension_numbers<[1], [0], [0], [1], [0, 0, 1, 1], [], []>} : vector<15x512xf32>, vector<512x64xf32>, vector<15x64xf32> -> vector<15x64xf32>
    %c0_269 = arith.constant 0 : index
    %c0_270 = arith.constant 0 : index
    %218 = vector.load %arg18[%c0_269, %c0_270] : memref<1x64xf32, #tpu.memory_space<vmem>>, vector<1x64xf32>
    %219 = vector.broadcast %218 : vector<1x64xf32> to vector<15x64xf32>
    %220 = arith.addf %217, %219 : vector<15x64xf32>
    %cst_271 = arith.constant 0.000000e+00 : f32
    %221 = vector.broadcast %cst_271 : f32 to vector<15x64xf32>
    %222 = arith.maximumf %220, %221 : vector<15x64xf32>
    %cst_272 = arith.constant 0.000000e+00 : f32
    %223 = vector.broadcast %cst_272 : f32 to vector<2x64xf32>
    %c0_273 = arith.constant 0 : index
    %c0_274 = arith.constant 0 : index
    %224 = vector.load %arg34[%c0_273, %c0_274] : memref<72x64xf32, #tpu.memory_space<vmem>>, vector<2x64xf32>
    tpu.vector_store %arg34[%c0_273, %c0_274], %223 {strides = array<i32>} : memref<72x64xf32, #tpu.memory_space<vmem>>, vector<2x64xf32>,
    %c2_275 = arith.constant 2 : index
    %c0_276 = arith.constant 0 : index
    %225 = vector.load %arg34[%c2_275, %c0_276] : memref<72x64xf32, #tpu.memory_space<vmem>>, vector<15x64xf32>
    tpu.vector_store %arg34[%c2_275, %c0_276], %222 {strides = array<i32>} : memref<72x64xf32, #tpu.memory_space<vmem>>, vector<15x64xf32>,
    %cst_277 = arith.constant 0.000000e+00 : f32
    %226 = vector.broadcast %cst_277 : f32 to vector<2x64xf32>
    %c17 = arith.constant 17 : index
    %c0_278 = arith.constant 0 : index
    %227 = vector.load %arg34[%c17, %c0_278] : memref<72x64xf32, #tpu.memory_space<vmem>>, vector<2x64xf32>
    tpu.vector_store %arg34[%c17, %c0_278], %226 {strides = array<i32>} : memref<72x64xf32, #tpu.memory_space<vmem>>, vector<2x64xf32>,
    %c0_279 = arith.constant 0 : index
    %c0_280 = arith.constant 0 : index
    %228 = vector.load %arg34[%c0_279, %c0_280] : memref<72x64xf32, #tpu.memory_space<vmem>>, vector<15x64xf32>
    %c0_281 = arith.constant 0 : index
    %c0_282 = arith.constant 0 : index
    %229 = vector.load %arg35[%c0_281, %c0_282] : memref<64x512xf32, #tpu.memory_space<vmem>>, vector<15x64xf32>
    tpu.vector_store %arg35[%c0_281, %c0_282], %228 {strides = array<i32>} : memref<64x512xf32, #tpu.memory_space<vmem>>, vector<15x64xf32>,
    %c1_283 = arith.constant 1 : index
    %c0_284 = arith.constant 0 : index
    %230 = vector.load %arg34[%c1_283, %c0_284] : memref<72x64xf32, #tpu.memory_space<vmem>>, vector<15x64xf32>
    %c0_285 = arith.constant 0 : index
    %c64_286 = arith.constant 64 : index
    %231 = vector.load %arg35[%c0_285, %c64_286] : memref<64x512xf32, #tpu.memory_space<vmem>>, vector<15x64xf32>
    tpu.vector_store %arg35[%c0_285, %c64_286], %230 {strides = array<i32>} : memref<64x512xf32, #tpu.memory_space<vmem>>, vector<15x64xf32>,
    %c2_287 = arith.constant 2 : index
    %c0_288 = arith.constant 0 : index
    %232 = vector.load %arg34[%c2_287, %c0_288] : memref<72x64xf32, #tpu.memory_space<vmem>>, vector<15x64xf32>
    %c0_289 = arith.constant 0 : index
    %c128_290 = arith.constant 128 : index
    %233 = vector.load %arg35[%c0_289, %c128_290] : memref<64x512xf32, #tpu.memory_space<vmem>>, vector<15x64xf32>
    tpu.vector_store %arg35[%c0_289, %c128_290], %232 {strides = array<i32>} : memref<64x512xf32, #tpu.memory_space<vmem>>, vector<15x64xf32>,
    %c3_291 = arith.constant 3 : index
    %c0_292 = arith.constant 0 : index
    %234 = vector.load %arg34[%c3_291, %c0_292] : memref<72x64xf32, #tpu.memory_space<vmem>>, vector<15x64xf32>
    %c0_293 = arith.constant 0 : index
    %c192_294 = arith.constant 192 : index
    %235 = vector.load %arg35[%c0_293, %c192_294] : memref<64x512xf32, #tpu.memory_space<vmem>>, vector<15x64xf32>
    tpu.vector_store %arg35[%c0_293, %c192_294], %234 {strides = array<i32>} : memref<64x512xf32, #tpu.memory_space<vmem>>, vector<15x64xf32>,
    %c4_295 = arith.constant 4 : index
    %c0_296 = arith.constant 0 : index
    %236 = vector.load %arg34[%c4_295, %c0_296] : memref<72x64xf32, #tpu.memory_space<vmem>>, vector<15x64xf32>
    %c0_297 = arith.constant 0 : index
    %c256_298 = arith.constant 256 : index
    %237 = vector.load %arg35[%c0_297, %c256_298] : memref<64x512xf32, #tpu.memory_space<vmem>>, vector<15x64xf32>
    tpu.vector_store %arg35[%c0_297, %c256_298], %236 {strides = array<i32>} : memref<64x512xf32, #tpu.memory_space<vmem>>, vector<15x64xf32>,
    %c0_299 = arith.constant 0 : index
    %c0_300 = arith.constant 0 : index
    %238 = vector.load %arg35[%c0_299, %c0_300] : memref<64x512xf32, #tpu.memory_space<vmem>>, vector<15x320xf32>
    %c0_301 = arith.constant 0 : index
    %c0_302 = arith.constant 0 : index
    %239 = vector.load %arg19[%c0_301, %c0_302] : memref<320x64xf32, #tpu.memory_space<vmem>>, vector<320x64xf32>
    %cst_303 = arith.constant dense<0.000000e+00> : vector<15x64xf32>
    %240 = tpu.matmul %238, %239, %cst_303 {dimension_numbers = #tpu.dot_dimension_numbers<[1], [0], [0], [1], [0, 0, 1, 1], [], []>} : vector<15x320xf32>, vector<320x64xf32>, vector<15x64xf32> -> vector<15x64xf32>
    %c0_304 = arith.constant 0 : index
    %c0_305 = arith.constant 0 : index
    %241 = vector.load %arg20[%c0_304, %c0_305] : memref<1x64xf32, #tpu.memory_space<vmem>>, vector<1x64xf32>
    %242 = vector.broadcast %241 : vector<1x64xf32> to vector<15x64xf32>
    %243 = arith.addf %240, %242 : vector<15x64xf32>
    %cst_306 = arith.constant 0.000000e+00 : f32
    %244 = vector.broadcast %cst_306 : f32 to vector<15x64xf32>
    %245 = arith.maximumf %243, %244 : vector<15x64xf32>
    %cst_307 = arith.constant 0.000000e+00 : f32
    %246 = vector.broadcast %cst_307 : f32 to vector<1x64xf32>
    %c0_308 = arith.constant 0 : index
    %c0_309 = arith.constant 0 : index
    %247 = vector.load %arg34[%c0_308, %c0_309] : memref<72x64xf32, #tpu.memory_space<vmem>>, vector<1x64xf32>
    tpu.vector_store %arg34[%c0_308, %c0_309], %246 {strides = array<i32>} : memref<72x64xf32, #tpu.memory_space<vmem>>, vector<1x64xf32>,
    %c1_310 = arith.constant 1 : index
    %c0_311 = arith.constant 0 : index
    %248 = vector.load %arg34[%c1_310, %c0_311] : memref<72x64xf32, #tpu.memory_space<vmem>>, vector<15x64xf32>
    tpu.vector_store %arg34[%c1_310, %c0_311], %245 {strides = array<i32>} : memref<72x64xf32, #tpu.memory_space<vmem>>, vector<15x64xf32>,
    %cst_312 = arith.constant 0.000000e+00 : f32
    %249 = vector.broadcast %cst_312 : f32 to vector<1x64xf32>
    %c16 = arith.constant 16 : index
    %c0_313 = arith.constant 0 : index
    %250 = vector.load %arg34[%c16, %c0_313] : memref<72x64xf32, #tpu.memory_space<vmem>>, vector<1x64xf32>
    tpu.vector_store %arg34[%c16, %c0_313], %249 {strides = array<i32>} : memref<72x64xf32, #tpu.memory_space<vmem>>, vector<1x64xf32>,
    %c0_314 = arith.constant 0 : index
    %c0_315 = arith.constant 0 : index
    %251 = vector.load %arg34[%c0_314, %c0_315] : memref<72x64xf32, #tpu.memory_space<vmem>>, vector<15x64xf32>
    %c0_316 = arith.constant 0 : index
    %c0_317 = arith.constant 0 : index
    %252 = vector.load %arg35[%c0_316, %c0_317] : memref<64x512xf32, #tpu.memory_space<vmem>>, vector<15x64xf32>
    tpu.vector_store %arg35[%c0_316, %c0_317], %251 {strides = array<i32>} : memref<64x512xf32, #tpu.memory_space<vmem>>, vector<15x64xf32>,
    %c1_318 = arith.constant 1 : index
    %c0_319 = arith.constant 0 : index
    %253 = vector.load %arg34[%c1_318, %c0_319] : memref<72x64xf32, #tpu.memory_space<vmem>>, vector<15x64xf32>
    %c0_320 = arith.constant 0 : index
    %c64_321 = arith.constant 64 : index
    %254 = vector.load %arg35[%c0_320, %c64_321] : memref<64x512xf32, #tpu.memory_space<vmem>>, vector<15x64xf32>
    tpu.vector_store %arg35[%c0_320, %c64_321], %253 {strides = array<i32>} : memref<64x512xf32, #tpu.memory_space<vmem>>, vector<15x64xf32>,
    %c2_322 = arith.constant 2 : index
    %c0_323 = arith.constant 0 : index
    %255 = vector.load %arg34[%c2_322, %c0_323] : memref<72x64xf32, #tpu.memory_space<vmem>>, vector<15x64xf32>
    %c0_324 = arith.constant 0 : index
    %c128_325 = arith.constant 128 : index
    %256 = vector.load %arg35[%c0_324, %c128_325] : memref<64x512xf32, #tpu.memory_space<vmem>>, vector<15x64xf32>
    tpu.vector_store %arg35[%c0_324, %c128_325], %255 {strides = array<i32>} : memref<64x512xf32, #tpu.memory_space<vmem>>, vector<15x64xf32>,
    %c0_326 = arith.constant 0 : index
    %c0_327 = arith.constant 0 : index
    %257 = vector.load %arg35[%c0_326, %c0_327] : memref<64x512xf32, #tpu.memory_space<vmem>>, vector<15x192xf32>
    %c0_328 = arith.constant 0 : index
    %c0_329 = arith.constant 0 : index
    %258 = vector.load %arg21[%c0_328, %c0_329] : memref<192x64xf32, #tpu.memory_space<vmem>>, vector<192x64xf32>
    %cst_330 = arith.constant dense<0.000000e+00> : vector<15x64xf32>
    %259 = tpu.matmul %257, %258, %cst_330 {dimension_numbers = #tpu.dot_dimension_numbers<[1], [0], [0], [1], [0, 0, 1, 1], [], []>} : vector<15x192xf32>, vector<192x64xf32>, vector<15x64xf32> -> vector<15x64xf32>
    %c0_331 = arith.constant 0 : index
    %c0_332 = arith.constant 0 : index
    %260 = vector.load %arg22[%c0_331, %c0_332] : memref<1x64xf32, #tpu.memory_space<vmem>>, vector<1x64xf32>
    %261 = vector.broadcast %260 : vector<1x64xf32> to vector<15x64xf32>
    %262 = arith.addf %259, %261 : vector<15x64xf32>
    %c0_333 = arith.constant 0 : index
    %c0_334 = arith.constant 0 : index
    %263 = vector.load %arg23[%c0_333, %c0_334] : memref<64x64xf32, #tpu.memory_space<vmem>>, vector<64x64xf32>
    %cst_335 = arith.constant dense<0.000000e+00> : vector<15x64xf32>
    %264 = tpu.matmul %193, %263, %cst_335 {dimension_numbers = #tpu.dot_dimension_numbers<[1], [0], [0], [1], [0, 0, 1, 1], [], []>} : vector<15x64xf32>, vector<64x64xf32>, vector<15x64xf32> -> vector<15x64xf32>
    %c0_336 = arith.constant 0 : index
    %c0_337 = arith.constant 0 : index
    %265 = vector.load %arg24[%c0_336, %c0_337] : memref<1x64xf32, #tpu.memory_space<vmem>>, vector<1x64xf32>
    %266 = vector.broadcast %265 : vector<1x64xf32> to vector<15x64xf32>
    %267 = arith.addf %264, %266 : vector<15x64xf32>
    %268 = arith.addf %262, %267 : vector<15x64xf32>
    %cst_338 = arith.constant 0.000000e+00 : f32
    %269 = vector.broadcast %cst_338 : f32 to vector<15x64xf32>
    %270 = arith.maximumf %268, %269 : vector<15x64xf32>
    %271 = tpu.iota {dimensions = array<i32: 0>} : vector<7x15xi32>
    %272 = tpu.iota {dimensions = array<i32: 1>} : vector<7x15xi32>
    %c2_i32_339 = arith.constant 2 : i32
    %273 = vector.broadcast %c2_i32_339 : i32 to vector<7x15xi32>
    %274 = arith.muli %273, %271 : vector<7x15xi32>
    %275 = arith.cmpi sge, %272, %274 : vector<7x15xi32>
    %c2_i32_340 = arith.constant 2 : i32
    %276 = vector.broadcast %c2_i32_340 : i32 to vector<7x15xi32>
    %277 = arith.muli %276, %271 : vector<7x15xi32>
    %c3_i32_341 = arith.constant 3 : i32
    %278 = vector.broadcast %c3_i32_341 : i32 to vector<7x15xi32>
    %279 = arith.addi %277, %278 : vector<7x15xi32>
    %280 = arith.cmpi slt, %272, %279 : vector<7x15xi32>
    %281 = arith.andi %275, %280 : vector<7x15xi1>
    %cst_342 = arith.constant 0.333333343 : f32
    %cst_343 = arith.constant 0.000000e+00 : f32
    %282 = vector.broadcast %cst_342 : f32 to vector<7x15xf32>
    %283 = vector.broadcast %cst_343 : f32 to vector<7x15xf32>
    %284 = arith.select %281, %282, %283 : vector<7x15xi1>, vector<7x15xf32>
    %cst_344 = arith.constant dense<0.000000e+00> : vector<7x64xf32>
    %285 = tpu.matmul %284, %270, %cst_344 {dimension_numbers = #tpu.dot_dimension_numbers<[1], [0], [0], [1], [0, 0, 1, 1], [], []>} : vector<7x15xf32>, vector<15x64xf32>, vector<7x64xf32> -> vector<7x64xf32>
    %cst_345 = arith.constant 0.000000e+00 : f32
    %286 = vector.broadcast %cst_345 : f32 to vector<3x64xf32>
    %c0_346 = arith.constant 0 : index
    %c0_347 = arith.constant 0 : index
    %287 = vector.load %arg34[%c0_346, %c0_347] : memref<72x64xf32, #tpu.memory_space<vmem>>, vector<3x64xf32>
    tpu.vector_store %arg34[%c0_346, %c0_347], %286 {strides = array<i32>} : memref<72x64xf32, #tpu.memory_space<vmem>>, vector<3x64xf32>,
    %c3_348 = arith.constant 3 : index
    %c0_349 = arith.constant 0 : index
    %288 = vector.load %arg34[%c3_348, %c0_349] : memref<72x64xf32, #tpu.memory_space<vmem>>, vector<7x64xf32>
    tpu.vector_store %arg34[%c3_348, %c0_349], %285 {strides = array<i32>} : memref<72x64xf32, #tpu.memory_space<vmem>>, vector<7x64xf32>,
    %cst_350 = arith.constant 0.000000e+00 : f32
    %289 = vector.broadcast %cst_350 : f32 to vector<4x64xf32>
    %c10 = arith.constant 10 : index
    %c0_351 = arith.constant 0 : index
    %290 = vector.load %arg34[%c10, %c0_351] : memref<72x64xf32, #tpu.memory_space<vmem>>, vector<4x64xf32>
    tpu.vector_store %arg34[%c10, %c0_351], %289 {strides = array<i32>} : memref<72x64xf32, #tpu.memory_space<vmem>>, vector<4x64xf32>,
    %c0_352 = arith.constant 0 : index
    %c0_353 = arith.constant 0 : index
    %291 = vector.load %arg34[%c0_352, %c0_353] : memref<72x64xf32, #tpu.memory_space<vmem>>, vector<7x64xf32>
    %c0_354 = arith.constant 0 : index
    %c0_355 = arith.constant 0 : index
    %292 = vector.load %arg35[%c0_354, %c0_355] : memref<64x512xf32, #tpu.memory_space<vmem>>, vector<7x64xf32>
    tpu.vector_store %arg35[%c0_354, %c0_355], %291 {strides = array<i32>} : memref<64x512xf32, #tpu.memory_space<vmem>>, vector<7x64xf32>,
    %c1_356 = arith.constant 1 : index
    %c0_357 = arith.constant 0 : index
    %293 = vector.load %arg34[%c1_356, %c0_357] : memref<72x64xf32, #tpu.memory_space<vmem>>, vector<7x64xf32>
    %c0_358 = arith.constant 0 : index
    %c64_359 = arith.constant 64 : index
    %294 = vector.load %arg35[%c0_358, %c64_359] : memref<64x512xf32, #tpu.memory_space<vmem>>, vector<7x64xf32>
    tpu.vector_store %arg35[%c0_358, %c64_359], %293 {strides = array<i32>} : memref<64x512xf32, #tpu.memory_space<vmem>>, vector<7x64xf32>,
    %c2_360 = arith.constant 2 : index
    %c0_361 = arith.constant 0 : index
    %295 = vector.load %arg34[%c2_360, %c0_361] : memref<72x64xf32, #tpu.memory_space<vmem>>, vector<7x64xf32>
    %c0_362 = arith.constant 0 : index
    %c128_363 = arith.constant 128 : index
    %296 = vector.load %arg35[%c0_362, %c128_363] : memref<64x512xf32, #tpu.memory_space<vmem>>, vector<7x64xf32>
    tpu.vector_store %arg35[%c0_362, %c128_363], %295 {strides = array<i32>} : memref<64x512xf32, #tpu.memory_space<vmem>>, vector<7x64xf32>,
    %c3_364 = arith.constant 3 : index
    %c0_365 = arith.constant 0 : index
    %297 = vector.load %arg34[%c3_364, %c0_365] : memref<72x64xf32, #tpu.memory_space<vmem>>, vector<7x64xf32>
    %c0_366 = arith.constant 0 : index
    %c192_367 = arith.constant 192 : index
    %298 = vector.load %arg35[%c0_366, %c192_367] : memref<64x512xf32, #tpu.memory_space<vmem>>, vector<7x64xf32>
    tpu.vector_store %arg35[%c0_366, %c192_367], %297 {strides = array<i32>} : memref<64x512xf32, #tpu.memory_space<vmem>>, vector<7x64xf32>,
    %c4_368 = arith.constant 4 : index
    %c0_369 = arith.constant 0 : index
    %299 = vector.load %arg34[%c4_368, %c0_369] : memref<72x64xf32, #tpu.memory_space<vmem>>, vector<7x64xf32>
    %c0_370 = arith.constant 0 : index
    %c256_371 = arith.constant 256 : index
    %300 = vector.load %arg35[%c0_370, %c256_371] : memref<64x512xf32, #tpu.memory_space<vmem>>, vector<7x64xf32>
    tpu.vector_store %arg35[%c0_370, %c256_371], %299 {strides = array<i32>} : memref<64x512xf32, #tpu.memory_space<vmem>>, vector<7x64xf32>,
    %c5_372 = arith.constant 5 : index
    %c0_373 = arith.constant 0 : index
    %301 = vector.load %arg34[%c5_372, %c0_373] : memref<72x64xf32, #tpu.memory_space<vmem>>, vector<7x64xf32>
    %c0_374 = arith.constant 0 : index
    %c320_375 = arith.constant 320 : index
    %302 = vector.load %arg35[%c0_374, %c320_375] : memref<64x512xf32, #tpu.memory_space<vmem>>, vector<7x64xf32>
    tpu.vector_store %arg35[%c0_374, %c320_375], %301 {strides = array<i32>} : memref<64x512xf32, #tpu.memory_space<vmem>>, vector<7x64xf32>,
    %c6_376 = arith.constant 6 : index
    %c0_377 = arith.constant 0 : index
    %303 = vector.load %arg34[%c6_376, %c0_377] : memref<72x64xf32, #tpu.memory_space<vmem>>, vector<7x64xf32>
    %c0_378 = arith.constant 0 : index
    %c384_379 = arith.constant 384 : index
    %304 = vector.load %arg35[%c0_378, %c384_379] : memref<64x512xf32, #tpu.memory_space<vmem>>, vector<7x64xf32>
    tpu.vector_store %arg35[%c0_378, %c384_379], %303 {strides = array<i32>} : memref<64x512xf32, #tpu.memory_space<vmem>>, vector<7x64xf32>,
    %c7_380 = arith.constant 7 : index
    %c0_381 = arith.constant 0 : index
    %305 = vector.load %arg34[%c7_380, %c0_381] : memref<72x64xf32, #tpu.memory_space<vmem>>, vector<7x64xf32>
    %c0_382 = arith.constant 0 : index
    %c448_383 = arith.constant 448 : index
    %306 = vector.load %arg35[%c0_382, %c448_383] : memref<64x512xf32, #tpu.memory_space<vmem>>, vector<7x64xf32>
    tpu.vector_store %arg35[%c0_382, %c448_383], %305 {strides = array<i32>} : memref<64x512xf32, #tpu.memory_space<vmem>>, vector<7x64xf32>,
    %c0_384 = arith.constant 0 : index
    %c0_385 = arith.constant 0 : index
    %307 = vector.load %arg35[%c0_384, %c0_385] : memref<64x512xf32, #tpu.memory_space<vmem>>, vector<7x512xf32>
    %c0_386 = arith.constant 0 : index
    %c0_387 = arith.constant 0 : index
    %308 = vector.load %arg25[%c0_386, %c0_387] : memref<512x64xf32, #tpu.memory_space<vmem>>, vector<512x64xf32>
    %cst_388 = arith.constant dense<0.000000e+00> : vector<7x64xf32>
    %309 = tpu.matmul %307, %308, %cst_388 {dimension_numbers = #tpu.dot_dimension_numbers<[1], [0], [0], [1], [0, 0, 1, 1], [], []>} : vector<7x512xf32>, vector<512x64xf32>, vector<7x64xf32> -> vector<7x64xf32>
    %c0_389 = arith.constant 0 : index
    %c0_390 = arith.constant 0 : index
    %310 = vector.load %arg26[%c0_389, %c0_390] : memref<1x64xf32, #tpu.memory_space<vmem>>, vector<1x64xf32>
    %311 = vector.broadcast %310 : vector<1x64xf32> to vector<7x64xf32>
    %312 = arith.addf %309, %311 : vector<7x64xf32>
    %cst_391 = arith.constant 0.000000e+00 : f32
    %313 = vector.broadcast %cst_391 : f32 to vector<7x64xf32>
    %314 = arith.maximumf %312, %313 : vector<7x64xf32>
    %cst_392 = arith.constant 0.000000e+00 : f32
    %315 = vector.broadcast %cst_392 : f32 to vector<2x64xf32>
    %c0_393 = arith.constant 0 : index
    %c0_394 = arith.constant 0 : index
    %316 = vector.load %arg34[%c0_393, %c0_394] : memref<72x64xf32, #tpu.memory_space<vmem>>, vector<2x64xf32>
    tpu.vector_store %arg34[%c0_393, %c0_394], %315 {strides = array<i32>} : memref<72x64xf32, #tpu.memory_space<vmem>>, vector<2x64xf32>,
    %c2_395 = arith.constant 2 : index
    %c0_396 = arith.constant 0 : index
    %317 = vector.load %arg34[%c2_395, %c0_396] : memref<72x64xf32, #tpu.memory_space<vmem>>, vector<7x64xf32>
    tpu.vector_store %arg34[%c2_395, %c0_396], %314 {strides = array<i32>} : memref<72x64xf32, #tpu.memory_space<vmem>>, vector<7x64xf32>,
    %cst_397 = arith.constant 0.000000e+00 : f32
    %318 = vector.broadcast %cst_397 : f32 to vector<2x64xf32>
    %c9 = arith.constant 9 : index
    %c0_398 = arith.constant 0 : index
    %319 = vector.load %arg34[%c9, %c0_398] : memref<72x64xf32, #tpu.memory_space<vmem>>, vector<2x64xf32>
    tpu.vector_store %arg34[%c9, %c0_398], %318 {strides = array<i32>} : memref<72x64xf32, #tpu.memory_space<vmem>>, vector<2x64xf32>,
    %c0_399 = arith.constant 0 : index
    %c0_400 = arith.constant 0 : index
    %320 = vector.load %arg34[%c0_399, %c0_400] : memref<72x64xf32, #tpu.memory_space<vmem>>, vector<7x64xf32>
    %c0_401 = arith.constant 0 : index
    %c0_402 = arith.constant 0 : index
    %321 = vector.load %arg35[%c0_401, %c0_402] : memref<64x512xf32, #tpu.memory_space<vmem>>, vector<7x64xf32>
    tpu.vector_store %arg35[%c0_401, %c0_402], %320 {strides = array<i32>} : memref<64x512xf32, #tpu.memory_space<vmem>>, vector<7x64xf32>,
    %c1_403 = arith.constant 1 : index
    %c0_404 = arith.constant 0 : index
    %322 = vector.load %arg34[%c1_403, %c0_404] : memref<72x64xf32, #tpu.memory_space<vmem>>, vector<7x64xf32>
    %c0_405 = arith.constant 0 : index
    %c64_406 = arith.constant 64 : index
    %323 = vector.load %arg35[%c0_405, %c64_406] : memref<64x512xf32, #tpu.memory_space<vmem>>, vector<7x64xf32>
    tpu.vector_store %arg35[%c0_405, %c64_406], %322 {strides = array<i32>} : memref<64x512xf32, #tpu.memory_space<vmem>>, vector<7x64xf32>,
    %c2_407 = arith.constant 2 : index
    %c0_408 = arith.constant 0 : index
    %324 = vector.load %arg34[%c2_407, %c0_408] : memref<72x64xf32, #tpu.memory_space<vmem>>, vector<7x64xf32>
    %c0_409 = arith.constant 0 : index
    %c128_410 = arith.constant 128 : index
    %325 = vector.load %arg35[%c0_409, %c128_410] : memref<64x512xf32, #tpu.memory_space<vmem>>, vector<7x64xf32>
    tpu.vector_store %arg35[%c0_409, %c128_410], %324 {strides = array<i32>} : memref<64x512xf32, #tpu.memory_space<vmem>>, vector<7x64xf32>,
    %c3_411 = arith.constant 3 : index
    %c0_412 = arith.constant 0 : index
    %326 = vector.load %arg34[%c3_411, %c0_412] : memref<72x64xf32, #tpu.memory_space<vmem>>, vector<7x64xf32>
    %c0_413 = arith.constant 0 : index
    %c192_414 = arith.constant 192 : index
    %327 = vector.load %arg35[%c0_413, %c192_414] : memref<64x512xf32, #tpu.memory_space<vmem>>, vector<7x64xf32>
    tpu.vector_store %arg35[%c0_413, %c192_414], %326 {strides = array<i32>} : memref<64x512xf32, #tpu.memory_space<vmem>>, vector<7x64xf32>,
    %c4_415 = arith.constant 4 : index
    %c0_416 = arith.constant 0 : index
    %328 = vector.load %arg34[%c4_415, %c0_416] : memref<72x64xf32, #tpu.memory_space<vmem>>, vector<7x64xf32>
    %c0_417 = arith.constant 0 : index
    %c256_418 = arith.constant 256 : index
    %329 = vector.load %arg35[%c0_417, %c256_418] : memref<64x512xf32, #tpu.memory_space<vmem>>, vector<7x64xf32>
    tpu.vector_store %arg35[%c0_417, %c256_418], %328 {strides = array<i32>} : memref<64x512xf32, #tpu.memory_space<vmem>>, vector<7x64xf32>,
    %c0_419 = arith.constant 0 : index
    %c0_420 = arith.constant 0 : index
    %330 = vector.load %arg35[%c0_419, %c0_420] : memref<64x512xf32, #tpu.memory_space<vmem>>, vector<7x320xf32>
    %c0_421 = arith.constant 0 : index
    %c0_422 = arith.constant 0 : index
    %331 = vector.load %arg27[%c0_421, %c0_422] : memref<320x64xf32, #tpu.memory_space<vmem>>, vector<320x64xf32>
    %cst_423 = arith.constant dense<0.000000e+00> : vector<7x64xf32>
    %332 = tpu.matmul %330, %331, %cst_423 {dimension_numbers = #tpu.dot_dimension_numbers<[1], [0], [0], [1], [0, 0, 1, 1], [], []>} : vector<7x320xf32>, vector<320x64xf32>, vector<7x64xf32> -> vector<7x64xf32>
    %c0_424 = arith.constant 0 : index
    %c0_425 = arith.constant 0 : index
    %333 = vector.load %arg28[%c0_424, %c0_425] : memref<1x64xf32, #tpu.memory_space<vmem>>, vector<1x64xf32>
    %334 = vector.broadcast %333 : vector<1x64xf32> to vector<7x64xf32>
    %335 = arith.addf %332, %334 : vector<7x64xf32>
    %cst_426 = arith.constant 0.000000e+00 : f32
    %336 = vector.broadcast %cst_426 : f32 to vector<7x64xf32>
    %337 = arith.maximumf %335, %336 : vector<7x64xf32>
    %cst_427 = arith.constant 0.000000e+00 : f32
    %338 = vector.broadcast %cst_427 : f32 to vector<1x64xf32>
    %c0_428 = arith.constant 0 : index
    %c0_429 = arith.constant 0 : index
    %339 = vector.load %arg34[%c0_428, %c0_429] : memref<72x64xf32, #tpu.memory_space<vmem>>, vector<1x64xf32>
    tpu.vector_store %arg34[%c0_428, %c0_429], %338 {strides = array<i32>} : memref<72x64xf32, #tpu.memory_space<vmem>>, vector<1x64xf32>,
    %c1_430 = arith.constant 1 : index
    %c0_431 = arith.constant 0 : index
    %340 = vector.load %arg34[%c1_430, %c0_431] : memref<72x64xf32, #tpu.memory_space<vmem>>, vector<7x64xf32>
    tpu.vector_store %arg34[%c1_430, %c0_431], %337 {strides = array<i32>} : memref<72x64xf32, #tpu.memory_space<vmem>>, vector<7x64xf32>,
    %cst_432 = arith.constant 0.000000e+00 : f32
    %341 = vector.broadcast %cst_432 : f32 to vector<1x64xf32>
    %c8 = arith.constant 8 : index
    %c0_433 = arith.constant 0 : index
    %342 = vector.load %arg34[%c8, %c0_433] : memref<72x64xf32, #tpu.memory_space<vmem>>, vector<1x64xf32>
    tpu.vector_store %arg34[%c8, %c0_433], %341 {strides = array<i32>} : memref<72x64xf32, #tpu.memory_space<vmem>>, vector<1x64xf32>,
    %c0_434 = arith.constant 0 : index
    %c0_435 = arith.constant 0 : index
    %343 = vector.load %arg34[%c0_434, %c0_435] : memref<72x64xf32, #tpu.memory_space<vmem>>, vector<7x64xf32>
    %c0_436 = arith.constant 0 : index
    %c0_437 = arith.constant 0 : index
    %344 = vector.load %arg35[%c0_436, %c0_437] : memref<64x512xf32, #tpu.memory_space<vmem>>, vector<7x64xf32>
    tpu.vector_store %arg35[%c0_436, %c0_437], %343 {strides = array<i32>} : memref<64x512xf32, #tpu.memory_space<vmem>>, vector<7x64xf32>,
    %c1_438 = arith.constant 1 : index
    %c0_439 = arith.constant 0 : index
    %345 = vector.load %arg34[%c1_438, %c0_439] : memref<72x64xf32, #tpu.memory_space<vmem>>, vector<7x64xf32>
    %c0_440 = arith.constant 0 : index
    %c64_441 = arith.constant 64 : index
    %346 = vector.load %arg35[%c0_440, %c64_441] : memref<64x512xf32, #tpu.memory_space<vmem>>, vector<7x64xf32>
    tpu.vector_store %arg35[%c0_440, %c64_441], %345 {strides = array<i32>} : memref<64x512xf32, #tpu.memory_space<vmem>>, vector<7x64xf32>,
    %c2_442 = arith.constant 2 : index
    %c0_443 = arith.constant 0 : index
    %347 = vector.load %arg34[%c2_442, %c0_443] : memref<72x64xf32, #tpu.memory_space<vmem>>, vector<7x64xf32>
    %c0_444 = arith.constant 0 : index
    %c128_445 = arith.constant 128 : index
    %348 = vector.load %arg35[%c0_444, %c128_445] : memref<64x512xf32, #tpu.memory_space<vmem>>, vector<7x64xf32>
    tpu.vector_store %arg35[%c0_444, %c128_445], %347 {strides = array<i32>} : memref<64x512xf32, #tpu.memory_space<vmem>>, vector<7x64xf32>,
    %c0_446 = arith.constant 0 : index
    %c0_447 = arith.constant 0 : index
    %349 = vector.load %arg35[%c0_446, %c0_447] : memref<64x512xf32, #tpu.memory_space<vmem>>, vector<7x192xf32>
    %c0_448 = arith.constant 0 : index
    %c0_449 = arith.constant 0 : index
    %350 = vector.load %arg29[%c0_448, %c0_449] : memref<192x64xf32, #tpu.memory_space<vmem>>, vector<192x64xf32>
    %cst_450 = arith.constant dense<0.000000e+00> : vector<7x64xf32>
    %351 = tpu.matmul %349, %350, %cst_450 {dimension_numbers = #tpu.dot_dimension_numbers<[1], [0], [0], [1], [0, 0, 1, 1], [], []>} : vector<7x192xf32>, vector<192x64xf32>, vector<7x64xf32> -> vector<7x64xf32>
    %c0_451 = arith.constant 0 : index
    %c0_452 = arith.constant 0 : index
    %352 = vector.load %arg30[%c0_451, %c0_452] : memref<1x64xf32, #tpu.memory_space<vmem>>, vector<1x64xf32>
    %353 = vector.broadcast %352 : vector<1x64xf32> to vector<7x64xf32>
    %354 = arith.addf %351, %353 : vector<7x64xf32>
    %c0_453 = arith.constant 0 : index
    %c0_454 = arith.constant 0 : index
    %355 = vector.load %arg31[%c0_453, %c0_454] : memref<64x64xf32, #tpu.memory_space<vmem>>, vector<64x64xf32>
    %cst_455 = arith.constant dense<0.000000e+00> : vector<7x64xf32>
    %356 = tpu.matmul %285, %355, %cst_455 {dimension_numbers = #tpu.dot_dimension_numbers<[1], [0], [0], [1], [0, 0, 1, 1], [], []>} : vector<7x64xf32>, vector<64x64xf32>, vector<7x64xf32> -> vector<7x64xf32>
    %c0_456 = arith.constant 0 : index
    %c0_457 = arith.constant 0 : index
    %357 = vector.load %arg32[%c0_456, %c0_457] : memref<1x64xf32, #tpu.memory_space<vmem>>, vector<1x64xf32>
    %358 = vector.broadcast %357 : vector<1x64xf32> to vector<7x64xf32>
    %359 = arith.addf %356, %358 : vector<7x64xf32>
    %360 = arith.addf %354, %359 : vector<7x64xf32>
    %cst_458 = arith.constant 0.000000e+00 : f32
    %361 = vector.broadcast %cst_458 : f32 to vector<7x64xf32>
    %362 = arith.maximumf %360, %361 : vector<7x64xf32>
    %363 = tpu.iota {dimensions = array<i32: 0>} : vector<3x7xi32>
    %364 = tpu.iota {dimensions = array<i32: 1>} : vector<3x7xi32>
    %c2_i32_459 = arith.constant 2 : i32
    %365 = vector.broadcast %c2_i32_459 : i32 to vector<3x7xi32>
    %366 = arith.muli %365, %363 : vector<3x7xi32>
    %367 = arith.cmpi sge, %364, %366 : vector<3x7xi32>
    %c2_i32_460 = arith.constant 2 : i32
    %368 = vector.broadcast %c2_i32_460 : i32 to vector<3x7xi32>
    %369 = arith.muli %368, %363 : vector<3x7xi32>
    %c3_i32_461 = arith.constant 3 : i32
    %370 = vector.broadcast %c3_i32_461 : i32 to vector<3x7xi32>
    %371 = arith.addi %369, %370 : vector<3x7xi32>
    %372 = arith.cmpi slt, %364, %371 : vector<3x7xi32>
    %373 = arith.andi %367, %372 : vector<3x7xi1>
    %cst_462 = arith.constant 0.333333343 : f32
    %cst_463 = arith.constant 0.000000e+00 : f32
    %374 = vector.broadcast %cst_462 : f32 to vector<3x7xf32>
    %375 = vector.broadcast %cst_463 : f32 to vector<3x7xf32>
    %376 = arith.select %373, %374, %375 : vector<3x7xi1>, vector<3x7xf32>
    %cst_464 = arith.constant dense<0.000000e+00> : vector<3x64xf32>
    %377 = tpu.matmul %376, %362, %cst_464 {dimension_numbers = #tpu.dot_dimension_numbers<[1], [0], [0], [1], [0, 0, 1, 1], [], []>} : vector<3x7xf32>, vector<7x64xf32>, vector<3x64xf32> -> vector<3x64xf32>
    %c0_465 = arith.constant 0 : index
    %c0_466 = arith.constant 0 : index
    %c0_467 = arith.constant 0 : index
    %378 = vector.load %arg33[%c0_465, %c0_466, %c0_467] : memref<1x3x64xf32, #tpu.memory_space<vmem>>, vector<1x3x64xf32>
    %379 = vector.shape_cast %378 : vector<1x3x64xf32> to vector<3x64xf32>
    %380 = vector.shape_cast %377 : vector<3x64xf32> to vector<1x3x64xf32>
    tpu.vector_store %arg33[%c0_465, %c0_466, %c0_467], %380 {strides = array<i32>} : memref<1x3x64xf32, #tpu.memory_space<vmem>>, vector<1x3x64xf32>,
    return
  }
  func.func @transform_0(%arg0: i32) -> (i32, i32) {
    %c0_i32 = arith.constant 0 : i32
    %c0_i32_0 = arith.constant 0 : i32
    %c0_i32_1 = arith.constant 0 : i32
    return %c0_i32, %c0_i32_0 : i32, i32
  }
  func.func @transform_1(%arg0: i32) -> (i32, i32, i32) {
    %c0_i32 = arith.constant 0 : i32
    %c0_i32_0 = arith.constant 0 : i32
    %c0_i32_1 = arith.constant 0 : i32
    return %arg0, %c0_i32, %c0_i32_0 : i32, i32, i32
  }
  func.func @transform_2(%arg0: i32) -> (i32, i32) {
    %c0_i32 = arith.constant 0 : i32
    %c0_i32_0 = arith.constant 0 : i32
    %c0_i32_1 = arith.constant 0 : i32
    return %c0_i32, %c0_i32_0 : i32, i32
  }
  func.func @transform_3(%arg0: i32) -> (i32, i32) {
    %c0_i32 = arith.constant 0 : i32
    %c0_i32_0 = arith.constant 0 : i32
    %c0_i32_1 = arith.constant 0 : i32
    return %c0_i32, %c0_i32_0 : i32, i32
  }
  func.func @transform_4(%arg0: i32) -> (i32, i32) {
    %c0_i32 = arith.constant 0 : i32
    %c0_i32_0 = arith.constant 0 : i32
    %c0_i32_1 = arith.constant 0 : i32
    return %c0_i32, %c0_i32_0 : i32, i32
  }
  func.func @transform_5(%arg0: i32) -> (i32, i32) {
    %c0_i32 = arith.constant 0 : i32
    %c0_i32_0 = arith.constant 0 : i32
    %c0_i32_1 = arith.constant 0 : i32
    return %c0_i32, %c0_i32_0 : i32, i32
  }
  func.func @transform_6(%arg0: i32) -> (i32, i32) {
    %c0_i32 = arith.constant 0 : i32
    %c0_i32_0 = arith.constant 0 : i32
    %c0_i32_1 = arith.constant 0 : i32
    return %c0_i32, %c0_i32_0 : i32, i32
  }
  func.func @transform_7(%arg0: i32) -> (i32, i32) {
    %c0_i32 = arith.constant 0 : i32
    %c0_i32_0 = arith.constant 0 : i32
    %c0_i32_1 = arith.constant 0 : i32
    return %c0_i32, %c0_i32_0 : i32, i32
  }
  func.func @transform_8(%arg0: i32) -> (i32, i32) {
    %c0_i32 = arith.constant 0 : i32
    %c0_i32_0 = arith.constant 0 : i32
    %c0_i32_1 = arith.constant 0 : i32
    return %c0_i32, %c0_i32_0 : i32, i32
  }
  func.func @transform_9(%arg0: i32) -> (i32, i32) {
    %c0_i32 = arith.constant 0 : i32
    %c0_i32_0 = arith.constant 0 : i32
    %c0_i32_1 = arith.constant 0 : i32
    return %c0_i32, %c0_i32_0 : i32, i32
  }
  func.func @transform_10(%arg0: i32) -> (i32, i32) {
    %c0_i32 = arith.constant 0 : i32
    %c0_i32_0 = arith.constant 0 : i32
    %c0_i32_1 = arith.constant 0 : i32
    return %c0_i32, %c0_i32_0 : i32, i32
  }
  func.func @transform_11(%arg0: i32) -> (i32, i32) {
    %c0_i32 = arith.constant 0 : i32
    %c0_i32_0 = arith.constant 0 : i32
    %c0_i32_1 = arith.constant 0 : i32
    return %c0_i32, %c0_i32_0 : i32, i32
  }
  func.func @transform_12(%arg0: i32) -> (i32, i32) {
    %c0_i32 = arith.constant 0 : i32
    %c0_i32_0 = arith.constant 0 : i32
    %c0_i32_1 = arith.constant 0 : i32
    return %c0_i32, %c0_i32_0 : i32, i32
  }
  func.func @transform_13(%arg0: i32) -> (i32, i32) {
    %c0_i32 = arith.constant 0 : i32
    %c0_i32_0 = arith.constant 0 : i32
    %c0_i32_1 = arith.constant 0 : i32
    return %c0_i32, %c0_i32_0 : i32, i32
  }
  func.func @transform_14(%arg0: i32) -> (i32, i32) {
    %c0_i32 = arith.constant 0 : i32
    %c0_i32_0 = arith.constant 0 : i32
    %c0_i32_1 = arith.constant 0 : i32
    return %c0_i32, %c0_i32_0 : i32, i32
  }
  func.func @transform_15(%arg0: i32) -> (i32, i32) {
    %c0_i32 = arith.constant 0 : i32
    %c0_i32_0 = arith.constant 0 : i32
    %c0_i32_1 = arith.constant 0 : i32
    return %c0_i32, %c0_i32_0 : i32, i32
  }
  func.func @transform_16(%arg0: i32) -> (i32, i32) {
    %c0_i32 = arith.constant 0 : i32
    %c0_i32_0 = arith.constant 0 : i32
    %c0_i32_1 = arith.constant 0 : i32
    return %c0_i32, %c0_i32_0 : i32, i32
  }
  func.func @transform_17(%arg0: i32) -> (i32, i32) {
    %c0_i32 = arith.constant 0 : i32
    %c0_i32_0 = arith.constant 0 : i32
    %c0_i32_1 = arith.constant 0 : i32
    return %c0_i32, %c0_i32_0 : i32, i32
  }
  func.func @transform_18(%arg0: i32) -> (i32, i32) {
    %c0_i32 = arith.constant 0 : i32
    %c0_i32_0 = arith.constant 0 : i32
    %c0_i32_1 = arith.constant 0 : i32
    return %c0_i32, %c0_i32_0 : i32, i32
  }
  func.func @transform_19(%arg0: i32) -> (i32, i32) {
    %c0_i32 = arith.constant 0 : i32
    %c0_i32_0 = arith.constant 0 : i32
    %c0_i32_1 = arith.constant 0 : i32
    return %c0_i32, %c0_i32_0 : i32, i32
  }
  func.func @transform_20(%arg0: i32) -> (i32, i32) {
    %c0_i32 = arith.constant 0 : i32
    %c0_i32_0 = arith.constant 0 : i32
    %c0_i32_1 = arith.constant 0 : i32
    return %c0_i32, %c0_i32_0 : i32, i32
  }
  func.func @transform_21(%arg0: i32) -> (i32, i32) {
    %c0_i32 = arith.constant 0 : i32
    %c0_i32_0 = arith.constant 0 : i32
    %c0_i32_1 = arith.constant 0 : i32
    return %c0_i32, %c0_i32_0 : i32, i32
  }
  func.func @transform_22(%arg0: i32) -> (i32, i32) {
    %c0_i32 = arith.constant 0 : i32
    %c0_i32_0 = arith.constant 0 : i32
    %c0_i32_1 = arith.constant 0 : i32
    return %c0_i32, %c0_i32_0 : i32, i32
  }
  func.func @transform_23(%arg0: i32) -> (i32, i32) {
    %c0_i32 = arith.constant 0 : i32
    %c0_i32_0 = arith.constant 0 : i32
    %c0_i32_1 = arith.constant 0 : i32
    return %c0_i32, %c0_i32_0 : i32, i32
  }
  func.func @transform_24(%arg0: i32) -> (i32, i32) {
    %c0_i32 = arith.constant 0 : i32
    %c0_i32_0 = arith.constant 0 : i32
    %c0_i32_1 = arith.constant 0 : i32
    return %c0_i32, %c0_i32_0 : i32, i32
  }
  func.func @transform_25(%arg0: i32) -> (i32, i32) {
    %c0_i32 = arith.constant 0 : i32
    %c0_i32_0 = arith.constant 0 : i32
    %c0_i32_1 = arith.constant 0 : i32
    return %c0_i32, %c0_i32_0 : i32, i32
  }
  func.func @transform_26(%arg0: i32) -> (i32, i32) {
    %c0_i32 = arith.constant 0 : i32
    %c0_i32_0 = arith.constant 0 : i32
    %c0_i32_1 = arith.constant 0 : i32
    return %c0_i32, %c0_i32_0 : i32, i32
  }
  func.func @transform_27(%arg0: i32) -> (i32, i32) {
    %c0_i32 = arith.constant 0 : i32
    %c0_i32_0 = arith.constant 0 : i32
    %c0_i32_1 = arith.constant 0 : i32
    return %c0_i32, %c0_i32_0 : i32, i32
  }
  func.func @transform_28(%arg0: i32) -> (i32, i32) {
    %c0_i32 = arith.constant 0 : i32
    %c0_i32_0 = arith.constant 0 : i32
    %c0_i32_1 = arith.constant 0 : i32
    return %c0_i32, %c0_i32_0 : i32, i32
  }
  func.func @transform_29(%arg0: i32) -> (i32, i32) {
    %c0_i32 = arith.constant 0 : i32
    %c0_i32_0 = arith.constant 0 : i32
    %c0_i32_1 = arith.constant 0 : i32
    return %c0_i32, %c0_i32_0 : i32, i32
  }
  func.func @transform_30(%arg0: i32) -> (i32, i32) {
    %c0_i32 = arith.constant 0 : i32
    %c0_i32_0 = arith.constant 0 : i32
    %c0_i32_1 = arith.constant 0 : i32
    return %c0_i32, %c0_i32_0 : i32, i32
  }
  func.func @transform_31(%arg0: i32) -> (i32, i32) {
    %c0_i32 = arith.constant 0 : i32
    %c0_i32_0 = arith.constant 0 : i32
    %c0_i32_1 = arith.constant 0 : i32
    return %c0_i32, %c0_i32_0 : i32, i32
  }
  func.func @transform_32(%arg0: i32) -> (i32, i32, i32) {
    %c0_i32 = arith.constant 0 : i32
    %c0_i32_0 = arith.constant 0 : i32
    %c0_i32_1 = arith.constant 0 : i32
    return %arg0, %c0_i32, %c0_i32_0 : i32, i32, i32
  }
}

</mosaic_0001>

<bundles_post_ra>
// kernel: single_channel_resnet_forward.1
= control target key start
LH: loop header
LB: loop body
LE: loop exit
PB: predicated region body
PF: predicated region fallthrough
CT: control target
= control target key end

     0   :  { %s6442_s6 = smov 1   ;;  %s6443_s10 = smov 2   ;;  %s7869_s0 = inlined_call_operand.smem [shape: u32[33], index: -1, kind: input, shape index: {}] }
   0x1   :  { %s6500_s5 = sld [smem:[%s7869_s0]]   ;;  %s6444_s14 = smov 3  }
   0x2   :  { %s6505_s9 = sld [smem:[%s7869_s0 + %s6442_s6]]   ;;  %s6445_s18 = smov 4  }
   0x3   :  { %s6510_s13 = sld [smem:[%s7869_s0 + %s6443_s10]]   ;;  %s6446_s22 = smov 5  }
   0x4   :  { %s6515_s17 = sld [smem:[%s7869_s0 + %s6444_s14]]   ;;  %s6447_s26 = smov 6  }
   0x5   :  { %s6520_s21 = sld [smem:[%s7869_s0 + %s6445_s18]]   ;;  %s6448_s30 = smov 7  }
   0x6   :  { %s6525_s25 = sld [smem:[%s7869_s0 + %s6446_s22]]   ;;  %s6449_s4 = smov 8  }
   0x7   :  { %s6530_s29 = sld [smem:[%s7869_s0 + %s6447_s26]]   ;;  %s6450_s10 = smov 9  }
   0x8   :  { %s6535_s3 = sld [smem:[%s7869_s0 + %s6448_s30]]   ;;  %s6451_s15 = smov 10  }
   0x9   :  { %s6540_s8 = sld [smem:[%s7869_s0 + %s6449_s4]]   ;;  %s6452_s20 = smov 11  }
   0xa   :  { %s6545_s14 = sld [smem:[%s7869_s0 + %s6450_s10]]   ;;  %s6453_s26 = smov 12  }
   0xb   :  { %s6550_s19 = sld [smem:[%s7869_s0 + %s6451_s15]]   ;;  %s6454_s1 = smov 13  }
   0xc   :  { %s6555_s24 = sld [smem:[%s7869_s0 + %s6452_s20]]   ;;  %s6455_s7 = smov 14  }
   0xd   :  { %s6560_s30 = sld [smem:[%s7869_s0 + %s6453_s26]]   ;;  %s6456_s15 = smov 15  }
   0xe   :  { %s6565_s6 = sld [smem:[%s7869_s0 + %s6454_s1]]   ;;  %s6457_s22 = smov 16  }
   0xf   :  { %s6570_s12 = sld [smem:[%s7869_s0 + %s6455_s7]]   ;;  %s6458_s28 = smov 17  }
  0x10   :  { %s6575_s20 = sld [smem:[%s7869_s0 + %s6456_s15]]   ;;  %s6459_s7 = smov 18  }
  0x11   :  { %s6580_s27 = sld [smem:[%s7869_s0 + %s6457_s22]]   ;;  %s6460_s15 = smov 19  }
  0x12   :  { %s6585_s4 = sld [smem:[%s7869_s0 + %s6458_s28]]   ;;  %s6461_s22 = smov 20  }
  0x13   :  { %s6462_s28 = smov 21  }
  0x14   :  { %7877 = sst [smem:[#allocation4_spill]] %s6565_s6 }
  0x15   :  { %s6590_s6 = sld [smem:[%s7869_s0 + %s6459_s7]]   ;;  %s6463_s7 = smov 22  }
  0x16   :  { %7878 = sst [smem:[#allocation5_spill]] %s6575_s20 }
  0x17   :  { %7879 = sst [smem:[#allocation6_spill]] %s6580_s27 }
  0x18   :  { %7880 = sst [smem:[#allocation7_spill]] %s6585_s4 }
  0x19   :  { %s6595_s20 = sld [smem:[%s7869_s0 + %s6460_s15]]   ;;  %s6464_s15 = smov 23  }
  0x1a   :  { %s6600_s27 = sld [smem:[%s7869_s0 + %s6461_s22]]   ;;  %s6465_s22 = smov 24  }
  0x1b   :  { %7881 = sst [smem:[#allocation8_spill]] %s6590_s6 }
  0x1c   :  { %s6605_s4 = sld [smem:[%s7869_s0 + %s6462_s28]]   ;;  %s6466_s28 = smov 25  }
  0x1d   :  { %s6610_s6 = sld [smem:[%s7869_s0 + %s6463_s7]]   ;;  %s6467_s7 = smov 26  }
  0x1f   :  { %7882 = sst [smem:[#allocation9_spill]] %s6595_s20 }
  0x20   :  { %7883 = sst [smem:[#allocation10_spill]] %s6600_s27 }
  0x21   :  { %s6615_s20 = sld [smem:[%s7869_s0 + %s6464_s15]]   ;;  %s6468_s15 = smov 27  }
  0x22   :  { %7884 = sst [smem:[#allocation11_spill]] %s6605_s4 }
  0x23   :  { %7885 = sst [smem:[#allocation12_spill]] %s6610_s6 }
  0x24   :  { %s6620_s27 = sld [smem:[%s7869_s0 + %s6465_s22]]   ;;  %s6469_s22 = smov 28  }
  0x25   :  { %s6625_s4 = sld [smem:[%s7869_s0 + %s6466_s28]]   ;;  %s6470_s28 = smov 29  }
  0x26   :  { %s6630_s6 = sld [smem:[%s7869_s0 + %s6467_s7]]   ;;  %s6471_s7 = smov 30  }
  0x27   :  { %7886 = sst [smem:[#allocation13_spill]] %s6615_s20 }
  0x28   :  { %s6635_s20 = sld [smem:[%s7869_s0 + %s6468_s15]]   ;;  %s6472_s15 = smov 31  }
  0x2a   :  { %7887 = sst [smem:[#allocation14_spill]] %s6620_s27 }
  0x2b   :  { %7888 = sst [smem:[#allocation15_spill]] %s6625_s4 }
  0x2c   :  { %7889 = sst [smem:[#allocation16_spill]] %s6630_s6 }
  0x2d   :  { %s6640_s27 = sld [smem:[%s7869_s0 + %s6469_s22]]   ;;  %s6473_s22 = smov 32  }
  0x2e   :  { %7890 = sst [smem:[#allocation17_spill]] %s6635_s20 }
  0x2f   :  { %s6645_s4 = sld [smem:[%s7869_s0 + %s6470_s28]]   ;;  %s6662_s28 = smov 0  }
  0x30   :  { %s6650_s6 = sld [smem:[%s7869_s0 + %s6471_s7]]  }
  0x31   :  { %s6655_s20 = sld [smem:[%s7869_s0 + %s6472_s15]]  }
  0x33   :  { %7891 = sst [smem:[#allocation18_spill]] %s6640_s27 }
  0x34   :  { %s6660_s27 = sld [smem:[%s7869_s0 + %s6473_s22]]  }
  0x35 LB: > { %s5126_s1 = sadd.s32 4294967295, %s6440_s28   ;;  %p5130_p0 = scmp.ge.s32.totalorder %s6440_s28, 1  ;;  %s6440_s28 = sphi %s6662_s28, %s75_s28  }
  0x36   : > { %p895_p1 = scmp.lt.s32.totalorder %s6440_s28, 3 }
  0x38   : > { %p896_p2 = pnand %p5130_p0, %p895_p1 }
  0x39   : > { %v5134_v0 = vld [vmem:[%s6500_s5] ss:$0 sm:$0xff] (!%p896_p2)  ;;  %vm1041_vm0 = vcmask (!%p896_p2), 2048   ;;  %s6474_s0 = smov (!%p896_p2), 127   ;;  %v6475_v1 = vmov (!%p896_p2), 0.0   ;;  %vm1052_vm1 = vcmask (!%p896_p2), 3072  }
  0x3a   : > { %899 = sbr.rel (%p896_p2) target bundleno = 5458 (0x1552), region = 148  ;;  %1008 = vrot.lane.b32.xlu0 (!%p896_p2), %v5134_v0, %s6474_s0  ;;  %1042 = vst.msk [vmem:[#allocation2] sm:$0x7] (!%p896_p2), %vm1041_vm0, %v6475_v1  ;;  %p976_p3 = scmp.lt.s32.totalorder (!%p896_p2), %s5126_s1, 1  ;;  %vm1043_vm2 = vcmask (!%p896_p2), 7168   ;;  %vm1567_vm3 = vcmask (!%p896_p2), 254976  }
  0x3b   : > { %1053 = vst.msk [vmem:[#allocation2 + $0x43] sm:$0xf] (!%p896_p2), %vm1052_vm1, %v6475_v1  ;;  %s6476_s10 = smov (!%p896_p2), 1   ;;  %s6477_s11 = smov (!%p896_p2), 2   ;;  %v1421_v54 = vld [vmem:[%s6510_s13] sm:$0xff] (!%p896_p2)  ;;  %vm1110_vm4 = vcmask (!%p896_p2), 15368  }
  0x3c   : > { %s6478_s15 = smov (!%p896_p2), 3   ;;  %s6479_s16 = smov (!%p896_p2), 4   ;;  %5626 = vmatprep.subr.mxu0 (!%p896_p2), %v1421_v54  ;;  %vm1159_vm5 = vcmask (!%p896_p2), 23568   ;;  %vm1208_vm6 = vcmask (!%p896_p2), 31768   ;;  %vm1257_vm7 = vcmask (!%p896_p2), 39968   ;;  %vm1306_vm8 = vcmask (!%p896_p2), 48168  }
  0x3d   : > { %s6480_s18 = smov (!%p896_p2), 5   ;;  %s6481_s22 = smov (!%p896_p2), 6   ;;  %5627 = vmatpush3.msra.mxu0 (!%p896_p2), %v1421_v54  ;;  %vm1355_vm9 = vcmask (!%p896_p2), 56368   ;;  %vm1404_vm10 = vcmask (!%p896_p2), 64568   ;;  %vm1429_vm11 = vcmask (!%p896_p2), 64512   ;;  %vm1569_vm12 = vcmask (!%p896_p2), 261120  }
  0x3e   : > { %s6482_s23 = smov (!%p896_p2), 7   ;;  %vm1938_vm13 = vcmask (!%p896_p2), 253952   ;;  %s6484_s26 = smov (!%p896_p2), 64   ;;  %vm1635_vm14 = vcmask (!%p896_p2), 523520   ;;  %vm1684_vm15 = vcmask (!%p896_p2), 785920   ;;  %vm1733_vm0 = vcmask (!%p896_p2), 1048320  }
  0x3f   : > { %s6485_s0 = smov (!%p896_p2), 32   ;;  %vm2403_vm1 = vcmask (!%p896_p2), 256000  }
  0x41   : > { %s7916_s1 = smov (!%p976_p3, %s5126_s1), 1 }
  0x42   : > { %s5208_s2 = sshll.u32 %s7916_s1, 6 }
  0x43   : > { %s6677_s7 = scalar_lea.vmem %s6505_s9, %s5208_s2  ;;  %s6486_s2 = smov 96  }
  0x44   : > { %v985_v2 = vld [vmem:[%s6677_s7] sm:$0xff]  ;;  %v986_v3 = vld [vmem:[%s6677_s7 + $0x8] sm:$0xff]  ;;  %v987_v4 = vld [vmem:[%s6677_s7 + $0x10] sm:$0xff] }
  0x45   : > { %v988_v5 = vld [vmem:[%s6677_s7 + $0x18] sm:$0xff]  ;;  %v989_v6 = vld [vmem:[%s6677_s7 + $0x20] sm:$0xff]  ;;  %v990_v7 = vld [vmem:[%s6677_s7 + $0x28] sm:$0xff]  ;;  %v1000_v10 = vmul.f32 %v5134_v0, %v985_v2  ;;  %v1001_v11 = vmul.f32 %v5134_v0, %v986_v3  ;;  %v1002_v12 = vmul.f32 %v5134_v0, %v987_v4 }
  0x46   : > { %v991_v8 = vld [vmem:[%s6677_s7 + $0x30] sm:$0xff]  ;;  %v992_v9 = vld [vmem:[%s6677_s7 + $0x38] sm:$0xff]  ;;  %v1003_v13 = vmul.f32 %v5134_v0, %v988_v5  ;;  %v1004_v14 = vmul.f32 %v5134_v0, %v989_v6  ;;  %v1005_v15 = vmul.f32 %v5134_v0, %v990_v7 }
  0x47   : > { %v1006_v16 = vmul.f32 %v5134_v0, %v991_v8  ;;  %v1007_v17 = vmul.f32 %v5134_v0, %v992_v9 }
  0xac   : > { %v1009_v18 = vpop.permute.xlu0 %1008 }
  0xad   : > { %v1011_v19 = vadd.f32 %v1009_v18, %v1000_v10  ;;  %v1012_v20 = vadd.f32 %v1009_v18, %v1001_v11  ;;  %v1013_v21 = vadd.f32 %v1009_v18, %v1002_v12  ;;  %v1014_v22 = vadd.f32 %v1009_v18, %v1003_v13 }
  0xae   : > { %v1015_v23 = vadd.f32 %v1009_v18, %v1004_v14  ;;  %v1016_v24 = vadd.f32 %v1009_v18, %v1005_v15  ;;  %v1017_v25 = vadd.f32 %v1009_v18, %v1006_v16  ;;  %v1018_v26 = vadd.f32 %v1009_v18, %v1007_v17 }
  0xaf   : > { %1044 = vst.msk [vmem:[#allocation2 + $0x3] sm:$0xff] %vm1043_vm2, %v1011_v19  ;;  %1045 = vst.msk [vmem:[#allocation2 + $0xb] sm:$0xff] %vm1043_vm2, %v1012_v20 }
  0xb0   : > { %1046 = vst.msk [vmem:[#allocation2 + $0x13] sm:$0xff] %vm1043_vm2, %v1013_v21  ;;  %1047 = vst.msk [vmem:[#allocation2 + $0x1b] sm:$0xff] %vm1043_vm2, %v1014_v22 }
  0xb1   : > { %1048 = vst.msk [vmem:[#allocation2 + $0x23] sm:$0xff] %vm1043_vm2, %v1015_v23  ;;  %1049 = vst.msk [vmem:[#allocation2 + $0x2b] sm:$0xff] %vm1043_vm2, %v1016_v24 }
  0xb2   : > { %1050 = vst.msk [vmem:[#allocation2 + $0x33] sm:$0xff] %vm1043_vm2, %v1017_v25  ;;  %1051 = vst.msk [vmem:[#allocation2 + $0x3b] sm:$0xff] %vm1043_vm2, %v1018_v26 }
  0xb6   : > { %v1055_v27 = vld [vmem:[#allocation2 + $0x8] sm:$0xff]  ;;  %v1054_v31 = vld [vmem:[#allocation2] sm:$0xff] }
  0xb7   : > { %v1056_v28 = vld [vmem:[#allocation2 + $0x10] sm:$0xff]  ;;  %1063 = vst.msk [vmem:[#allocation3 + $0x20] sm:$0xff] %vm1043_vm2, %v1055_v27  ;;  %v1070_v30 = vld [vmem:[#allocation2 + $0x1] sm:$0xff]  ;;  %1062 = vst.msk [vmem:[#allocation3] sm:$0xff] %vm1043_vm2, %v1054_v31 }
  0xb8   : > { %1064 = vst.msk [vmem:[#allocation3 + $0x40] sm:$0xff] %vm1043_vm2, %v1056_v28  ;;  %v1071_v29 = vld [vmem:[#allocation2 + $0x9] sm:$0xff]  ;;  %1086 = vrot.lane.b32.xlu0 %v1070_v30, %s6476_s10  ;;  %v1057_v45 = vld [vmem:[#allocation2 + $0x18] sm:$0xff]  ;;  %v1058_v46 = vld [vmem:[#allocation2 + $0x20] sm:$0xff] }
  0xb9   : > { %1088 = vrot.lane.b32.xlu1 %v1071_v29, %s6476_s10  ;;  %1568 = vst.msk [vmem:[#allocation2] sm:$0x3] %vm1567_vm3, %v6475_v1  ;;  %v1119_v32 = vld [vmem:[#allocation2 + $0x2] sm:$0xff]  ;;  %v1120_v33 = vld [vmem:[#allocation2 + $0xa] sm:$0xff]  ;;  %v1061_v49 = vld [vmem:[#allocation2 + $0x38] sm:$0xff] }
  0xba   : > { %v1168_v34 = vld [vmem:[#allocation2 + $0x3] sm:$0xff]  ;;  %v1169_v35 = vld [vmem:[#allocation2 + $0xb] sm:$0xff]  ;;  %v6708_v40 = vld [vmem:[#allocation2 + $0x3b] sm:$0xff]  ;;  %1065 = vst.msk [vmem:[#allocation3 + $0x60] sm:$0xff] %vm1043_vm2, %v1057_v45 }
  0xbb   : > { %v1217_v36 = vld [vmem:[#allocation2 + $0x4] sm:$0xff]  ;;  %v1218_v37 = vld [vmem:[#allocation2 + $0xc] sm:$0xff]  ;;  %v6710_v41 = vld [vmem:[#allocation2 + $0x3c] sm:$0xff]  ;;  %1066 = vst.msk [vmem:[#allocation3 + $0x80] sm:$0xff] %vm1043_vm2, %v1058_v46 }
  0xbc   : > { %1137 = vrot.lane.b32.xlu0 %v1120_v33, %s6477_s11  ;;  %v1266_v38 = vld [vmem:[#allocation2 + $0x5] sm:$0xff]  ;;  %v1267_v39 = vld [vmem:[#allocation2 + $0xd] sm:$0xff]  ;;  %v6712_v42 = vld [vmem:[#allocation2 + $0x3d] sm:$0xff]  ;;  %1069 = vst.msk [vmem:[#allocation3 + $0xe0] sm:$0xff] %vm1043_vm2, %v1061_v49 }
  0xbd   : > { %1135 = vrot.lane.b32.xlu1 %v1119_v32, %s6477_s11  ;;  %v6714_v43 = vld [vmem:[#allocation2 + $0x3e] sm:$0xff]  ;;  %v1059_v47 = vld [vmem:[#allocation2 + $0x28] sm:$0xff]  ;;  %v1060_v48 = vld [vmem:[#allocation2 + $0x30] sm:$0xff] }
  0xbe   : > { %v6716_v44 = vld [vmem:[#allocation2 + $0x3f] sm:$0xff]  ;;  %1067 = vst.msk [vmem:[#allocation3 + $0xa0] sm:$0xff] %vm1043_vm2, %v1059_v47  ;;  %1068 = vst.msk [vmem:[#allocation3 + $0xc0] sm:$0xff] %vm1043_vm2, %v1060_v48  ;;  %v1072_v51 = vld [vmem:[#allocation2 + $0x11] sm:$0xff]  ;;  %vm2088_vm2 = vcmask 785408  }
  0xbf   : > { %1578 = vst.msk [vmem:[#allocation2 + $0x42] sm:$0x3] %vm1567_vm3, %v6475_v1  ;;  %v1315_v50 = vld [vmem:[#allocation2 + $0x6] sm:$0xff]  ;;  %v1316_v52 = vld [vmem:[#allocation2 + $0xe] sm:$0xff]  ;;  %v1073_v55 = vld [vmem:[#allocation2 + $0x19] sm:$0xff] }
  0xc0   : > { %1186 = vrot.lane.b32.xlu0 %v1169_v35, %s6478_s15  ;;  %v1364_v53 = vld [vmem:[#allocation2 + $0x7] sm:$0xff]  ;;  %v1121_v56 = vld [vmem:[#allocation2 + $0x12] sm:$0xff]  ;;  %v1122_v58 = vld [vmem:[#allocation2 + $0x1a] sm:$0xff] }
  0xc1   : > { %1184 = vrot.lane.b32.xlu1 %v1168_v34, %s6478_s15  ;;  %v1365_v57 = vld [vmem:[#allocation2 + $0xf] sm:$0xff]  ;;  %v1171_v60 = vld [vmem:[#allocation2 + $0x1b] sm:$0xff]  ;;  %v1172_v10 = vld [vmem:[#allocation2 + $0x23] sm:$0xff] }
  0xc2   : > { %v1170_v59 = vld [vmem:[#allocation2 + $0x13] sm:$0xff]  ;;  %v1220_v62 = vld [vmem:[#allocation2 + $0x1c] sm:$0xff]  ;;  %v1075_v7 = vld [vmem:[#allocation2 + $0x29] sm:$0xff] }
  0xc3   : > { %v1219_v61 = vld [vmem:[#allocation2 + $0x14] sm:$0xff]  ;;  %v1269_v0 = vld [vmem:[#allocation2 + $0x1d] sm:$0xff]  ;;  %v1124_v9 = vld [vmem:[#allocation2 + $0x2a] sm:$0xff] }
  0xc4   : > { %1235 = vrot.lane.b32.xlu0 %v1218_v37, %s6479_s16  ;;  %v1268_v63 = vld [vmem:[#allocation2 + $0x15] sm:$0xff]  ;;  %v1318_v3 = vld [vmem:[#allocation2 + $0x1e] sm:$0xff]  ;;  %v1173_v11 = vld [vmem:[#allocation2 + $0x2b] sm:$0xff] }
  0xc5   : > { %1233 = vrot.lane.b32.xlu1 %v1217_v36, %s6479_s16  ;;  %v1317_v2 = vld [vmem:[#allocation2 + $0x16] sm:$0xff]  ;;  %v1367_v5 = vld [vmem:[#allocation2 + $0x1f] sm:$0xff]  ;;  %v1222_v13 = vld [vmem:[#allocation2 + $0x2c] sm:$0xff] }
  0xc6   : > { %v1366_v4 = vld [vmem:[#allocation2 + $0x17] sm:$0xff]  ;;  %v1074_v6 = vld [vmem:[#allocation2 + $0x21] sm:$0xff]  ;;  %v1271_v15 = vld [vmem:[#allocation2 + $0x2d] sm:$0xff] }
  0xc7   : > { %v1123_v8 = vld [vmem:[#allocation2 + $0x22] sm:$0xff]  ;;  %v1320_v17 = vld [vmem:[#allocation2 + $0x2e] sm:$0xff]  ;;  %v1077_v21 = vld [vmem:[#allocation2 + $0x39] sm:$0xff] }
  0xc8   : > { %1284 = vrot.lane.b32.xlu0 %v1267_v39, %s6480_s18  ;;  %v1221_v12 = vld [vmem:[#allocation2 + $0x24] sm:$0xff]  ;;  %v1369_v19 = vld [vmem:[#allocation2 + $0x2f] sm:$0xff]  ;;  %v1126_v23 = vld [vmem:[#allocation2 + $0x3a] sm:$0xff] }
  0xc9   : > { %1282 = vrot.lane.b32.xlu1 %v1266_v38, %s6480_s18  ;;  %v1270_v14 = vld [vmem:[#allocation2 + $0x25] sm:$0xff]  ;;  %v1076_v20 = vld [vmem:[#allocation2 + $0x31] sm:$0xff] }
  0xca   : > { %v1319_v16 = vld [vmem:[#allocation2 + $0x26] sm:$0xff]  ;;  %v1125_v22 = vld [vmem:[#allocation2 + $0x32] sm:$0xff] }
  0xcb   : > { %v1368_v18 = vld [vmem:[#allocation2 + $0x27] sm:$0xff]  ;;  %v1174_v24 = vld [vmem:[#allocation2 + $0x33] sm:$0xff] }
  0xcc   : > { %1090 = vrot.lane.b32.xlu0 %v1072_v51, %s6476_s10  ;;  %v1223_v25 = vld [vmem:[#allocation2 + $0x34] sm:$0xff] }
  0xcd   : > { %1331 = vrot.lane.b32.xlu1 %v1315_v50, %s6481_s22  ;;  %v1272_v26 = vld [vmem:[#allocation2 + $0x35] sm:$0xff] }
  0xce   : > { %v1321_v27 = vld [vmem:[#allocation2 + $0x36] sm:$0xff] }
  0xcf   : > { %v1370_v28 = vld [vmem:[#allocation2 + $0x37] sm:$0xff] }
  0xd0   : > { %1380 = vrot.lane.b32.xlu0 %v1364_v53, %s6482_s23 }
  0xd1   : > { %1333 = vrot.lane.b32.xlu1 %v1316_v52, %s6481_s22 }
  0xd4   : > { %1139 = vrot.lane.b32.xlu0 %v1121_v56, %s6477_s11 }
  0xd5   : > { %1092 = vrot.lane.b32.xlu1 %v1073_v55, %s6476_s10 }
  0xd8   : > { %1141 = vrot.lane.b32.xlu0 %v1122_v58, %s6477_s11 }
  0xd9   : > { %1382 = vrot.lane.b32.xlu1 %v1365_v57, %s6482_s23 }
  0xdc   : > { %1190 = vrot.lane.b32.xlu0 %v1171_v60, %s6478_s15 }
  0xdd   : > { %1188 = vrot.lane.b32.xlu1 %v1170_v59, %s6478_s15 }
  0xe0   : > { %1239 = vrot.lane.b32.xlu0 %v1220_v62, %s6479_s16 }
  0xe1   : > { %1237 = vrot.lane.b32.xlu1 %v1219_v61, %s6479_s16 }
  0xe4   : > { %1288 = vrot.lane.b32.xlu0 %v1269_v0, %s6480_s18 }
  0xe5   : > { %1286 = vrot.lane.b32.xlu1 %v1268_v63, %s6480_s18 }
  0xe8   : > { %1337 = vrot.lane.b32.xlu0 %v1318_v3, %s6481_s22 }
  0xe9   : > { %1335 = vrot.lane.b32.xlu1 %v1317_v2, %s6481_s22 }
  0xec   : > { %1386 = vrot.lane.b32.xlu0 %v1367_v5, %s6482_s23 }
  0xed   : > { %1384 = vrot.lane.b32.xlu1 %v1366_v4, %s6482_s23 }
  0xf0   : > { %1096 = vrot.lane.b32.xlu0 %v1075_v7, %s6476_s10 }
  0xf1   : > { %1094 = vrot.lane.b32.xlu1 %v1074_v6, %s6476_s10 }
  0xf4   : > { %1145 = vrot.lane.b32.xlu0 %v1124_v9, %s6477_s11 }
  0xf5   : > { %1143 = vrot.lane.b32.xlu1 %v1123_v8, %s6477_s11 }
  0xf8   : > { %1194 = vrot.lane.b32.xlu0 %v1173_v11, %s6478_s15 }
  0xf9   : > { %1192 = vrot.lane.b32.xlu1 %v1172_v10, %s6478_s15 }
  0xfc   : > { %1243 = vrot.lane.b32.xlu0 %v1222_v13, %s6479_s16 }
  0xfd   : > { %1241 = vrot.lane.b32.xlu1 %v1221_v12, %s6479_s16 }
 0x100   : > { %1292 = vrot.lane.b32.xlu0 %v1271_v15, %s6480_s18 }
 0x101   : > { %1290 = vrot.lane.b32.xlu1 %v1270_v14, %s6480_s18 }
 0x104   : > { %1341 = vrot.lane.b32.xlu0 %v1320_v17, %s6481_s22 }
 0x105   : > { %1339 = vrot.lane.b32.xlu1 %v1319_v16, %s6481_s22 }
 0x108   : > { %1390 = vrot.lane.b32.xlu0 %v1369_v19, %s6482_s23 }
 0x109   : > { %1388 = vrot.lane.b32.xlu1 %v1368_v18, %s6482_s23 }
 0x10c   : > { %1100 = vrot.lane.b32.xlu0 %v1077_v21, %s6476_s10 }
 0x10d   : > { %1098 = vrot.lane.b32.xlu1 %v1076_v20, %s6476_s10  ;;  %s6488_s10 = smov 126  }
 0x110   : > { %1149 = vrot.lane.b32.xlu0 %v1126_v23, %s6477_s11 }
 0x111   : > { %1147 = vrot.lane.b32.xlu1 %v1125_v22, %s6477_s11  ;;  %s6489_s11 = smov 125  }
 0x114   : > { %1198 = vrot.lane.b32.xlu0 %v6708_v40, %s6478_s15 }
 0x115   : > { %1196 = vrot.lane.b32.xlu1 %v1174_v24, %s6478_s15  ;;  %s7899_s15 = sld [smem:[#allocation4_spill]] }
 0x118   : > { %1247 = vrot.lane.b32.xlu0 %v6710_v41, %s6479_s16 }
 0x119   : > { %1245 = vrot.lane.b32.xlu1 %v1223_v25, %s6479_s16  ;;  %s7900_s16 = sld [smem:[#allocation6_spill]] }
 0x11c   : > { %1296 = vrot.lane.b32.xlu0 %v6712_v42, %s6480_s18 }
 0x11d   : > { %1294 = vrot.lane.b32.xlu1 %v1272_v26, %s6480_s18  ;;  %s7903_s18 = sld [smem:[#allocation8_spill]] }
 0x120   : > { %1345 = vrot.lane.b32.xlu0 %v6714_v43, %s6481_s22 }
 0x121   : > { %1343 = vrot.lane.b32.xlu1 %v1321_v27, %s6481_s22  ;;  %s7904_s22 = sld [smem:[#allocation12_spill]] }
 0x124   : > { %1394 = vrot.lane.b32.xlu0 %v6716_v44, %s6482_s23 }
 0x125   : > { %1392 = vrot.lane.b32.xlu1 %v1370_v28, %s6482_s23  ;;  %s7905_s23 = sld [smem:[#allocation7_spill]] }
 0x12a   : > { %v1087_v30 = vpop.permute.xlu0 %1086 }
 0x12b   : > { %v1089_v29 = vpop.permute.xlu1 %1088  ;;  %1111 = vst.msk [vmem:[#allocation3] sm:$0xff] %vm1110_vm4, %v1087_v30  ;;  %v1774_v30 = vld [vmem:[%s6520_s21] sm:$0xff] }
 0x12c   : > { %1112 = vst.msk [vmem:[#allocation3 + $0x20] sm:$0xff] %vm1110_vm4, %v1089_v29 }
 0x12e   : > { %v1138_v32 = vpop.permute.xlu0 %1137 }
 0x12f   : > { %v1136_v31 = vpop.permute.xlu1 %1135  ;;  %1161 = vst.msk [vmem:[#allocation3 + $0x20] sm:$0xff] %vm1159_vm5, %v1138_v32  ;;  %v1776_v32 = vld [vmem:[%s6520_s21 + $0x10] sm:$0xff] }
 0x130   : > { %1160 = vst.msk [vmem:[#allocation3] sm:$0xff] %vm1159_vm5, %v1136_v31  ;;  %v1775_v31 = vld [vmem:[%s6520_s21 + $0x8] sm:$0xff] }
 0x132   : > { %v1187_v34 = vpop.permute.xlu0 %1186 }
 0x133   : > { %v1185_v33 = vpop.permute.xlu1 %1184  ;;  %1210 = vst.msk [vmem:[#allocation3 + $0x20] sm:$0xff] %vm1208_vm6, %v1187_v34  ;;  %v5834_v34 = vpack.c.bf16 %v1775_v31, %v1774_v30 }
 0x134   : > { %1209 = vst.msk [vmem:[#allocation3] sm:$0xff] %vm1208_vm6, %v1185_v33  ;;  %v6483_v33 = vmov 0.0|0.0  }
 0x135   : > { %5833 = vmatprep.subr.bf16.mxu1 %v6483_v33 }
 0x136   : > { %v1236_v36 = vpop.permute.xlu0 %1235  ;;  %5835 = vmatpush1.bf16.msra.mxu1 %v5834_v34 }
 0x137   : > { %v1234_v35 = vpop.permute.xlu1 %1233  ;;  %1259 = vst.msk [vmem:[#allocation3 + $0x20] sm:$0xff] %vm1257_vm7, %v1236_v36  ;;  %5836 = vmatprep.subr.bf16.mxu1 %v6483_v33 }
 0x138   : > { %1258 = vst.msk [vmem:[#allocation3] sm:$0xff] %vm1257_vm7, %v1234_v35  ;;  %v1777_v35 = vld [vmem:[%s6520_s21 + $0x18] sm:$0xff] }
 0x139   : > { %v5837_v36 = vpack.c.bf16 %v1777_v35, %v1776_v32 }
 0x13a   : > { %v1285_v38 = vpop.permute.xlu0 %1284 }
 0x13b   : > { %v1283_v37 = vpop.permute.xlu1 %1282  ;;  %1308 = vst.msk [vmem:[#allocation3 + $0x20] sm:$0xff] %vm1306_vm8, %v1285_v38  ;;  %v1779_v38 = vld [vmem:[%s6520_s21 + $0x28] sm:$0xff]  ;;  %5838 = vmatpush1.bf16.msra.mxu1 %v5837_v36 }
 0x13c   : > { %1307 = vst.msk [vmem:[#allocation3] sm:$0xff] %vm1306_vm8, %v1283_v37  ;;  %v1778_v37 = vld [vmem:[%s6520_s21 + $0x20] sm:$0xff]  ;;  %5839 = vmatprep.subr.bf16.mxu1 %v6483_v33 }
 0x13e   : > { %v1091_v40 = vpop.permute.xlu0 %1090 }
 0x13f   : > { %v1332_v39 = vpop.permute.xlu1 %1331  ;;  %1113 = vst.msk [vmem:[#allocation3 + $0x40] sm:$0xff] %vm1110_vm4, %v1091_v40  ;;  %v1780_v40 = vld [vmem:[%s6520_s21 + $0x30] sm:$0xff] }
 0x140   : > { %1356 = vst.msk [vmem:[#allocation3] sm:$0xff] %vm1355_vm9, %v1332_v39  ;;  %v5840_v39 = vpack.c.bf16 %v1779_v38, %v1778_v37 }
 0x142   : > { %v1381_v42 = vpop.permute.xlu0 %1380  ;;  %5841 = vmatpush1.bf16.msra.mxu1 %v5840_v39 }
 0x143   : > { %v1334_v41 = vpop.permute.xlu1 %1333  ;;  %1405 = vst.msk [vmem:[#allocation3] sm:$0xff] %vm1404_vm10, %v1381_v42  ;;  %5842 = vmatprep.subr.bf16.mxu1 %v6483_v33 }
 0x144   : > { %1357 = vst.msk [vmem:[#allocation3 + $0x20] sm:$0xff] %vm1355_vm9, %v1334_v41  ;;  %v1781_v41 = vld [vmem:[%s6520_s21 + $0x38] sm:$0xff] }
 0x145   : > { %v5843_v42 = vpack.c.bf16 %v1781_v41, %v1780_v40 }
 0x146   : > { %v1140_v44 = vpop.permute.xlu0 %1139 }
 0x147   : > { %v1093_v43 = vpop.permute.xlu1 %1092  ;;  %1162 = vst.msk [vmem:[#allocation3 + $0x40] sm:$0xff] %vm1159_vm5, %v1140_v44  ;;  %v1783_v44 = vld [vmem:[%s6520_s21 + $0x48] sm:$0xff]  ;;  %5844 = vmatpush1.bf16.msra.mxu1 %v5843_v42 }
 0x148   : > { %1114 = vst.msk [vmem:[#allocation3 + $0x60] sm:$0xff] %vm1110_vm4, %v1093_v43  ;;  %v1782_v43 = vld [vmem:[%s6520_s21 + $0x40] sm:$0xff]  ;;  %5845 = vmatprep.subr.bf16.mxu1 %v6483_v33 }
 0x14a   : > { %v1142_v46 = vpop.permute.xlu0 %1141  ;;  %v1413_v47 = vld [vmem:[#allocation3] sm:$0xff] }
 0x14b   : > { %v1383_v45 = vpop.permute.xlu1 %1382  ;;  %1163 = vst.msk [vmem:[#allocation3 + $0x60] sm:$0xff] %vm1159_vm5, %v1142_v46  ;;  %5628 = vmatprep.mubr.msk.f32.mxu0 %vm1429_vm11, %v1413_v47  ;;  %v1784_v46 = vld [vmem:[%s6520_s21 + $0x50] sm:$0xff]  ;;  %v1785_v47 = vld [vmem:[%s6520_s21 + $0x58] sm:$0xff] }
 0x14c   : > { %1406 = vst.msk [vmem:[#allocation3 + $0x20] sm:$0xff] %vm1404_vm10, %v1383_v45  ;;  %v5846_v45 = vpack.c.bf16 %v1783_v44, %v1782_v43 }
 0x14e   : > { %v1191_v49 = vpop.permute.xlu0 %1190  ;;  %5847 = vmatpush1.bf16.msra.mxu1 %v5846_v45 }
 0x14f   : > { %v1189_v48 = vpop.permute.xlu1 %1188  ;;  %1212 = vst.msk [vmem:[#allocation3 + $0x60] sm:$0xff] %vm1208_vm6, %v1191_v49  ;;  %5848 = vmatprep.subr.bf16.mxu1 %v6483_v33  ;;  %v6862_v49 = vld [vmem:[%s6515_s17] ss:$0 sm:$0xff] }
 0x150   : > { %1211 = vst.msk [vmem:[#allocation3 + $0x40] sm:$0xff] %vm1208_vm6, %v1189_v48  ;;  %v5849_v48 = vpack.c.bf16 %v1785_v47, %v1784_v46 }
 0x152   : > { %v1240_v51 = vpop.permute.xlu0 %1239  ;;  %5850 = vmatpush1.bf16.msra.mxu1 %v5849_v48 }
 0x153   : > { %v1238_v50 = vpop.permute.xlu1 %1237  ;;  %v1414_v52 = vld [vmem:[#allocation3 + $0x20] sm:$0xff]  ;;  %1261 = vst.msk [vmem:[#allocation3 + $0x60] sm:$0xff] %vm1257_vm7, %v1240_v51  ;;  %5851 = vmatprep.subr.bf16.mxu1 %v6483_v33  ;;  %v1786_v51 = vld [vmem:[%s6520_s21 + $0x60] sm:$0xff] }
 0x154   : > { %1260 = vst.msk [vmem:[#allocation3 + $0x40] sm:$0xff] %vm1257_vm7, %v1238_v50  ;;  %5629 = vmatmul.mubr.msk.f32.vlgmr.msra.gmra.mrb[0].mxu0 %vm1429_vm11, %v1414_v52  ;;  %v1787_v52 = vld [vmem:[%s6520_s21 + $0x68] sm:$0xff] }
 0x156   : > { %v1289_v54 = vpop.permute.xlu0 %1288 }
 0x157   : > { %v1287_v53 = vpop.permute.xlu1 %1286  ;;  %1310 = vst.msk [vmem:[#allocation3 + $0x60] sm:$0xff] %vm1306_vm8, %v1289_v54 }
 0x158   : > { %1309 = vst.msk [vmem:[#allocation3 + $0x40] sm:$0xff] %vm1306_vm8, %v1287_v53 }
 0x15a   : > { %v1338_v56 = vpop.permute.xlu0 %1337 }
 0x15b   : > { %v1336_v55 = vpop.permute.xlu1 %1335  ;;  %1359 = vst.msk [vmem:[#allocation3 + $0x60] sm:$0xff] %vm1355_vm9, %v1338_v56 }
 0x15c   : > { %1358 = vst.msk [vmem:[#allocation3 + $0x40] sm:$0xff] %vm1355_vm9, %v1336_v55  ;;  %v5852_v55 = vpack.c.bf16 %v1787_v52, %v1786_v51 }
 0x15e   : > { %v1387_v58 = vpop.permute.xlu0 %1386  ;;  %5853 = vmatpush1.bf16.msra.mxu1 %v5852_v55 }
 0x15f   : > { %v1385_v57 = vpop.permute.xlu1 %1384  ;;  %1408 = vst.msk [vmem:[#allocation3 + $0x60] sm:$0xff] %vm1404_vm10, %v1387_v58  ;;  %5854 = vmatprep.subr.bf16.mxu1 %v6483_v33 }
 0x160   : > { %1407 = vst.msk [vmem:[#allocation3 + $0x40] sm:$0xff] %vm1404_vm10, %v1385_v57 }
 0x162   : > { %v1097_v60 = vpop.permute.xlu0 %1096 }
 0x163   : > { %v1095_v59 = vpop.permute.xlu1 %1094  ;;  %1116 = vst.msk [vmem:[#allocation3 + $0xa0] sm:$0xff] %vm1110_vm4, %v1097_v60  ;;  %v1789_v60 = vld [vmem:[%s6520_s21 + $0x78] sm:$0xff] }
 0x164   : > { %1115 = vst.msk [vmem:[#allocation3 + $0x80] sm:$0xff] %vm1110_vm4, %v1095_v59  ;;  %v1788_v59 = vld [vmem:[%s6520_s21 + $0x70] sm:$0xff] }
 0x166   : > { %v1146_v62 = vpop.permute.xlu0 %1145  ;;  %v1416_v0 = vld [vmem:[#allocation3 + $0x60] sm:$0xff] }
 0x167   : > { %v1144_v61 = vpop.permute.xlu1 %1143  ;;  %v1415_v63 = vld [vmem:[#allocation3 + $0x40] sm:$0xff]  ;;  %1165 = vst.msk [vmem:[#allocation3 + $0xa0] sm:$0xff] %vm1159_vm5, %v1146_v62  ;;  %v1790_v62 = vld [vmem:[%s6520_s21 + $0x80] sm:$0xff] }
 0x168   : > { %1164 = vst.msk [vmem:[#allocation3 + $0x80] sm:$0xff] %vm1159_vm5, %v1144_v61  ;;  %5631 = vmatprep.mubr.msk.f32.mxu0 %vm1429_vm11, %v1415_v63  ;;  %v5855_v61 = vpack.c.bf16 %v1789_v60, %v1788_v59  ;;  %v1791_v63 = vld [vmem:[%s6520_s21 + $0x88] sm:$0xff] }
 0x169   : > { %5632 = vmatmul.mubr.msk.f32.gmra.mrb[2].mxu0 %vm1429_vm11, %v1416_v0  ;;  %v5858_v0 = vpack.c.bf16 %v1791_v63, %v1790_v62 }
 0x16a   : > { %v1195_v3 = vpop.permute.xlu0 %1194  ;;  %5856 = vmatpush1.bf16.msra.mxu1 %v5855_v61 }
 0x16b   : > { %v1193_v2 = vpop.permute.xlu1 %1192  ;;  %1214 = vst.msk [vmem:[#allocation3 + $0xa0] sm:$0xff] %vm1208_vm6, %v1195_v3  ;;  %5857 = vmatprep.subr.bf16.mxu1 %v6483_v33  ;;  %v1793_v3 = vld [vmem:[%s6520_s21 + $0x98] sm:$0xff] }
 0x16c   : > { %1213 = vst.msk [vmem:[#allocation3 + $0x80] sm:$0xff] %vm1208_vm6, %v1193_v2  ;;  %v1792_v2 = vld [vmem:[%s6520_s21 + $0x90] sm:$0xff] }
 0x16e   : > { %v1244_v5 = vpop.permute.xlu0 %1243  ;;  %5859 = vmatpush1.bf16.msra.mxu1 %v5858_v0 }
 0x16f   : > { %v1242_v4 = vpop.permute.xlu1 %1241  ;;  %1263 = vst.msk [vmem:[#allocation3 + $0xa0] sm:$0xff] %vm1257_vm7, %v1244_v5  ;;  %v5861_v5 = vpack.c.bf16 %v1793_v3, %v1792_v2  ;;  %5860 = vmatprep.subr.bf16.mxu1 %v6483_v33 }
 0x170   : > { %1262 = vst.msk [vmem:[#allocation3 + $0x80] sm:$0xff] %vm1257_vm7, %v1242_v4 }
 0x172   : > { %v1293_v7 = vpop.permute.xlu0 %1292  ;;  %5862 = vmatpush1.bf16.msra.mxu1 %v5861_v5 }
 0x173   : > { %v1291_v6 = vpop.permute.xlu1 %1290  ;;  %1312 = vst.msk [vmem:[#allocation3 + $0xa0] sm:$0xff] %vm1306_vm8, %v1293_v7 }
 0x174   : > { %1311 = vst.msk [vmem:[#allocation3 + $0x80] sm:$0xff] %vm1306_vm8, %v1291_v6 }
 0x176   : > { %v1342_v9 = vpop.permute.xlu0 %1341 }
 0x177   : > { %v1340_v8 = vpop.permute.xlu1 %1339  ;;  %1361 = vst.msk [vmem:[#allocation3 + $0xa0] sm:$0xff] %vm1355_vm9, %v1342_v9 }
 0x178   : > { %1360 = vst.msk [vmem:[#allocation3 + $0x80] sm:$0xff] %vm1355_vm9, %v1340_v8 }
 0x17a   : > { %v1391_v11 = vpop.permute.xlu0 %1390 }
 0x17b   : > { %v1389_v10 = vpop.permute.xlu1 %1388  ;;  %1410 = vst.msk [vmem:[#allocation3 + $0xa0] sm:$0xff] %vm1404_vm10, %v1391_v11 }
 0x17c   : > { %1409 = vst.msk [vmem:[#allocation3 + $0x80] sm:$0xff] %vm1404_vm10, %v1389_v10 }
 0x17e   : > { %v1101_v13 = vpop.permute.xlu0 %1100 }
 0x17f   : > { %v1099_v12 = vpop.permute.xlu1 %1098  ;;  %1118 = vst.msk [vmem:[#allocation3 + $0xe0] sm:$0xff] %vm1110_vm4, %v1101_v13 }
 0x180   : > { %1117 = vst.msk [vmem:[#allocation3 + $0xc0] sm:$0xff] %vm1110_vm4, %v1099_v12  ;;  %vm2305_vm4 = vcmask 523264  }
 0x182   : > { %v1150_v15 = vpop.permute.xlu0 %1149  ;;  %v1418_v17 = vld [vmem:[#allocation3 + $0xa0] sm:$0xff] }
 0x183   : > { %v1148_v14 = vpop.permute.xlu1 %1147  ;;  %v1417_v16 = vld [vmem:[#allocation3 + $0x80] sm:$0xff]  ;;  %1167 = vst.msk [vmem:[#allocation3 + $0xe0] sm:$0xff] %vm1159_vm5, %v1150_v15 }
 0x184   : > { %1166 = vst.msk [vmem:[#allocation3 + $0xc0] sm:$0xff] %vm1159_vm5, %v1148_v14  ;;  %5634 = vmatprep.mubr.msk.f32.mxu0 %vm1429_vm11, %v1417_v16 }
 0x185   : > { %5635 = vmatmul.mubr.msk.f32.gmra.mrb[4].mxu0 %vm1429_vm11, %v1418_v17 }
 0x186   : > { %v1199_v19 = vpop.permute.xlu0 %1198 }
 0x187   : > { %v1197_v18 = vpop.permute.xlu1 %1196  ;;  %1216 = vst.msk [vmem:[#allocation3 + $0xe0] sm:$0xff] %vm1208_vm6, %v1199_v19 }
 0x188   : > { %1215 = vst.msk [vmem:[#allocation3 + $0xc0] sm:$0xff] %vm1208_vm6, %v1197_v18 }
 0x18a   : > { %v1248_v21 = vpop.permute.xlu0 %1247 }
 0x18b   : > { %v1246_v20 = vpop.permute.xlu1 %1245  ;;  %1265 = vst.msk [vmem:[#allocation3 + $0xe0] sm:$0xff] %vm1257_vm7, %v1248_v21 }
 0x18c   : > { %1264 = vst.msk [vmem:[#allocation3 + $0xc0] sm:$0xff] %vm1257_vm7, %v1246_v20 }
 0x18e   : > { %v1297_v23 = vpop.permute.xlu0 %1296 }
 0x18f   : > { %v1295_v22 = vpop.permute.xlu1 %1294  ;;  %1314 = vst.msk [vmem:[#allocation3 + $0xe0] sm:$0xff] %vm1306_vm8, %v1297_v23 }
 0x190   : > { %1313 = vst.msk [vmem:[#allocation3 + $0xc0] sm:$0xff] %vm1306_vm8, %v1295_v22 }
 0x192   : > { %v1346_v25 = vpop.permute.xlu0 %1345 }
 0x193   : > { %v1344_v24 = vpop.permute.xlu1 %1343  ;;  %1363 = vst.msk [vmem:[#allocation3 + $0xe0] sm:$0xff] %vm1355_vm9, %v1346_v25 }
 0x194   : > { %1362 = vst.msk [vmem:[#allocation3 + $0xc0] sm:$0xff] %vm1355_vm9, %v1344_v24 }
 0x196   : > { %v1395_v27 = vpop.permute.xlu0 %1394 }
 0x197   : > { %v1393_v26 = vpop.permute.xlu1 %1392  ;;  %1412 = vst.msk [vmem:[#allocation3 + $0xe0] sm:$0xff] %vm1404_vm10, %v1395_v27 }
 0x198   : > { %1411 = vst.msk [vmem:[#allocation3 + $0xc0] sm:$0xff] %vm1404_vm10, %v1393_v26 }
 0x19e   : > { %v1420_v29 = vld [vmem:[#allocation3 + $0xe0] sm:$0xff] }
 0x19f   : > { %v1419_v28 = vld [vmem:[#allocation3 + $0xc0] sm:$0xff] }
 0x1a0   : > { %5637 = vmatprep.mubr.msk.f32.mxu0 %vm1429_vm11, %v1419_v28 }
 0x1a1   : > { %5638 = vmatmul.mubr.msk.f32.gmra.mrb[6].mxu0 %vm1429_vm11, %v1420_v29 }
 0x227   : > { %v5630_v50 = vpop.f32.mrb[0].mxu0 }
 0x228   : > { %v1526_v53 = vadd.f32 %v5630_v50, %v6862_v49  ;;  %v1520_v54 = vpop.f32.mrb[1].mxu0 }
 0x229   : > { %v1521_v56 = vadd.f32 %v6862_v49, %v1520_v54 }
 0x22a   : > { %v1560_v57 = vmax.f32 %v1526_v53, 0.0 }
 0x22b   : > { %v1559_v58 = vmax.f32 %v1521_v56, 0.0 }
 0x22c   : > { %1571 = vst.msk [vmem:[#allocation2 + $0xa] sm:$0xff] %vm1569_vm12, %v1560_v57 }
 0x22d   : > { %1570 = vst.msk [vmem:[#allocation2 + $0x2] sm:$0xff] %vm1569_vm12, %v1559_v58 }
 0x233   : > { %v1645_v4 = vld [vmem:[#allocation2 + $0xa] sm:$0xff] }
 0x234   : > { %1662 = vrot.lane.b32.xlu1 %v1645_v4, %s6484_s26  ;;  %v1644_v6 = vld [vmem:[#allocation2 + $0x2] sm:$0xff] }
 0x235   : > { %v1742_v7 = vld [vmem:[#allocation2 + $0x4] sm:$0xff]  ;;  %1660 = vrot.lane.b32.xlu0 %v1644_v6, %s6484_s26 }
 0x236   : > { %v1579_v8 = vld [vmem:[#allocation2] sm:$0xff]  ;;  %v1580_v9 = vld [vmem:[#allocation2 + $0x8] sm:$0xff]  ;;  %1750 = vst.msk [vmem:[#allocation3 + $0x8] sm:$0xff] %vm1569_vm12, %v1742_v7 }
 0x237   : > { %1587 = vst.msk [vmem:[#allocation3] sm:$0xff] %vm1569_vm12, %v1579_v8  ;;  %1588 = vst.msk [vmem:[#allocation3 + $0x20] sm:$0xff] %vm1569_vm12, %v1580_v9  ;;  %v1595_v10 = vld [vmem:[#allocation2 + $0x1] sm:$0xff]  ;;  %v1596_v11 = vld [vmem:[#allocation2 + $0x9] sm:$0xff] }
 0x238   : > { %1939 = vst.msk [vmem:[#allocation2] sm:$0x1] %vm1938_vm13, %v6475_v1  ;;  %1611 = vrot.lane.b32.xlu1 %v1595_v10, %s6485_s0  ;;  %v1693_v12 = vld [vmem:[#allocation2 + $0x3] sm:$0xff] }
 0x239   : > { %1613 = vrot.lane.b32.xlu0 %v1596_v11, %s6485_s0 }
 0x23c   : > { %v5633_v13 = vpop.f32.mrb[2].mxu0  ;;  %1709 = vrot.lane.b32.xlu1 %v1693_v12, %s6486_s2 }
 0x23d   : > { %v1759_v14 = vld [vmem:[#allocation3 + $0x8] sm:$0xff]  ;;  %v1536_v15 = vadd.f32 %v5633_v13, %v6862_v49  ;;  %v1530_v16 = vpop.f32.mrb[3].mxu0 }
 0x23e   : > { %5145 = vmatprep.mubr.msk.f32.mxu1 %vm1569_vm12, %v1759_v14  ;;  %v1531_v17 = vadd.f32 %v6862_v49, %v1530_v16 }
 0x23f   : > { %v1562_v18 = vmax.f32 %v1536_v15, 0.0 }
 0x240   : > { %v1561_v19 = vmax.f32 %v1531_v17, 0.0 }
 0x241   : > { %1573 = vst.msk [vmem:[#allocation2 + $0x1a] sm:$0xff] %vm1569_vm12, %v1562_v18 }
 0x242   : > { %1572 = vst.msk [vmem:[#allocation2 + $0x12] sm:$0xff] %vm1569_vm12, %v1561_v19 }
 0x248   : > { %v1647_v20 = vld [vmem:[#allocation2 + $0x1a] sm:$0xff] }
 0x249   : > { %1666 = vrot.lane.b32.xlu1 %v1647_v20, %s6484_s26  ;;  %v1694_v21 = vld [vmem:[#allocation2 + $0xb] sm:$0xff]  ;;  %v1582_v24 = vld [vmem:[#allocation2 + $0x18] sm:$0xff] }
 0x24a   : > { %1711 = vrot.lane.b32.xlu0 %v1694_v21, %s6486_s2  ;;  %v1743_v22 = vld [vmem:[#allocation2 + $0xc] sm:$0xff]  ;;  %v1744_v25 = vld [vmem:[#allocation2 + $0x14] sm:$0xff]  ;;  %1590 = vst.msk [vmem:[#allocation3 + $0x60] sm:$0xff] %vm1569_vm12, %v1582_v24 }
 0x24b   : > { %1751 = vst.msk [vmem:[#allocation3 + $0x28] sm:$0xff] %vm1569_vm12, %v1743_v22  ;;  %v1581_v23 = vld [vmem:[#allocation2 + $0x10] sm:$0xff]  ;;  %1752 = vst.msk [vmem:[#allocation3 + $0x48] sm:$0xff] %vm1569_vm12, %v1744_v25  ;;  %v1598_v29 = vld [vmem:[#allocation2 + $0x19] sm:$0xff] }
 0x24c   : > { %v1597_v26 = vld [vmem:[#allocation2 + $0x11] sm:$0xff]  ;;  %1589 = vst.msk [vmem:[#allocation3 + $0x40] sm:$0xff] %vm1569_vm12, %v1581_v23 }
 0x24d   : > { %1615 = vrot.lane.b32.xlu1 %v1597_v26, %s6485_s0  ;;  %v1646_v27 = vld [vmem:[#allocation2 + $0x12] sm:$0xff] }
 0x24e   : > { %1664 = vrot.lane.b32.xlu0 %v1646_v27, %s6484_s26  ;;  %v1695_v28 = vld [vmem:[#allocation2 + $0x13] sm:$0xff] }
 0x251   : > { %1713 = vrot.lane.b32.xlu1 %v1695_v28, %s6486_s2 }
 0x252   : > { %1617 = vrot.lane.b32.xlu0 %v1598_v29, %s6485_s0  ;;  %v1761_v8 = vld [vmem:[#allocation3 + $0x28] sm:$0xff] }
 0x253   : > { %v1763_v16 = vld [vmem:[#allocation3 + $0x48] sm:$0xff] }
 0x258   : > { %v5636_v30 = vpop.f32.mrb[4].mxu0 }
 0x259   : > { %v1546_v31 = vadd.f32 %v5636_v30, %v6862_v49  ;;  %v1540_v32 = vpop.f32.mrb[5].mxu0 }
 0x25a   : > { %v1541_v34 = vadd.f32 %v6862_v49, %v1540_v32 }
 0x25b   : > { %v1564_v35 = vmax.f32 %v1546_v31, 0.0 }
 0x25c   : > { %v1563_v36 = vmax.f32 %v1541_v34, 0.0 }
 0x25d   : > { %1575 = vst.msk [vmem:[#allocation2 + $0x2a] sm:$0xff] %vm1569_vm12, %v1564_v35 }
 0x25e   : > { %1574 = vst.msk [vmem:[#allocation2 + $0x22] sm:$0xff] %vm1569_vm12, %v1563_v36 }
 0x264   : > { %v1649_v37 = vld [vmem:[#allocation2 + $0x2a] sm:$0xff] }
 0x265   : > { %1670 = vrot.lane.b32.xlu1 %v1649_v37, %s6484_s26  ;;  %v1696_v38 = vld [vmem:[#allocation2 + $0x1b] sm:$0xff]  ;;  %v1584_v41 = vld [vmem:[#allocation2 + $0x28] sm:$0xff] }
 0x266   : > { %1715 = vrot.lane.b32.xlu0 %v1696_v38, %s6486_s2  ;;  %v1745_v39 = vld [vmem:[#allocation2 + $0x1c] sm:$0xff]  ;;  %v1746_v42 = vld [vmem:[#allocation2 + $0x24] sm:$0xff]  ;;  %1592 = vst.msk [vmem:[#allocation3 + $0xa0] sm:$0xff] %vm1569_vm12, %v1584_v41 }
 0x267   : > { %1753 = vst.msk [vmem:[#allocation3 + $0x68] sm:$0xff] %vm1569_vm12, %v1745_v39  ;;  %v1583_v40 = vld [vmem:[#allocation2 + $0x20] sm:$0xff]  ;;  %1754 = vst.msk [vmem:[#allocation3 + $0x88] sm:$0xff] %vm1569_vm12, %v1746_v42  ;;  %v1600_v46 = vld [vmem:[#allocation2 + $0x29] sm:$0xff] }
 0x268   : > { %v1599_v43 = vld [vmem:[#allocation2 + $0x21] sm:$0xff]  ;;  %1591 = vst.msk [vmem:[#allocation3 + $0x80] sm:$0xff] %vm1569_vm12, %v1583_v40  ;;  %v6969_v42 = vld [vmem:[%s6525_s25] ss:$0 sm:$0xff] }
 0x269   : > { %1619 = vrot.lane.b32.xlu1 %v1599_v43, %s6485_s0  ;;  %v1648_v44 = vld [vmem:[#allocation2 + $0x22] sm:$0xff] }
 0x26a   : > { %1668 = vrot.lane.b32.xlu0 %v1648_v44, %s6484_s26  ;;  %v1697_v45 = vld [vmem:[#allocation2 + $0x23] sm:$0xff] }
 0x26b   : > { %v2069_v44 = vld [vmem:[%s6530_s29] sm:$0xff] }
 0x26d   : > { %1717 = vrot.lane.b32.xlu1 %v1697_v45, %s6486_s2  ;;  %v2070_v45 = vld [vmem:[%s6530_s29 + $0x8] sm:$0xff] }
 0x26e   : > { %1621 = vrot.lane.b32.xlu0 %v1600_v46, %s6485_s0  ;;  %v1765_v18 = vld [vmem:[#allocation3 + $0x68] sm:$0xff] }
 0x26f   : > { %v1767_v26 = vld [vmem:[#allocation3 + $0x88] sm:$0xff] }
 0x270   : > { %v2071_v46 = vld [vmem:[%s6530_s29 + $0x10] sm:$0xff] }
 0x274   : > { %v5639_v47 = vpop.f32.mrb[6].mxu0 }
 0x275   : > { %v1556_v48 = vadd.f32 %v5639_v47, %v6862_v49  ;;  %v1550_v50 = vpop.f32.mrb[7].mxu0 }
 0x276   : > { %v1551_v51 = vadd.f32 %v6862_v49, %v1550_v50  ;;  %v5863_v50 = vpack.c.bf16 %v2070_v45, %v2069_v44 }
 0x277   : > { %v1566_v52 = vmax.f32 %v1556_v48, 0.0 }
 0x278   : > { %v1565_v53 = vmax.f32 %v1551_v51, 0.0  ;;  %v2072_v51 = vld [vmem:[%s6530_s29 + $0x18] sm:$0xff]  ;;  %5864 = vmatprep.subr.bf16.mxu1 %v5863_v50 }
 0x279   : > { %1577 = vst.msk [vmem:[#allocation2 + $0x3a] sm:$0xff] %vm1569_vm12, %v1566_v52  ;;  %v5867_v52 = vpack.c.bf16 %v2072_v51, %v2071_v46 }
 0x27a   : > { %1576 = vst.msk [vmem:[#allocation2 + $0x32] sm:$0xff] %vm1569_vm12, %v1565_v53  ;;  %v2073_v53 = vld [vmem:[%s6530_s29 + $0x20] sm:$0xff] }
 0x280   : > { %v1651_v54 = vld [vmem:[#allocation2 + $0x3a] sm:$0xff] }
 0x281   : > { %v1700_v55 = vld [vmem:[#allocation2 + $0x3b] sm:$0xff]  ;;  %v1698_v57 = vld [vmem:[#allocation2 + $0x2b] sm:$0xff]  ;;  %v1699_v63 = vld [vmem:[#allocation2 + $0x33] sm:$0xff] }
 0x282   : > { %v1749_v56 = vld [vmem:[#allocation2 + $0x3c] sm:$0xff]  ;;  %v1601_v58 = vld [vmem:[#allocation2 + $0x31] sm:$0xff]  ;;  %1719 = vrot.lane.b32.xlu0 %v1698_v57, %s6486_s2 }
 0x283   : > { %1948 = vst.msk [vmem:[#allocation2 + $0x41] sm:$0x1] %vm1938_vm13, %v6475_v1  ;;  %1623 = vrot.lane.b32.xlu1 %v1601_v58, %s6485_s0  ;;  %v1747_v49 = vld [vmem:[#allocation2 + $0x2c] sm:$0xff]  ;;  %v1586_v60 = vld [vmem:[#allocation2 + $0x38] sm:$0xff] }
 0x284   : > { %1757 = vst.msk [vmem:[#allocation3 + $0xe8] sm:$0xff] %vm1569_vm12, %v1749_v56  ;;  %1755 = vst.msk [vmem:[#allocation3 + $0xa8] sm:$0xff] %vm1569_vm12, %v1747_v49  ;;  %v1585_v59 = vld [vmem:[#allocation2 + $0x30] sm:$0xff]  ;;  %v1602_v0 = vld [vmem:[#allocation2 + $0x39] sm:$0xff] }
 0x285   : > { %v1748_v61 = vld [vmem:[#allocation2 + $0x34] sm:$0xff]  ;;  %1593 = vst.msk [vmem:[#allocation3 + $0xc0] sm:$0xff] %vm1569_vm12, %v1585_v59  ;;  %1594 = vst.msk [vmem:[#allocation3 + $0xe0] sm:$0xff] %vm1569_vm12, %v1586_v60 }
 0x286   : > { %1756 = vst.msk [vmem:[#allocation3 + $0xc8] sm:$0xff] %vm1569_vm12, %v1748_v61  ;;  %v1650_v62 = vld [vmem:[#allocation2 + $0x32] sm:$0xff] }
 0x287   : > { %1672 = vrot.lane.b32.xlu0 %v1650_v62, %s6484_s26  ;;  %1721 = vrot.lane.b32.xlu1 %v1699_v63, %s6486_s2  ;;  %v2075_v59 = vld [vmem:[%s6530_s29 + $0x30] sm:$0xff]  ;;  %v2076_v60 = vld [vmem:[%s6530_s29 + $0x38] sm:$0xff] }
 0x288   : > { %v5875_v63 = vpack.c.bf16 %v2076_v60, %v2075_v59 }
 0x28b   : > { %1625 = vrot.lane.b32.xlu0 %v1602_v0, %s6485_s0  ;;  %1674 = vrot.lane.b32.xlu1 %v1651_v54, %s6484_s26  ;;  %v1769_v28 = vld [vmem:[#allocation3 + $0xa8] sm:$0xff]  ;;  %v2074_v54 = vld [vmem:[%s6530_s29 + $0x28] sm:$0xff] }
 0x28c   : > { %v1773_v40 = vld [vmem:[#allocation3 + $0xe8] sm:$0xff]  ;;  %v5871_v56 = vpack.c.bf16 %v2074_v54, %v2073_v53 }
 0x28d   : > { %v1771_v37 = vld [vmem:[#allocation3 + $0xc8] sm:$0xff] }
 0x28f   : > { %1723 = vrot.lane.b32.xlu0 %v1700_v55, %s6486_s2 }
 0x2a6   : > { %v1663_v2 = vpop.permute.xlu1 %1662 }
 0x2a7   : > { %v1661_v3 = vpop.permute.xlu0 %1660 }
 0x2aa   : > { %v1612_v4 = vpop.permute.xlu1 %1611 }
 0x2ab   : > { %1636 = vst.msk [vmem:[#allocation3] sm:$0xff] %vm1635_vm14, %v1612_v4  ;;  %v1614_v5 = vpop.permute.xlu0 %1613  ;;  %v2078_v4 = vld [vmem:[%s6530_s29 + $0x48] sm:$0xff] }
 0x2ac   : > { %1637 = vst.msk [vmem:[#allocation3 + $0x20] sm:$0xff] %vm1635_vm14, %v1614_v5 }
 0x2ad   : > { %1685 = vst.msk [vmem:[#allocation3] sm:$0xff] %vm1684_vm15, %v1661_v3  ;;  %1686 = vst.msk [vmem:[#allocation3 + $0x20] sm:$0xff] %vm1684_vm15, %v1663_v2  ;;  %v2077_v3 = vld [vmem:[%s6530_s29 + $0x40] sm:$0xff] }
 0x2ae   : > { %v1710_v6 = vpop.permute.xlu1 %1709 }
 0x2af   : > { %1734 = vst.msk [vmem:[#allocation3] sm:$0xff] %vm1733_vm0, %v1710_v6 }
 0x2b6   : > { %v1758_v7 = vld [vmem:[#allocation3] sm:$0xff] }
 0x2b7   : > { %1890 = vmatmul.mubr.f32.vlgmr.msra.gmra.mrb[0].mxu1 %v1758_v7  ;;  %v5879_v7 = vpack.c.bf16 %v2078_v4, %v2077_v3 }
 0x2b8   : > { %5146 = vmatprep.mubr.msk.f32.mxu1 %vm1569_vm12, %v1761_v8  ;;  %5866 = vmatpush3.bf16.msra.mxu1 %v5863_v50  ;;  %v2079_v8 = vld [vmem:[%s6530_s29 + $0x50] sm:$0xff] }
 0x2b9   : > { %5868 = vmatprep.subr.bf16.mxu1 %v5867_v52 }
 0x2bb   : > { %v1667_v9 = vpop.permute.xlu1 %1666 }
 0x2bc   : > { %v1712_v10 = vpop.permute.xlu0 %1711  ;;  %5870 = vmatpush3.bf16.msra.mxu1 %v5867_v52 }
 0x2bd   : > { %1735 = vst.msk [vmem:[#allocation3 + $0x20] sm:$0xff] %vm1733_vm0, %v1712_v10  ;;  %5872 = vmatprep.subr.bf16.mxu1 %v5871_v56 }
 0x2bf   : > { %v1616_v11 = vpop.permute.xlu1 %1615 }
 0x2c0   : > { %1638 = vst.msk [vmem:[#allocation3 + $0x40] sm:$0xff] %vm1635_vm14, %v1616_v11  ;;  %v1665_v12 = vpop.permute.xlu0 %1664  ;;  %5874 = vmatpush3.bf16.msra.mxu1 %v5871_v56 }
 0x2c1   : > { %1687 = vst.msk [vmem:[#allocation3 + $0x40] sm:$0xff] %vm1684_vm15, %v1665_v12  ;;  %5876 = vmatprep.subr.bf16.mxu1 %v5875_v63 }
 0x2c3   : > { %v1714_v13 = vpop.permute.xlu1 %1713 }
 0x2c4   : > { %1736 = vst.msk [vmem:[#allocation3 + $0x40] sm:$0xff] %vm1733_vm0, %v1714_v13  ;;  %v1618_v14 = vpop.permute.xlu0 %1617  ;;  %v1760_v15 = vld [vmem:[#allocation3 + $0x20] sm:$0xff]  ;;  %5878 = vmatpush3.bf16.msra.mxu1 %v5875_v63 }
 0x2c5   : > { %1639 = vst.msk [vmem:[#allocation3 + $0x60] sm:$0xff] %vm1635_vm14, %v1618_v14  ;;  %1895 = vmatmul.mubr.f32.gmra.mrb[2].mxu1 %v1760_v15  ;;  %5880 = vmatprep.subr.bf16.mxu1 %v5879_v7 }
 0x2c6   : > { %1688 = vst.msk [vmem:[#allocation3 + $0x60] sm:$0xff] %vm1684_vm15, %v1667_v9  ;;  %5147 = vmatprep.mubr.msk.f32.mxu1 %vm1569_vm12, %v1763_v16  ;;  %v2080_v9 = vld [vmem:[%s6530_s29 + $0x58] sm:$0xff] }
 0x2c7   : > { %v5883_v10 = vpack.c.bf16 %v2080_v9, %v2079_v8 }
 0x2c8   : > { %5882 = vmatpush3.bf16.msra.mxu1 %v5879_v7 }
 0x2c9   : > { %5884 = vmatprep.subr.bf16.mxu1 %v5883_v10 }
 0x2cb   : > { %v1762_v17 = vld [vmem:[#allocation3 + $0x40] sm:$0xff] }
 0x2cc   : > { %1900 = vmatmul.mubr.f32.gmra.mrb[4].mxu1 %v1762_v17 }
 0x2cd   : > { %5148 = vmatprep.mubr.msk.f32.mxu1 %vm1569_vm12, %v1765_v18  ;;  %5886 = vmatpush3.bf16.msra.mxu1 %v5883_v10 }
 0x2d7   : > { %v1671_v19 = vpop.permute.xlu1 %1670 }
 0x2d8   : > { %v1716_v20 = vpop.permute.xlu0 %1715 }
 0x2d9   : > { %1737 = vst.msk [vmem:[#allocation3 + $0x60] sm:$0xff] %vm1733_vm0, %v1716_v20 }
 0x2db   : > { %v1620_v21 = vpop.permute.xlu1 %1619 }
 0x2dc   : > { %1640 = vst.msk [vmem:[#allocation3 + $0x80] sm:$0xff] %vm1635_vm14, %v1620_v21  ;;  %v1669_v22 = vpop.permute.xlu0 %1668 }
 0x2dd   : > { %1689 = vst.msk [vmem:[#allocation3 + $0x80] sm:$0xff] %vm1684_vm15, %v1669_v22 }
 0x2df   : > { %v1718_v23 = vpop.permute.xlu1 %1717 }
 0x2e0   : > { %1738 = vst.msk [vmem:[#allocation3 + $0x80] sm:$0xff] %vm1733_vm0, %v1718_v23  ;;  %v1622_v24 = vpop.permute.xlu0 %1621  ;;  %v1764_v25 = vld [vmem:[#allocation3 + $0x60] sm:$0xff] }
 0x2e1   : > { %1641 = vst.msk [vmem:[#allocation3 + $0xa0] sm:$0xff] %vm1635_vm14, %v1622_v24  ;;  %1905 = vmatmul.mubr.f32.gmra.mrb[6].mxu1 %v1764_v25 }
 0x2e2   : > { %1690 = vst.msk [vmem:[#allocation3 + $0xa0] sm:$0xff] %vm1684_vm15, %v1671_v19  ;;  %5149 = vmatprep.mubr.msk.f32.mxu1 %vm1569_vm12, %v1767_v26 }
 0x2e7   : > { %v1766_v27 = vld [vmem:[#allocation3 + $0x80] sm:$0xff] }
 0x2e8   : > { %1910 = vmatmul.mubr.f32.gmra.mrb[8].mxu1 %v1766_v27 }
 0x2e9   : > { %5150 = vmatprep.mubr.msk.f32.mxu1 %vm1569_vm12, %v1769_v28 }
 0x2f4   : > { %v1720_v29 = vpop.permute.xlu0 %1719 }
 0x2f5   : > { %v1624_v30 = vpop.permute.xlu1 %1623  ;;  %1739 = vst.msk [vmem:[#allocation3 + $0xa0] sm:$0xff] %vm1733_vm0, %v1720_v29 }
 0x2f6   : > { %1642 = vst.msk [vmem:[#allocation3 + $0xc0] sm:$0xff] %vm1635_vm14, %v1624_v30 }
 0x2f9   : > { %v1673_v31 = vpop.permute.xlu0 %1672  ;;  %v1722_v32 = vpop.permute.xlu1 %1721 }
 0x2fa   : > { %1691 = vst.msk [vmem:[#allocation3 + $0xc0] sm:$0xff] %vm1684_vm15, %v1673_v31 }
 0x2fb   : > { %1740 = vst.msk [vmem:[#allocation3 + $0xc0] sm:$0xff] %vm1733_vm0, %v1722_v32 }
 0x2fc   : > { %v1768_v36 = vld [vmem:[#allocation3 + $0xa0] sm:$0xff] }
 0x2fd   : > { %v1626_v34 = vpop.permute.xlu0 %1625  ;;  %v1675_v35 = vpop.permute.xlu1 %1674  ;;  %1915 = vmatmul.mubr.f32.gmra.mrb[10].mxu1 %v1768_v36 }
 0x2fe   : > { %1643 = vst.msk [vmem:[#allocation3 + $0xe0] sm:$0xff] %vm1635_vm14, %v1626_v34  ;;  %5151 = vmatprep.mubr.msk.f32.mxu1 %vm1569_vm12, %v1771_v37 }
 0x2ff   : > { %1692 = vst.msk [vmem:[#allocation3 + $0xe0] sm:$0xff] %vm1684_vm15, %v1675_v35 }
 0x301   : > { %v1724_v38 = vpop.permute.xlu0 %1723 }
 0x302   : > { %1741 = vst.msk [vmem:[#allocation3 + $0xe0] sm:$0xff] %vm1733_vm0, %v1724_v38  ;;  %v1770_v39 = vld [vmem:[#allocation3 + $0xc0] sm:$0xff] }
 0x303   : > { %1920 = vmatmul.mubr.f32.gmra.mrb[12].mxu1 %v1770_v39 }
 0x304   : > { %5152 = vmatprep.mubr.msk.f32.mxu1 %vm1569_vm12, %v1773_v40 }
 0x309   : > { %v1772_v41 = vld [vmem:[#allocation3 + $0xe0] sm:$0xff] }
 0x30a   : > { %1925 = vmatmul.mubr.f32.gmra.mrb[14].mxu1 %v1772_v41 }
 0x38a   : > { %v1891_v43 = vpop.f32.mrb[0].mxu1 }
 0x38b   : > { %v1892_v47 = vadd.f32 %v6969_v42, %v1891_v43  ;;  %v1893_v48 = vpop.f32.mrb[1].mxu1 }
 0x38d   : > { %v1930_v55 = vmax.f32 %v1892_v47, 0.0 }
 0x38f   : > { %1940 = vst.msk [vmem:[#allocation2 + $0x1] sm:$0xff] %vm1569_vm12, %v1930_v55  ;;  %v6487_v55 = vmov 0  }
 0x390   : > { %6424 = vset.pattern.permute.xlu0 %v6487_v55  ;;  %6423 = vset.pattern.permute.xlu1 %v6487_v55 }
 0x396   : > { %v1965_v57 = vld [vmem:[#allocation2 + $0x1] sm:$0xff] }
 0x397   : > { %v1949_v58 = vld [vmem:[#allocation2] sm:$0xff]  ;;  %1981 = vrot.lane.b32.xlu1 %v1965_v57, %s6485_s0 }
 0x398   : > { %1957 = vst.msk [vmem:[#allocation3] sm:$0xff] %vm1569_vm12, %v1949_v58  ;;  %v1896_v49 = vpop.f32.mrb[2].mxu1  ;;  %v6425_v57 = vld [vmem:[%s6500_s5] ss:$0 sm:$0xff] }
 0x399   : > { %v1897_v61 = vadd.f32 %v6969_v42, %v1896_v49  ;;  %v1898_v62 = vpop.f32.mrb[3].mxu1 }
 0x39b   : > { %v1931_v0 = vmax.f32 %v1897_v61, 0.0 }
 0x39d   : > { %1941 = vst.msk [vmem:[#allocation2 + $0x9] sm:$0xff] %vm1569_vm12, %v1931_v0 }
 0x39f   : > { %v1901_v2 = vpop.f32.mrb[4].mxu1 }
 0x3a0   : > { %v1902_v5 = vadd.f32 %v6969_v42, %v1901_v2  ;;  %v1903_v6 = vpop.f32.mrb[5].mxu1 }
 0x3a2   : > { %v1932_v11 = vmax.f32 %v1902_v5, 0.0 }
 0x3a4   : > { %1942 = vst.msk [vmem:[#allocation2 + $0x11] sm:$0xff] %vm1569_vm12, %v1932_v11  ;;  %v1966_v12 = vld [vmem:[#allocation2 + $0x9] sm:$0xff] }
 0x3a5   : > { %v2013_v13 = vld [vmem:[#allocation2 + $0x2] sm:$0xff]  ;;  %1983 = vrot.lane.b32.xlu0 %v1966_v12, %s6485_s0 }
 0x3a6   : > { %v1950_v14 = vld [vmem:[#allocation2 + $0x8] sm:$0xff]  ;;  %2029 = vrot.lane.b32.xlu1 %v2013_v13, %s6484_s26  ;;  %2404 = vst.msk [vmem:[#allocation2] sm:$0x7] %vm2403_vm1, %v6475_v1 }
 0x3a7   : > { %1958 = vst.msk [vmem:[#allocation3 + $0x20] sm:$0xff] %vm1569_vm12, %v1950_v14 }
 0x3ab   : > { %v2014_v15 = vld [vmem:[#allocation2 + $0xa] sm:$0xff] }
 0x3ac   : > { %v1967_v16 = vld [vmem:[#allocation2 + $0x11] sm:$0xff]  ;;  %2031 = vrot.lane.b32.xlu0 %v2014_v15, %s6484_s26 }
 0x3ad   : > { %v1951_v17 = vld [vmem:[#allocation2 + $0x10] sm:$0xff]  ;;  %1985 = vrot.lane.b32.xlu1 %v1967_v16, %s6485_s0 }
 0x3ae   : > { %1959 = vst.msk [vmem:[#allocation3 + $0x40] sm:$0xff] %vm1569_vm12, %v1951_v17  ;;  %v6426_v17 = vld [vmem:[%s6677_s7 + $0x8] sm:$0xff] }
 0x3b4   : > { %v1906_v18 = vpop.f32.mrb[6].mxu1 }
 0x3b5   : > { %v1907_v19 = vadd.f32 %v6969_v42, %v1906_v18  ;;  %v1908_v20 = vpop.f32.mrb[7].mxu1 }
 0x3b7   : > { %v1933_v21 = vmax.f32 %v1907_v19, 0.0  ;;  %v6427_v19 = vld [vmem:[%s6677_s7] sm:$0xff] }
 0x3b9   : > { %1943 = vst.msk [vmem:[#allocation2 + $0x19] sm:$0xff] %vm1569_vm12, %v1933_v21  ;;  %v6428_v21 = vld [vmem:[%s6677_s7 + $0x10] sm:$0xff] }
 0x3bb   : > { %v1911_v22 = vpop.f32.mrb[8].mxu1 }
 0x3bc   : > { %v1912_v23 = vadd.f32 %v6969_v42, %v1911_v22  ;;  %v1913_v24 = vpop.f32.mrb[9].mxu1 }
 0x3be   : > { %v1934_v25 = vmax.f32 %v1912_v23, 0.0  ;;  %v6429_v23 = vld [vmem:[%s6677_s7 + $0x20] sm:$0xff] }
 0x3c0   : > { %1944 = vst.msk [vmem:[#allocation2 + $0x21] sm:$0xff] %vm1569_vm12, %v1934_v25  ;;  %v1968_v26 = vld [vmem:[#allocation2 + $0x19] sm:$0xff] }
 0x3c1   : > { %v2015_v27 = vld [vmem:[#allocation2 + $0x12] sm:$0xff]  ;;  %1987 = vrot.lane.b32.xlu0 %v1968_v26, %s6485_s0 }
 0x3c2   : > { %v1952_v28 = vld [vmem:[#allocation2 + $0x18] sm:$0xff]  ;;  %2033 = vrot.lane.b32.xlu1 %v2015_v27, %s6484_s26 }
 0x3c3   : > { %1960 = vst.msk [vmem:[#allocation3 + $0x60] sm:$0xff] %vm1569_vm12, %v1952_v28 }
 0x3c7   : > { %v2016_v29 = vld [vmem:[#allocation2 + $0x1a] sm:$0xff] }
 0x3c8   : > { %v1969_v30 = vld [vmem:[#allocation2 + $0x21] sm:$0xff]  ;;  %2035 = vrot.lane.b32.xlu0 %v2016_v29, %s6484_s26  ;;  %v6430_v29 = vld [vmem:[%s6677_s7 + $0x18] sm:$0xff] }
 0x3c9   : > { %v1953_v31 = vld [vmem:[#allocation2 + $0x20] sm:$0xff]  ;;  %1989 = vrot.lane.b32.xlu1 %v1969_v30, %s6485_s0 }
 0x3ca   : > { %1961 = vst.msk [vmem:[#allocation3 + $0x80] sm:$0xff] %vm1569_vm12, %v1953_v31 }
 0x3d0   : > { %v1916_v32 = vpop.f32.mrb[10].mxu1 }
 0x3d1   : > { %v1917_v34 = vadd.f32 %v6969_v42, %v1916_v32  ;;  %v1918_v35 = vpop.f32.mrb[11].mxu1 }
 0x3d3   : > { %v1935_v36 = vmax.f32 %v1917_v34, 0.0  ;;  %v6431_v34 = vld [vmem:[%s6677_s7 + $0x30] sm:$0xff] }
 0x3d5   : > { %1945 = vst.msk [vmem:[#allocation2 + $0x29] sm:$0xff] %vm1569_vm12, %v1935_v36 }
 0x3d6   : > { %v1921_v37 = vpop.f32.mrb[12].mxu1 }
 0x3d7   : > { %v1922_v38 = vadd.f32 %v6969_v42, %v1921_v37  ;;  %v1923_v39 = vpop.f32.mrb[13].mxu1 }
 0x3d9   : > { %v1936_v40 = vmax.f32 %v1922_v38, 0.0  ;;  %v6432_v38 = vld [vmem:[%s6677_s7 + $0x28] sm:$0xff] }
 0x3db   : > { %1946 = vst.msk [vmem:[#allocation2 + $0x31] sm:$0xff] %vm1569_vm12, %v1936_v40 }
 0x3dc   : > { %v1970_v43 = vld [vmem:[#allocation2 + $0x29] sm:$0xff] }
 0x3dd   : > { %v1926_v41 = vpop.f32.mrb[14].mxu1  ;;  %v2017_v44 = vld [vmem:[#allocation2 + $0x22] sm:$0xff]  ;;  %1991 = vrot.lane.b32.xlu0 %v1970_v43, %s6485_s0  ;;  %v6433_v43 = vld [vmem:[%s6677_s7 + $0x38] sm:$0xff]  ;;  %s7898_s7 = sld [smem:[#allocation5_spill]] }
 0x3de   : > { %v1954_v45 = vld [vmem:[#allocation2 + $0x28] sm:$0xff]  ;;  %v1927_v46 = vadd.f32 %v6969_v42, %v1926_v41  ;;  %v1928_v47 = vpop.f32.mrb[15].mxu1  ;;  %2037 = vrot.lane.b32.xlu1 %v2017_v44, %s6484_s26 }
 0x3df   : > { %1962 = vst.msk [vmem:[#allocation3 + $0xa0] sm:$0xff] %vm1569_vm12, %v1954_v45 }
 0x3e0   : > { %v1937_v48 = vmax.f32 %v1927_v46, 0.0  ;;  %v2274_v46 = vlaneseq }
 0x3e2   : > { %1947 = vst.msk [vmem:[#allocation2 + $0x39] sm:$0xff] %vm1569_vm12, %v1937_v48  ;;  %v2018_v50 = vld [vmem:[#allocation2 + $0x2a] sm:$0xff]  ;;  %v2275_v47 = vshrl.u32 %v2274_v46, 7  ;;  %v2280_v48 = vand.u32 127, %v2274_v46 }
 0x3e3   : > { %v1971_v51 = vld [vmem:[#allocation2 + $0x31] sm:$0xff]  ;;  %2039 = vrot.lane.b32.xlu0 %v2018_v50, %s6484_s26 }
 0x3e4   : > { %v1955_v52 = vld [vmem:[#allocation2 + $0x30] sm:$0xff]  ;;  %1993 = vrot.lane.b32.xlu1 %v1971_v51, %s6485_s0  ;;  %v2281_v50 = vmul.u32 2, %v2275_v47  ;;  %v2276_v51 = vadd.s32 8, %v2275_v47 }
 0x3e5   : > { %1963 = vst.msk [vmem:[#allocation3 + $0xc0] sm:$0xff] %vm1569_vm12, %v1955_v52  ;;  %v2277_v52 = vadd.s32 16, %v2275_v47 }
 0x3e6   : > { %vm2285_vm3 = vcmp.ge.s32.totalorder %v2280_v48, %v2281_v50 }
 0x3e7   : > { %v2283_v55 = vmul.u32 2, %v2277_v52  ;;  %v2600_v52 = vld [vmem:[%s6540_s8 + $0x88] sm:$0xff] }
 0x3e9   : > { %v1972_v42 = vld [vmem:[#allocation2 + $0x39] sm:$0xff]  ;;  %vm2287_vm7 = vcmp.ge.s32.totalorder %v2280_v48, %v2283_v55 }
 0x3ea   : > { %v2019_v53 = vld [vmem:[#allocation2 + $0x32] sm:$0xff]  ;;  %1995 = vrot.lane.b32.xlu0 %v1972_v42, %s6485_s0  ;;  %v2020_v56 = vld [vmem:[#allocation2 + $0x3a] sm:$0xff]  ;;  %v2278_v42 = vadd.s32 24, %v2275_v47 }
 0x3eb   : > { %2041 = vrot.lane.b32.xlu1 %v2019_v53, %s6484_s26  ;;  %v1956_v54 = vld [vmem:[#allocation2 + $0x38] sm:$0xff]  ;;  %v2289_v53 = vadd.s32 3, %v2281_v50 }
 0x3ec   : > { %1964 = vst.msk [vmem:[#allocation3 + $0xe0] sm:$0xff] %vm1569_vm12, %v1956_v54  ;;  %v2282_v54 = vmul.u32 2, %v2276_v51  ;;  %v2599_v51 = vld [vmem:[%s6540_s8 + $0x80] sm:$0xff] }
 0x3ed   : > { %vm2293_vm5 = vcmp.lt.s32.totalorder %v2280_v48, %v2289_v53  ;;  %v5903_v53 = vpack.c.bf16 %v2600_v52, %v2599_v51  ;;  %v2613_v51 = vld [vmem:[%s6540_s8 + $0xf0] sm:$0xff] }
 0x3ee   : > { %2043 = vrot.lane.b32.xlu0 %v2020_v56, %s6484_s26  ;;  %v2284_v56 = vmul.u32 2, %v2278_v42  ;;  %vm2286_vm6 = vcmp.ge.s32.totalorder %v2280_v48, %v2282_v54  ;;  %vm2297_vm8 = vmand %vm2285_vm3, %vm2293_vm5  ;;  %vm2410_vm5 = vcmask 257024   ;;  %v2583_v42 = vld [vmem:[%s6540_s8] sm:$0xff] }
 0x3ef   : > { %1019 = vrot.lane.b32.xlu1 %v6425_v57, %s6488_s10  ;;  %2411 = vst.msk [vmem:[#allocation2 + $0x22] sm:$0xf] %vm2410_vm5, %v6475_v1  ;;  %5904 = vmatprep.subr.bf16.mxu1 %v5903_v53  ;;  %v2597_v53 = vld [vmem:[%s6540_s8 + $0x70] sm:$0xff]  ;;  %vm3425_vm5 = vcmask 519168   ;;  %s7908_s10 = sld [smem:[#allocation13_spill]] }
 0x3f0   : > { %vm2288_vm9 = vcmp.ge.s32.totalorder %v2280_v48, %v2284_v56 }
 0x3f2   : > { %1030 = vrot.lane.b32.xlu0 %v6425_v57, %s6489_s11  ;;  %v2290_v57 = vadd.s32 3, %v2282_v54  ;;  %v2584_v54 = vld [vmem:[%s6540_s8 + $0x8] sm:$0xff]  ;;  %s7909_s11 = sld [smem:[#allocation11_spill]] }
 0x3f4   : > { %vm2294_vm10 = vcmp.lt.s32.totalorder %v2280_v48, %v2290_v57  ;;  %v5905_v57 = vpack.c.bf16 %v2584_v54, %v2583_v42  ;;  %v2614_v42 = vld [vmem:[%s6540_s8 + $0xf8] sm:$0xff] }
 0x3f5   : > { %vm7062_vm11 = vmand %vm2286_vm6, %vm2294_vm10  ;;  %vm2408_vm6 = vcmask 260096   ;;  %v2598_v54 = vld [vmem:[%s6540_s8 + $0x78] sm:$0xff]  ;;  %vm3038_vm10 = vcmask 516096  }
 0x3f6   : > { %v7078_v47 = vsel %vm7062_vm11, 0.33333334, %v6475_v1  ;;  %vm3337_vm11 = vcmask 252928  }
 0x409   : > { %v1982_v58 = vpop.permute.xlu1 %1981 }
 0x40a   : > { %2005 = vst.msk [vmem:[#allocation3] sm:$0xff] %vm1635_vm14, %v1982_v58  ;;  %v2291_v58 = vadd.s32 3, %v2283_v55  ;;  %v2601_v55 = vld [vmem:[%s6540_s8 + $0x90] sm:$0xff] }
 0x40c   : > { %vm2295_vm13 = vcmp.lt.s32.totalorder %v2280_v48, %v2291_v58 }
 0x417   : > { %v1984_v49 = vpop.permute.xlu0 %1983 }
 0x418   : > { %v2030_v59 = vpop.permute.xlu1 %2029  ;;  %2006 = vst.msk [vmem:[#allocation3 + $0x20] sm:$0xff] %vm1635_vm14, %v1984_v49  ;;  %v2292_v49 = vadd.s32 3, %v2284_v56  ;;  %v2602_v56 = vld [vmem:[%s6540_s8 + $0x98] sm:$0xff] }
 0x419   : > { %2053 = vst.msk [vmem:[#allocation3] sm:$0xff] %vm1684_vm15, %v2030_v59  ;;  %v7058_v59 = vsel %vm2297_vm8, 0.33333334, %v6475_v1  ;;  %v5907_v58 = vpack.c.bf16 %v2602_v56, %v2601_v55  ;;  %v5931_v55 = vpack.c.bf16 %v2614_v42, %v2613_v51  ;;  %vm2443_vm8 = vcmask 522496   ;;  %v2837_v51 = vld [vmem:[%s6550_s19 + $0x100] sm:$0xff]  ;;  %v2839_v42 = vld [vmem:[%s6550_s19 + $0x110] sm:$0xff] }
 0x41a   : > { %5692 = vmatprep.mubr.msk.f32.mxu0 %vm2305_vm4, %v7058_v59  ;;  %vm2296_vm1 = vcmp.lt.s32.totalorder %v2280_v48, %v2292_v49  ;;  %v2585_v49 = vld [vmem:[%s6540_s8 + $0x10] sm:$0xff] }
 0x41b   : > { %vm7070_vm3 = vmand %vm2288_vm9, %vm2296_vm1  ;;  %vm2468_vm9 = vcmask 784896   ;;  %vm6490_vm1 = vmmov 1  }
 0x41c   : > { %v2304_v50 = vsel %vm7070_vm3, 0.33333334, %v6475_v1  ;;  %vm3421_vm3 = vcmask 518144  }
 0x41e   : > { %v2032_v60 = vpop.permute.xlu0 %2031 }
 0x41f   : > { %v1986_v61 = vpop.permute.xlu1 %1985  ;;  %2054 = vst.msk [vmem:[#allocation3 + $0x20] sm:$0xff] %vm1684_vm15, %v2032_v60  ;;  %v2586_v60 = vld [vmem:[%s6540_s8 + $0x18] sm:$0xff] }
 0x420   : > { %2007 = vst.msk [vmem:[#allocation3 + $0x40] sm:$0xff] %vm1635_vm14, %v1986_v61  ;;  %v2061_v62 = vld [vmem:[#allocation3] sm:$0xff]  ;;  %v2603_v61 = vld [vmem:[%s6540_s8 + $0xa0] sm:$0xff] }
 0x421   : > { %5664 = vmatprep.mubr.msk.f32.mxu1 %vm2088_vm2, %v2061_v62  ;;  %v2604_v62 = vld [vmem:[%s6540_s8 + $0xa8] sm:$0xff] }
 0x426   : > { %v2062_v63 = vld [vmem:[#allocation3 + $0x20] sm:$0xff] }
 0x427   : > { %5665 = vmatmul.mubr.msk.f32.vlgmr.msra.gmra.mrb[16].mxu1 %vm2088_vm2, %v2062_v63  ;;  %v5153_v63 = vld [vmem:[%s6535_s3] ss:$0 sm:$0xff] }
 0x428   : > { %5906 = vmatpush3.bf16.msra.mxu1 %v5905_v57 }
 0x429   : > { %5908 = vmatprep.subr.bf16.mxu1 %v5907_v58 }
 0x433   : > { %v1988_v0 = vpop.permute.xlu0 %1987 }
 0x434   : > { %v2034_v2 = vpop.permute.xlu1 %2033  ;;  %2008 = vst.msk [vmem:[#allocation3 + $0x60] sm:$0xff] %vm1635_vm14, %v1988_v0 }
 0x435   : > { %2055 = vst.msk [vmem:[#allocation3 + $0x40] sm:$0xff] %vm1684_vm15, %v2034_v2 }
 0x43a   : > { %v2036_v3 = vpop.permute.xlu0 %2035 }
 0x43b   : > { %v1990_v4 = vpop.permute.xlu1 %1989  ;;  %2056 = vst.msk [vmem:[#allocation3 + $0x60] sm:$0xff] %vm1684_vm15, %v2036_v3 }
 0x43c   : > { %2009 = vst.msk [vmem:[#allocation3 + $0x80] sm:$0xff] %vm1635_vm14, %v1990_v4  ;;  %v2063_v5 = vld [vmem:[#allocation3 + $0x40] sm:$0xff] }
 0x43d   : > { %5667 = vmatprep.mubr.msk.f32.mxu1 %vm2088_vm2, %v2063_v5 }
 0x442   : > { %v2064_v6 = vld [vmem:[#allocation3 + $0x60] sm:$0xff] }
 0x443   : > { %5668 = vmatmul.mubr.msk.f32.gmra.mrb[18].mxu1 %vm2088_vm2, %v2064_v6 }
 0x44f   : > { %v1992_v7 = vpop.permute.xlu0 %1991 }
 0x450   : > { %v2038_v8 = vpop.permute.xlu1 %2037  ;;  %2010 = vst.msk [vmem:[#allocation3 + $0xa0] sm:$0xff] %vm1635_vm14, %v1992_v7 }
 0x451   : > { %2057 = vst.msk [vmem:[#allocation3 + $0x80] sm:$0xff] %vm1684_vm15, %v2038_v8 }
 0x455   : > { %v2040_v9 = vpop.permute.xlu0 %2039 }
 0x456   : > { %v1994_v10 = vpop.permute.xlu1 %1993  ;;  %2058 = vst.msk [vmem:[#allocation3 + $0xa0] sm:$0xff] %vm1684_vm15, %v2040_v9 }
 0x457   : > { %2011 = vst.msk [vmem:[#allocation3 + $0xc0] sm:$0xff] %vm1635_vm14, %v1994_v10 }
 0x458   : > { %v2065_v11 = vld [vmem:[#allocation3 + $0x80] sm:$0xff] }
 0x459   : > { %5670 = vmatprep.mubr.msk.f32.mxu1 %vm2088_vm2, %v2065_v11 }
 0x45c   : > { %v1996_v12 = vpop.permute.xlu0 %1995 }
 0x45d   : > { %v2042_v13 = vpop.permute.xlu1 %2041  ;;  %2012 = vst.msk [vmem:[#allocation3 + $0xe0] sm:$0xff] %vm1635_vm14, %v1996_v12  ;;  %v2066_v14 = vld [vmem:[#allocation3 + $0xa0] sm:$0xff] }
 0x45e   : > { %2059 = vst.msk [vmem:[#allocation3 + $0xc0] sm:$0xff] %vm1684_vm15, %v2042_v13  ;;  %5671 = vmatmul.mubr.msk.f32.gmra.mrb[20].mxu1 %vm2088_vm2, %v2066_v14 }
 0x460   : > { %v2044_v15 = vpop.permute.xlu0 %2043 }
 0x461   : > { %v1020_v16 = vpop.permute.xlu1 %1019  ;;  %2060 = vst.msk [vmem:[#allocation3 + $0xe0] sm:$0xff] %vm1684_vm15, %v2044_v15 }
 0x462   : > { %v1023_v18 = vmul.f32 %v6426_v17, %v1020_v16  ;;  %v1022_v20 = vmul.f32 %v6427_v19, %v1020_v16  ;;  %v1024_v22 = vmul.f32 %v6428_v21, %v1020_v16  ;;  %v1026_v24 = vmul.f32 %v6429_v23, %v1020_v16 }
 0x463   : > { %v1025_v30 = vmul.f32 %v6430_v29, %v1020_v16  ;;  %v1028_v35 = vmul.f32 %v6431_v34, %v1020_v16  ;;  %v1027_v39 = vmul.f32 %v6432_v38, %v1020_v16  ;;  %v1029_v44 = vmul.f32 %v6433_v43, %v1020_v16 }
 0x464   : > { %v1031_v26 = vpop.permute.xlu0 %1030 }
 0x465   : > { %v2067_v25 = vld [vmem:[#allocation3 + $0xc0] sm:$0xff]  ;;  %v1034_v27 = vadd.f32 %v1031_v26, %v1023_v18  ;;  %v1033_v28 = vadd.f32 %v1031_v26, %v1022_v20  ;;  %v1035_v31 = vadd.f32 %v1031_v26, %v1024_v22  ;;  %v1037_v32 = vadd.f32 %v1031_v26, %v1026_v24 }
 0x466   : > { %5673 = vmatprep.mubr.msk.f32.mxu1 %vm2088_vm2, %v2067_v25  ;;  %v1036_v37 = vadd.f32 %v1031_v26, %v1025_v30  ;;  %v1039_v40 = vadd.f32 %v1031_v26, %v1028_v35  ;;  %v1038_v41 = vadd.f32 %v1031_v26, %v1027_v39  ;;  %v1040_v45 = vadd.f32 %v1031_v26, %v1029_v44 }
 0x467   : > { %2225 = vperm.xlu0 %6424, %v1034_v27   ;;  %2220 = vperm.xlu1 %6423, %v1033_v28  }
 0x468   : > { %v2068_v36 = vld [vmem:[#allocation3 + $0xe0] sm:$0xff] }
 0x469   : > { %5674 = vmatmul.mubr.msk.f32.gmra.mrb[22].mxu1 %vm2088_vm2, %v2068_v36  ;;  %vm7066_vm2 = vmand %vm2287_vm7, %vm2295_vm13  ;;  %vm2711_vm7 = vcmask 517120   ;;  %vm3342_vm13 = vcmask 1046528  }
 0x46a   : > { %v2303_v48 = vsel %vm7066_vm2, 0.33333334, %v6475_v1  ;;  %vm7390_vm2 = vmpackc.low %vm3342_vm13, %vm6490_vm1 }
 0x46b   : > { %2230 = vperm.xlu1 %6423, %v1035_v31   ;;  %2240 = vperm.xlu0 %6424, %v1037_v32  }
 0x46f   : > { %2235 = vperm.xlu1 %6423, %v1036_v37   ;;  %2250 = vperm.xlu0 %6424, %v1039_v40  }
 0x473   : > { %2245 = vperm.xlu1 %6423, %v1038_v41  }
 0x477   : > { %2255 = vperm.xlu1 %6423, %v1040_v45  }
 0x4e6   : > { %v2226_v2 = vpop.permute.xlu0 %2225  ;;  %v2221_v5 = vpop.permute.xlu1 %2220 }
 0x4ea   : > { %v2231_v12 = vpop.permute.xlu1 %2230  ;;  %v2241_v28 = vpop.permute.xlu0 %2240 }
 0x4ee   : > { %v2236_v14 = vpop.permute.xlu1 %2235  ;;  %v2251_v40 = vpop.permute.xlu0 %2250 }
 0x4f2   : > { %v2246_v26 = vpop.permute.xlu1 %2245 }
 0x4f6   : > { %v2256_v38 = vpop.permute.xlu1 %2255 }
 0x4fa   : > { %v5666_v0 = vpop.f32.mrb[16].mxu1 }
 0x4fb   : > { %v2185_v3 = vadd.f32 %v5666_v0, %v5153_v63  ;;  %v2179_v4 = vpop.f32.mrb[17].mxu1  ;;  %v5911_v0 = vpack.c.bf16 %v2604_v62, %v2603_v61 }
 0x4fc   : > { %v2180_v6 = vadd.f32 %v5153_v63, %v2179_v4 }
 0x4fd   : > { %v2259_v7 = vadd.f32 %v2226_v2, %v2185_v3  ;;  %v2587_v2 = vld [vmem:[%s6540_s8 + $0x20] sm:$0xff]  ;;  %v2588_v3 = vld [vmem:[%s6540_s8 + $0x28] sm:$0xff] }
 0x4fe   : > { %v2258_v8 = vadd.f32 %v2221_v5, %v2180_v6  ;;  %v5913_v4 = vpack.c.bf16 %v2588_v3, %v2587_v2  ;;  %v2605_v5 = vld [vmem:[%s6540_s8 + $0xb0] sm:$0xff]  ;;  %v2606_v6 = vld [vmem:[%s6540_s8 + $0xb8] sm:$0xff] }
 0x4ff   : > { %v2267_v9 = vmax.f32 %v2259_v7, 0.0  ;;  %v5915_v7 = vpack.c.bf16 %v2606_v6, %v2605_v5 }
 0x500   : > { %v2266_v10 = vmax.f32 %v2258_v8, 0.0  ;;  %v2589_v8 = vld [vmem:[%s6540_s8 + $0x30] sm:$0xff] }
 0x502   : > { %v5887_v11 = vpack.c.bf16 %v2267_v9, %v2266_v10  ;;  %v2590_v9 = vld [vmem:[%s6540_s8 + $0x38] sm:$0xff] }
 0x503   : > { %v5917_v10 = vpack.c.bf16 %v2590_v9, %v2589_v8 }
 0x504   : > { %5888 = vmatprep.subr.bf16.mxu0 %v5887_v11 }
 0x505   : > { %5890 = vmatpush3.bf16.msra.mxu0 %v5887_v11 }
 0x516   : > { %v5669_v13 = vpop.f32.mrb[18].mxu1 }
 0x517   : > { %v2195_v15 = vadd.f32 %v5669_v13, %v5153_v63  ;;  %v2189_v16 = vpop.f32.mrb[19].mxu1  ;;  %v2608_v13 = vld [vmem:[%s6540_s8 + $0xc8] sm:$0xff] }
 0x518   : > { %v2190_v17 = vadd.f32 %v5153_v63, %v2189_v16  ;;  %v2591_v16 = vld [vmem:[%s6540_s8 + $0x40] sm:$0xff] }
 0x519   : > { %v2261_v18 = vadd.f32 %v2236_v14, %v2195_v15 }
 0x51a   : > { %v2260_v19 = vadd.f32 %v2231_v12, %v2190_v17  ;;  %v2607_v12 = vld [vmem:[%s6540_s8 + $0xc0] sm:$0xff]  ;;  %v2592_v17 = vld [vmem:[%s6540_s8 + $0x48] sm:$0xff] }
 0x51b   : > { %v2269_v20 = vmax.f32 %v2261_v18, 0.0  ;;  %v5919_v15 = vpack.c.bf16 %v2608_v13, %v2607_v12  ;;  %v5921_v18 = vpack.c.bf16 %v2592_v17, %v2591_v16 }
 0x51c   : > { %v2268_v21 = vmax.f32 %v2260_v19, 0.0 }
 0x51e   : > { %v5891_v22 = vpack.c.bf16 %v2269_v20, %v2268_v21  ;;  %v2609_v20 = vld [vmem:[%s6540_s8 + $0xd0] sm:$0xff]  ;;  %v2610_v21 = vld [vmem:[%s6540_s8 + $0xd8] sm:$0xff] }
 0x520   : > { %5892 = vmatprep.subr.bf16.mxu0 %v5891_v22 }
 0x521   : > { %5894 = vmatpush3.bf16.msra.mxu0 %v5891_v22 }
 0x531   : > { %v5672_v23 = vpop.f32.mrb[20].mxu1 }
 0x532   : > { %v2205_v24 = vadd.f32 %v5672_v23, %v5153_v63  ;;  %v2199_v25 = vpop.f32.mrb[21].mxu1  ;;  %v5923_v23 = vpack.c.bf16 %v2610_v21, %v2609_v20 }
 0x533   : > { %v2200_v27 = vadd.f32 %v5153_v63, %v2199_v25  ;;  %v2594_v25 = vld [vmem:[%s6540_s8 + $0x58] sm:$0xff] }
 0x534   : > { %v2263_v29 = vadd.f32 %v2246_v26, %v2205_v24  ;;  %v2593_v24 = vld [vmem:[%s6540_s8 + $0x50] sm:$0xff] }
 0x535   : > { %v2262_v30 = vadd.f32 %v2241_v28, %v2200_v27  ;;  %v5925_v26 = vpack.c.bf16 %v2594_v25, %v2593_v24  ;;  %v2611_v28 = vld [vmem:[%s6540_s8 + $0xe0] sm:$0xff] }
 0x536   : > { %v2271_v31 = vmax.f32 %v2263_v29, 0.0  ;;  %v2612_v29 = vld [vmem:[%s6540_s8 + $0xe8] sm:$0xff] }
 0x537   : > { %v2270_v32 = vmax.f32 %v2262_v30, 0.0 }
 0x539   : > { %v5895_v34 = vpack.c.bf16 %v2271_v31, %v2270_v32 }
 0x53b   : > { %5896 = vmatprep.subr.bf16.mxu0 %v5895_v34 }
 0x53c   : > { %v5675_v35 = vpop.f32.mrb[22].mxu1  ;;  %5898 = vmatpush3.bf16.msra.mxu0 %v5895_v34  ;;  %v5927_v34 = vpack.c.bf16 %v2612_v29, %v2611_v28 }
 0x53d   : > { %v2215_v36 = vadd.f32 %v5675_v35, %v5153_v63  ;;  %v2209_v37 = vpop.f32.mrb[23].mxu1 }
 0x53e   : > { %v2210_v39 = vadd.f32 %v5153_v63, %v2209_v37  ;;  %v5909_v63 = vpack.c.bf16 %v2586_v60, %v2585_v49  ;;  %v5933_v49 = vpack.c.bf16 %v2598_v54, %v2597_v53  ;;  %v2840_v54 = vld [vmem:[%s6550_s19 + $0x118] sm:$0xff] }
 0x53f   : > { %v2265_v41 = vadd.f32 %v2256_v38, %v2215_v36 }
 0x540   : > { %v2264_v43 = vadd.f32 %v2251_v40, %v2210_v39  ;;  %5910 = vmatpush3.bf16.msra.mxu1 %v5909_v63 }
 0x541   : > { %v2273_v44 = vmax.f32 %v2265_v41, 0.0  ;;  %5912 = vmatprep.subr.bf16.mxu1 %v5911_v0 }
 0x542   : > { %v2272_v45 = vmax.f32 %v2264_v43, 0.0 }
 0x544   : > { %v5899_v46 = vpack.c.bf16 %v2273_v44, %v2272_v45  ;;  %5914 = vmatpush3.bf16.msra.mxu1 %v5913_v4  ;;  %v2595_v45 = vld [vmem:[%s6540_s8 + $0x60] sm:$0xff] }
 0x545   : > { %5916 = vmatprep.subr.bf16.mxu1 %v5915_v7 }
 0x546   : > { %5900 = vmatprep.subr.bf16.mxu0 %v5899_v46 }
 0x547   : > { %5902 = vmatpush3.bf16.msra.mxu0 %v5899_v46 }
 0x548   : > { %5918 = vmatpush3.bf16.msra.mxu1 %v5917_v10 }
 0x549   : > { %5920 = vmatprep.subr.bf16.mxu1 %v5919_v15 }
 0x54a   : > { %5693 = vmatmul.mubr.msk.f32.vlgmr.msra.gmra.mrb[8].mxu0 %vm2305_vm4, %v7078_v47 }
 0x54b   : > { %5695 = vmatprep.mubr.msk.f32.mxu0 %vm2305_vm4, %v2303_v48  ;;  %v2596_v48 = vld [vmem:[%s6540_s8 + $0x68] sm:$0xff] }
 0x54c   : > { %5922 = vmatpush3.bf16.msra.mxu1 %v5921_v18  ;;  %v5929_v52 = vpack.c.bf16 %v2596_v48, %v2595_v45 }
 0x54d   : > { %5924 = vmatprep.subr.bf16.mxu1 %v5923_v23 }
 0x54e   : > { %5696 = vmatmul.mubr.msk.f32.gmra.mrb[10].mxu0 %vm2305_vm4, %v2304_v50 }
 0x550   : > { %5926 = vmatpush3.bf16.msra.mxu1 %v5925_v26 }
 0x551   : > { %5928 = vmatprep.subr.bf16.mxu1 %v5927_v34 }
 0x554   : > { %5930 = vmatpush3.bf16.msra.mxu1 %v5929_v52  ;;  %v2838_v52 = vld [vmem:[%s6550_s19 + $0x108] sm:$0xff] }
 0x555   : > { %5932 = vmatprep.subr.bf16.mxu1 %v5931_v55  ;;  %v5967_v53 = vpack.c.bf16 %v2838_v52, %v2837_v51  ;;  %v5971_v55 = vpack.c.bf16 %v2840_v54, %v2839_v42 }
 0x558   : > { %5934 = vmatpush3.bf16.msra.mxu1 %v5933_v49  ;;  %v2843_v49 = vld [vmem:[%s6550_s19 + $0x130] sm:$0xff] }
 0x559   : > { %5968 = vmatprep.subr.bf16.mxu1 %v5967_v53 }
 0x61d   : > { %v7107_v11 = vpop.f32.mrb[8].mxu0 }
 0x61e   : > { %2406 = vst.msk [vmem:[#allocation2 + $0xb] sm:$0xff] %vm1569_vm12, %v7107_v11  ;;  %v7113_v14 = vpop.f32.mrb[9].mxu0 }
 0x61f   : > { %2405 = vst.msk [vmem:[#allocation2 + $0x3] sm:$0xff] %vm1569_vm12, %v7113_v14 }
 0x621   : > { %v7119_v19 = vpop.f32.mrb[10].mxu0 }
 0x622   : > { %v7123_v22 = vpop.f32.mrb[11].mxu0  ;;  %2409 = vst.msk [vmem:[#allocation2 + $0x1b] sm:$0x7f] %vm2408_vm6, %v7119_v19 }
 0x623   : > { %2407 = vst.msk [vmem:[#allocation2 + $0x13] sm:$0xff] %vm1569_vm12, %v7123_v22 }
 0x625   : > { %v2471_v27 = vld [vmem:[#allocation2 + $0xb] sm:$0xff] }
 0x626   : > { %2480 = vrot.lane.b32.xlu1 %v2471_v27, %s6486_s2  ;;  %v2503_v30 = vld [vmem:[#allocation2 + $0x5] sm:$0xff] }
 0x627   : > { %v2420_v31 = vld [vmem:[#allocation2 + $0x1] sm:$0xff]  ;;  %2511 = vrot.lane.b32.xlu0 %v2503_v30, %s6485_s0  ;;  %v2421_v61 = vld [vmem:[#allocation2 + $0x9] sm:$0xff] }
 0x628   : > { %v2412_v32 = vld [vmem:[#allocation2] sm:$0xff]  ;;  %v2413_v50 = vld [vmem:[#allocation2 + $0x8] sm:$0xff] }
 0x629   : > { %2712 = vst.msk [vmem:[#allocation2] sm:$0x3] %vm2711_vm7, %v6475_v1  ;;  %v2527_v35 = vld [vmem:[#allocation2 + $0x6] sm:$0xff]  ;;  %v2506_v38 = vld [vmem:[#allocation2 + $0x1d] sm:$0x7f] }
 0x62a   : > { %2416 = vst.msk [vmem:[#allocation3] sm:$0xff] %vm1569_vm12, %v2412_v32  ;;  %2428 = vrot.lane.b32.xlu1 %v2420_v31, %s6485_s0  ;;  %v2445_v36 = vld [vmem:[#allocation2 + $0x2] sm:$0xff]  ;;  %v2473_v40 = vld [vmem:[#allocation2 + $0x1b] sm:$0x7f]  ;;  %2417 = vst.msk [vmem:[#allocation3 + $0x20] sm:$0xff] %vm1569_vm12, %v2413_v50 }
 0x62b   : > { %2535 = vrot.lane.b32.xlu0 %v2527_v35, %s6484_s26  ;;  %v2551_v37 = vld [vmem:[#allocation2 + $0x7] sm:$0xff]  ;;  %v2530_v39 = vld [vmem:[#allocation2 + $0x1e] sm:$0x7f]  ;;  %v2414_v57 = vld [vmem:[#allocation2 + $0x10] sm:$0xff] }
 0x62c   : > { %v2554_v41 = vld [vmem:[#allocation2 + $0x1f] sm:$0x7f]  ;;  %v2496_v56 = vld [vmem:[#allocation2 + $0xc] sm:$0xff]  ;;  %v2497_v58 = vld [vmem:[#allocation2 + $0x14] sm:$0xff]  ;;  %2418 = vst.msk [vmem:[#allocation3 + $0x40] sm:$0xff] %vm1569_vm12, %v2414_v57 }
 0x62d   : > { %v2495_v43 = vld [vmem:[#allocation2 + $0x4] sm:$0xff]  ;;  %v2498_v44 = vld [vmem:[#allocation2 + $0x1c] sm:$0x7f]  ;;  %2500 = vst.msk [vmem:[#allocation3 + $0x28] sm:$0xff] %vm1569_vm12, %v2496_v56  ;;  %2501 = vst.msk [vmem:[#allocation3 + $0x48] sm:$0xff] %vm1569_vm12, %v2497_v58 }
 0x62e   : > { %2453 = vrot.lane.b32.xlu1 %v2445_v36, %s6484_s26  ;;  %v2470_v46 = vld [vmem:[#allocation2 + $0x3] sm:$0xff]  ;;  %2499 = vst.msk [vmem:[#allocation3 + $0x8] sm:$0xff] %vm1569_vm12, %v2495_v43  ;;  %v2415_v60 = vld [vmem:[#allocation2 + $0x18] sm:$0x7f]  ;;  %v2504_v63 = vld [vmem:[#allocation2 + $0xd] sm:$0xff] }
 0x62f   : > { %2559 = vrot.lane.b32.xlu0 %v2551_v37, %s6486_s2  ;;  %2502 = vst.msk [vmem:[#allocation3 + $0x68] sm:$0x7f] %vm2408_vm6, %v2498_v44  ;;  %2419 = vst.msk [vmem:[#allocation3 + $0x60] sm:$0x7f] %vm2408_vm6, %v2415_v60  ;;  %v2446_v62 = vld [vmem:[#allocation2 + $0xa] sm:$0xff]  ;;  %v2447_v3 = vld [vmem:[#allocation2 + $0x12] sm:$0xff] }
 0x630   : > { %2718 = vst.msk [vmem:[#allocation2 + $0x21] sm:$0x3] %vm2711_vm7, %v6475_v1  ;;  %v2422_v0 = vld [vmem:[#allocation2 + $0x11] sm:$0xff]  ;;  %v2423_v7 = vld [vmem:[#allocation2 + $0x19] sm:$0x7f]  ;;  %v2841_v56 = vld [vmem:[%s6550_s19 + $0x120] sm:$0xff] }
 0x631   : > { %v2528_v2 = vld [vmem:[#allocation2 + $0xe] sm:$0xff]  ;;  %v2529_v8 = vld [vmem:[#allocation2 + $0x16] sm:$0xff]  ;;  %vm6491_vm6 = vmmov 0  }
 0x632   : > { %2478 = vrot.lane.b32.xlu1 %v2470_v46, %s6486_s2  ;;  %v2552_v4 = vld [vmem:[#allocation2 + $0xf] sm:$0xff]  ;;  %v2448_v9 = vld [vmem:[#allocation2 + $0x1a] sm:$0x7f] }
 0x633   : > { %2517 = vrot.lane.b32.xlu0 %v2506_v38, %s6485_s0  ;;  %v2472_v5 = vld [vmem:[#allocation2 + $0x13] sm:$0xff]  ;;  %v2842_v57 = vld [vmem:[%s6550_s19 + $0x128] sm:$0xff] }
 0x634   : > { %v2505_v6 = vld [vmem:[#allocation2 + $0x15] sm:$0xff]  ;;  %v5975_v58 = vpack.c.bf16 %v2842_v57, %v2841_v56  ;;  %v2833_v57 = vld [vmem:[%s6550_s19 + $0xe0] sm:$0xff] }
 0x635   : > { %v2553_v10 = vld [vmem:[#allocation2 + $0x17] sm:$0xff] }
 0x636   : > { %2430 = vrot.lane.b32.xlu1 %v2421_v61, %s6485_s0  ;;  %v2844_v60 = vld [vmem:[%s6550_s19 + $0x138] sm:$0xff] }
 0x637   : > { %2541 = vrot.lane.b32.xlu0 %v2530_v39, %s6484_s26  ;;  %v5979_v61 = vpack.c.bf16 %v2844_v60, %v2843_v49  ;;  %v2817_v49 = vld [vmem:[%s6550_s19 + $0x60] sm:$0xff] }
 0x63a   : > { %2455 = vrot.lane.b32.xlu1 %v2446_v62, %s6484_s26  ;;  %v3221_v62 = vld [vmem:[%s6570_s12] sm:$0xff] }
 0x63b   : > { %2513 = vrot.lane.b32.xlu0 %v2504_v63, %s6485_s0  ;;  %v3222_v63 = vld [vmem:[%s6570_s12 + $0x8] sm:$0xff] }
 0x63e   : > { %2432 = vrot.lane.b32.xlu1 %v2422_v0, %s6485_s0  ;;  %v7207_v0 = vpack.c.bf16 %v3222_v63, %v3221_v62  ;;  %v2818_v62 = vld [vmem:[%s6550_s19 + $0x68] sm:$0xff]  ;;  %v2835_v63 = vld [vmem:[%s6550_s19 + $0xf0] sm:$0xff] }
 0x63f   : > { %2537 = vrot.lane.b32.xlu0 %v2528_v2, %s6484_s26  ;;  %v2821_v2 = vld [vmem:[%s6550_s19 + $0x80] sm:$0xff] }
 0x642   : > { %2457 = vrot.lane.b32.xlu1 %v2447_v3, %s6484_s26  ;;  %v2822_v3 = vld [vmem:[%s6550_s19 + $0x88] sm:$0xff] }
 0x643   : > { %2561 = vrot.lane.b32.xlu0 %v2552_v4, %s6486_s2  ;;  %v2805_v4 = vld [vmem:[%s6550_s19] sm:$0xff] }
 0x646   : > { %2482 = vrot.lane.b32.xlu1 %v2472_v5, %s6486_s2  ;;  %v5935_v5 = vpack.c.bf16 %v2822_v3, %v2821_v2  ;;  %v2836_v2 = vld [vmem:[%s6550_s19 + $0xf8] sm:$0xff]  ;;  %v5961_v3 = vpack.c.bf16 %v2818_v62, %v2817_v49 }
 0x647   : > { %2515 = vrot.lane.b32.xlu0 %v2505_v6, %s6485_s0  ;;  %v2806_v6 = vld [vmem:[%s6550_s19 + $0x8] sm:$0xff] }
 0x648   : > { %5936 = vmatprep.subr.bf16.mxu0 %v5935_v5  ;;  %v2819_v5 = vld [vmem:[%s6550_s19 + $0x70] sm:$0xff] }
 0x64a   : > { %2434 = vrot.lane.b32.xlu1 %v2423_v7, %s6485_s0  ;;  %v2823_v7 = vld [vmem:[%s6550_s19 + $0x90] sm:$0xff]  ;;  %s7906_s0 = sld [smem:[#allocation10_spill]] }
 0x64b   : > { %2539 = vrot.lane.b32.xlu0 %v2529_v8, %s6484_s26  ;;  %v2824_v8 = vld [vmem:[%s6550_s19 + $0x98] sm:$0xff] }
 0x64e   : > { %2459 = vrot.lane.b32.xlu1 %v2448_v9, %s6484_s26  ;;  %v5937_v9 = vpack.c.bf16 %v2806_v6, %v2805_v4  ;;  %v5963_v4 = vpack.c.bf16 %v2836_v2, %v2835_v63  ;;  %v2820_v6 = vld [vmem:[%s6550_s19 + $0x78] sm:$0xff] }
 0x64f   : > { %2563 = vrot.lane.b32.xlu0 %v2553_v10, %s6486_s2  ;;  %v5939_v10 = vpack.c.bf16 %v2824_v8, %v2823_v7  ;;  %v5965_v8 = vpack.c.bf16 %v2820_v6, %v2819_v5  ;;  %v3093_v6 = vld [vmem:[%s6560_s30] sm:$0xff] }
 0x650   : > { %5938 = vmatpush3.bf16.msra.mxu0 %v5937_v9 }
 0x651   : > { %5940 = vmatprep.subr.bf16.mxu0 %v5939_v10 }
 0x652   : > { %2484 = vrot.lane.b32.xlu1 %v2473_v40, %s6486_s2 }
 0x653   : > { %2565 = vrot.lane.b32.xlu0 %v2554_v41, %s6486_s2  ;;  %s7907_s2 = sld [smem:[#allocation9_spill]] }
 0x698   : > { %v2481_v12 = vpop.permute.xlu1 %2480 }
 0x699   : > { %v2512_v13 = vpop.permute.xlu0 %2511 }
 0x69a   : > { %2523 = vst.msk [vmem:[#allocation3 + $0x8] sm:$0xff] %vm1635_vm14, %v2512_v13  ;;  %v7217_v13 = vld [vmem:[%s6545_s14] ss:$0 sm:$0xff] }
 0x69c   : > { %v2429_v15 = vpop.permute.xlu1 %2428 }
 0x69d   : > { %2440 = vst.msk [vmem:[#allocation3] sm:$0xff] %vm1635_vm14, %v2429_v15  ;;  %v2536_v16 = vpop.permute.xlu0 %2535 }
 0x69e   : > { %2547 = vst.msk [vmem:[#allocation3 + $0x8] sm:$0xff] %vm1684_vm15, %v2536_v16 }
 0x6a0   : > { %v2454_v17 = vpop.permute.xlu1 %2453 }
 0x6a1   : > { %2465 = vst.msk [vmem:[#allocation3] sm:$0xff] %vm1684_vm15, %v2454_v17  ;;  %v2560_v18 = vpop.permute.xlu0 %2559  ;;  %v2807_v17 = vld [vmem:[%s6550_s19 + $0x10] sm:$0xff] }
 0x6a2   : > { %2571 = vst.msk [vmem:[#allocation3 + $0x8] sm:$0xff] %vm1733_vm0, %v2560_v18  ;;  %v2808_v18 = vld [vmem:[%s6550_s19 + $0x18] sm:$0xff] }
 0x6a4   : > { %v2479_v20 = vpop.permute.xlu1 %2478 }
 0x6a5   : > { %2490 = vst.msk [vmem:[#allocation3] sm:$0xff] %vm1733_vm0, %v2479_v20  ;;  %v2518_v21 = vpop.permute.xlu0 %2517  ;;  %v2825_v20 = vld [vmem:[%s6550_s19 + $0xa0] sm:$0xff] }
 0x6a6   : > { %2526 = vst.msk [vmem:[#allocation3 + $0x68] sm:$0x7f] %vm2443_vm8, %v2518_v21 }
 0x6a8   : > { %v2431_v23 = vpop.permute.xlu1 %2430 }
 0x6a9   : > { %2441 = vst.msk [vmem:[#allocation3 + $0x20] sm:$0xff] %vm1635_vm14, %v2431_v23  ;;  %v2542_v24 = vpop.permute.xlu0 %2541  ;;  %v2576_v25 = vld [vmem:[#allocation3 + $0x8] sm:$0xff]  ;;  %v5941_v23 = vpack.c.bf16 %v2808_v18, %v2807_v17 }
 0x6aa   : > { %2550 = vst.msk [vmem:[#allocation3 + $0x68] sm:$0x7f] %vm2468_vm9, %v2542_v24  ;;  %2686 = vmatprep.mubr.f32.mxu1 %v2576_v25  ;;  %v2826_v24 = vld [vmem:[%s6550_s19 + $0xa8] sm:$0xff]  ;;  %v2809_v25 = vld [vmem:[%s6550_s19 + $0x20] sm:$0xff] }
 0x6ab   : > { %5942 = vmatpush3.bf16.msra.mxu0 %v5941_v23 }
 0x6ac   : > { %v2456_v26 = vpop.permute.xlu1 %2455  ;;  %v2575_v27 = vld [vmem:[#allocation3] sm:$0xff] }
 0x6ad   : > { %2466 = vst.msk [vmem:[#allocation3 + $0x20] sm:$0xff] %vm1684_vm15, %v2456_v26  ;;  %2687 = vmatmul.mubr.f32.vlgmr.msra.gmra.mrb[24].mxu1 %v2575_v27  ;;  %v2514_v28 = vpop.permute.xlu0 %2513  ;;  %v2810_v26 = vld [vmem:[%s6550_s19 + $0x28] sm:$0xff]  ;;  %v5943_v27 = vpack.c.bf16 %v2826_v24, %v2825_v20 }
 0x6ae   : > { %2491 = vst.msk [vmem:[#allocation3 + $0x20] sm:$0xff] %vm1733_vm0, %v2481_v12  ;;  %5970 = vmatpush3.bf16.msra.mxu1 %v5967_v53 }
 0x6af   : > { %2524 = vst.msk [vmem:[#allocation3 + $0x28] sm:$0xff] %vm1635_vm14, %v2514_v28  ;;  %5972 = vmatprep.subr.bf16.mxu1 %v5971_v55  ;;  %v2827_v28 = vld [vmem:[%s6550_s19 + $0xb0] sm:$0xff]  ;;  %5944 = vmatprep.subr.bf16.mxu0 %v5943_v27 }
 0x6b0   : > { %v2433_v29 = vpop.permute.xlu1 %2432 }
 0x6b1   : > { %2442 = vst.msk [vmem:[#allocation3 + $0x40] sm:$0xff] %vm1635_vm14, %v2433_v29  ;;  %v2538_v30 = vpop.permute.xlu0 %2537  ;;  %v2828_v29 = vld [vmem:[%s6550_s19 + $0xb8] sm:$0xff] }
 0x6b2   : > { %2548 = vst.msk [vmem:[#allocation3 + $0x28] sm:$0xff] %vm1684_vm15, %v2538_v30  ;;  %5974 = vmatpush3.bf16.msra.mxu1 %v5971_v55 }
 0x6b3   : > { %5976 = vmatprep.subr.bf16.mxu1 %v5975_v58 }
 0x6b4   : > { %v2458_v31 = vpop.permute.xlu1 %2457 }
 0x6b5   : > { %2467 = vst.msk [vmem:[#allocation3 + $0x40] sm:$0xff] %vm1684_vm15, %v2458_v31  ;;  %v2562_v32 = vpop.permute.xlu0 %2561  ;;  %v2577_v39 = vld [vmem:[#allocation3 + $0x20] sm:$0xff]  ;;  %v5945_v31 = vpack.c.bf16 %v2810_v26, %v2809_v25 }
 0x6b6   : > { %2572 = vst.msk [vmem:[#allocation3 + $0x28] sm:$0xff] %vm1733_vm0, %v2562_v32  ;;  %5978 = vmatpush3.bf16.msra.mxu1 %v5975_v58  ;;  %v5947_v32 = vpack.c.bf16 %v2828_v29, %v2827_v28  ;;  %v2834_v58 = vld [vmem:[%s6550_s19 + $0xe8] sm:$0xff] }
 0x6b7   : > { %5980 = vmatprep.subr.bf16.mxu1 %v5979_v61  ;;  %5946 = vmatpush3.bf16.msra.mxu0 %v5945_v31 }
 0x6b8   : > { %v2483_v34 = vpop.permute.xlu1 %2482  ;;  %5948 = vmatprep.subr.bf16.mxu0 %v5947_v32 }
 0x6b9   : > { %2492 = vst.msk [vmem:[#allocation3 + $0x40] sm:$0xff] %vm1733_vm0, %v2483_v34  ;;  %v2516_v35 = vpop.permute.xlu0 %2515  ;;  %v2811_v34 = vld [vmem:[%s6550_s19 + $0x30] sm:$0xff] }
 0x6ba   : > { %2525 = vst.msk [vmem:[#allocation3 + $0x48] sm:$0xff] %vm1635_vm14, %v2516_v35  ;;  %vm2493_vm14 = vcmask 1047296   ;;  %5982 = vmatpush3.bf16.msra.mxu1 %v5979_v61  ;;  %v2812_v35 = vld [vmem:[%s6550_s19 + $0x38] sm:$0xff]  ;;  %v5959_v61 = vpack.c.bf16 %v2834_v58, %v2833_v57 }
 0x6bb   : > { %6020 = vmatprep.subr.bf16.mxu1 %v7207_v0 }
 0x6bc   : > { %v2435_v36 = vpop.permute.xlu1 %2434 }
 0x6bd   : > { %2444 = vst.msk [vmem:[#allocation3 + $0x60] sm:$0x7f] %vm2443_vm8, %v2435_v36  ;;  %v2540_v37 = vpop.permute.xlu0 %2539  ;;  %v2578_v38 = vld [vmem:[#allocation3 + $0x28] sm:$0xff]  ;;  %v2829_v36 = vld [vmem:[%s6550_s19 + $0xc0] sm:$0xff]  ;;  %vm4213_vm8 = vcmask 121856  }
 0x6be   : > { %2549 = vst.msk [vmem:[#allocation3 + $0x48] sm:$0xff] %vm1684_vm15, %v2540_v37  ;;  %2691 = vmatprep.mubr.f32.mxu1 %v2578_v38  ;;  %v2830_v37 = vld [vmem:[%s6550_s19 + $0xc8] sm:$0xff]  ;;  %v5949_v38 = vpack.c.bf16 %v2812_v35, %v2811_v34  ;;  %vm2716_vm15 = vcmask 522240   ;;  %v3223_v35 = vld [vmem:[%s6570_s12 + $0x10] sm:$0xff] }
 0x6bf   : > { %2692 = vmatmul.mubr.f32.gmra.mrb[26].mxu1 %v2577_v39  ;;  %v5951_v39 = vpack.c.bf16 %v2830_v37, %v2829_v36 }
 0x6c0   : > { %v2460_v40 = vpop.permute.xlu1 %2459  ;;  %v2579_v46 = vld [vmem:[#allocation3 + $0x40] sm:$0xff]  ;;  %5950 = vmatpush3.bf16.msra.mxu0 %v5949_v38  ;;  %v3224_v38 = vld [vmem:[%s6570_s12 + $0x18] sm:$0xff] }
 0x6c1   : > { %2469 = vst.msk [vmem:[#allocation3 + $0x60] sm:$0x7f] %vm2468_vm9, %v2460_v40  ;;  %v2564_v41 = vpop.permute.xlu0 %2563  ;;  %v2813_v40 = vld [vmem:[%s6550_s19 + $0x40] sm:$0xff]  ;;  %5952 = vmatprep.subr.bf16.mxu0 %v5951_v39 }
 0x6c2   : > { %2573 = vst.msk [vmem:[#allocation3 + $0x48] sm:$0xff] %vm1733_vm0, %v2564_v41  ;;  %v2814_v41 = vld [vmem:[%s6550_s19 + $0x48] sm:$0xff]  ;;  %vm2747_vm0 = vcmask 1048064  }
 0x6c4   : > { %v2485_v43 = vpop.permute.xlu1 %2484 }
 0x6c5   : > { %2494 = vst.msk [vmem:[#allocation3 + $0x60] sm:$0x7f] %vm2493_vm14, %v2485_v43  ;;  %v2566_v44 = vpop.permute.xlu0 %2565  ;;  %v2831_v43 = vld [vmem:[%s6550_s19 + $0xd0] sm:$0xff] }
 0x6c6   : > { %2574 = vst.msk [vmem:[#allocation3 + $0x68] sm:$0x7f] %vm2493_vm14, %v2566_v44  ;;  %v2832_v44 = vld [vmem:[%s6550_s19 + $0xd8] sm:$0xff] }
 0x6c7   : > { %v5955_v52 = vpack.c.bf16 %v2832_v44, %v2831_v43  ;;  %v6023_v44 = vpack.c.bf16 %v3224_v38, %v3223_v35 }
 0x6c9   : > { %v2580_v45 = vld [vmem:[#allocation3 + $0x48] sm:$0xff] }
 0x6ca   : > { %2696 = vmatprep.mubr.f32.mxu1 %v2580_v45  ;;  %v5953_v45 = vpack.c.bf16 %v2814_v41, %v2813_v40 }
 0x6cb   : > { %2697 = vmatmul.mubr.f32.gmra.mrb[28].mxu1 %v2579_v46  ;;  %v2815_v46 = vld [vmem:[%s6550_s19 + $0x50] sm:$0xff] }
 0x6cc   : > { %v2581_v50 = vld [vmem:[#allocation3 + $0x60] sm:$0x7f]  ;;  %5954 = vmatpush3.bf16.msra.mxu0 %v5953_v45 }
 0x6cd   : > { %v2582_v48 = vld [vmem:[#allocation3 + $0x68] sm:$0x7f]  ;;  %5956 = vmatprep.subr.bf16.mxu0 %v5955_v52 }
 0x6ce   : > { %2701 = vmatprep.mubr.f32.mxu1 %v2582_v48  ;;  %v2816_v48 = vld [vmem:[%s6550_s19 + $0x58] sm:$0xff] }
 0x6cf   : > { %2702 = vmatmul.mubr.f32.gmra.mrb[30].mxu1 %v2581_v50  ;;  %v5957_v54 = vpack.c.bf16 %v2816_v48, %v2815_v46 }
 0x6d1   : > { %5958 = vmatpush3.bf16.msra.mxu0 %v5957_v54 }
 0x6d2   : > { %5960 = vmatprep.subr.bf16.mxu0 %v5959_v61 }
 0x6d5   : > { %5962 = vmatpush3.bf16.msra.mxu0 %v5961_v3 }
 0x6d6   : > { %5964 = vmatprep.subr.bf16.mxu0 %v5963_v4 }
 0x6d9   : > { %5966 = vmatpush3.bf16.msra.mxu0 %v5965_v8  ;;  %v3095_v8 = vld [vmem:[%s6560_s30 + $0x10] sm:$0xff] }
 0x6da   : > { %5983 = vmatprep.subr.bf16.mxu0 %v6483_v33 }
 0x780   : > { %v5282_v12 = vpop.f32.mrb[24].mxu1 }
 0x781   : > { %v5283_v15 = vpop.f32.mrb[25].mxu1 }
 0x782   : > { %v5284_v16 = vadd.f32 %v5283_v15, %v5282_v12 }
 0x784   : > { %v2689_v21 = vadd.f32 %v5284_v16, %v7217_v13 }
 0x786   : > { %v2707_v30 = vmax.f32 %v2689_v21, 0.0 }
 0x788   : > { %2713 = vst.msk [vmem:[#allocation2 + $0x2] sm:$0xff] %vm2305_vm4, %v2707_v30 }
 0x78f   : > { %v2727_v50 = vld [vmem:[#allocation2 + $0x1] sm:$0xff] }
 0x790   : > { %v2719_v51 = vld [vmem:[#allocation2] sm:$0xff]  ;;  %2735 = vrot.lane.b32.xlu1 %v2727_v50, %s6484_s26 }
 0x791   : > { %v2753_v42 = vld [vmem:[#allocation2 + $0x2] sm:$0xff]  ;;  %2723 = vst.msk [vmem:[#allocation3] sm:$0xff] %vm2305_vm4, %v2719_v51 }
 0x792   : > { %2757 = vst.msk [vmem:[#allocation3 + $0x8] sm:$0xff] %vm2305_vm4, %v2753_v42  ;;  %v5285_v53 = vpop.f32.mrb[26].mxu1 }
 0x793   : > { %v5286_v55 = vpop.f32.mrb[27].mxu1  ;;  %3039 = vst.msk [vmem:[#allocation2] sm:$0x1] %vm3038_vm10, %v6475_v1 }
 0x794   : > { %v5287_v56 = vadd.f32 %v5286_v55, %v5285_v53 }
 0x796   : > { %v2694_v60 = vadd.f32 %v5287_v56, %v7217_v13 }
 0x798   : > { %v2708_v7 = vmax.f32 %v2694_v60, 0.0 }
 0x79a   : > { %2714 = vst.msk [vmem:[#allocation2 + $0xa] sm:$0xff] %vm2305_vm4, %v2708_v7  ;;  %v3094_v7 = vld [vmem:[%s6560_s30 + $0x8] sm:$0xff] }
 0x79e   : > { %v5288_v9 = vpop.f32.mrb[28].mxu1 }
 0x79f   : > { %v5289_v10 = vpop.f32.mrb[29].mxu1 }
 0x7a0   : > { %v5290_v12 = vadd.f32 %v5289_v10, %v5288_v9  ;;  %v5984_v10 = vpack.c.bf16 %v3094_v7, %v3093_v6 }
 0x7a1   : > { %v2761_v15 = vld [vmem:[#allocation2 + $0x3] sm:$0xff] }
 0x7a2   : > { %v2728_v16 = vld [vmem:[#allocation2 + $0x9] sm:$0xff]  ;;  %v2699_v18 = vadd.f32 %v5290_v12, %v7217_v13  ;;  %2769 = vrot.lane.b32.xlu0 %v2761_v15, %s6484_s26  ;;  %v5291_v20 = vpop.f32.mrb[30].mxu1  ;;  %v3096_v12 = vld [vmem:[%s6560_s30 + $0x18] sm:$0xff] }
 0x7a3   : > { %v2785_v17 = vld [vmem:[#allocation2 + $0x4] sm:$0xff]  ;;  %2737 = vrot.lane.b32.xlu1 %v2728_v16, %s6484_s26  ;;  %v5292_v24 = vpop.f32.mrb[31].mxu1  ;;  %v5987_v15 = vpack.c.bf16 %v3096_v12, %v3095_v8 }
 0x7a4   : > { %2789 = vst.msk [vmem:[#allocation3 + $0x10] sm:$0xff] %vm2305_vm4, %v2785_v17  ;;  %v2720_v21 = vld [vmem:[#allocation2 + $0x8] sm:$0xff]  ;;  %v2709_v25 = vmax.f32 %v2699_v18, 0.0  ;;  %v5293_v26 = vadd.f32 %v5292_v24, %v5291_v20  ;;  %v3097_v16 = vld [vmem:[%s6560_s30 + $0x20] sm:$0xff]  ;;  %v3099_v20 = vld [vmem:[%s6560_s30 + $0x30] sm:$0xff] }
 0x7a5   : > { %v2754_v23 = vld [vmem:[#allocation2 + $0xa] sm:$0xff]  ;;  %2724 = vst.msk [vmem:[#allocation3 + $0x20] sm:$0xff] %vm2305_vm4, %v2720_v21  ;;  %v3100_v21 = vld [vmem:[%s6560_s30 + $0x38] sm:$0xff]  ;;  %v3101_v24 = vld [vmem:[%s6560_s30 + $0x40] sm:$0xff] }
 0x7a6   : > { %2758 = vst.msk [vmem:[#allocation3 + $0x28] sm:$0xff] %vm2305_vm4, %v2754_v23  ;;  %2715 = vst.msk [vmem:[#allocation2 + $0x12] sm:$0xff] %vm2305_vm4, %v2709_v25  ;;  %v2704_v27 = vadd.f32 %v5293_v26, %v7217_v13  ;;  %v3098_v17 = vld [vmem:[%s6560_s30 + $0x28] sm:$0xff]  ;;  %v5993_v23 = vpack.c.bf16 %v3100_v21, %v3099_v20 }
 0x7a7   : > { %v5990_v18 = vpack.c.bf16 %v3098_v17, %v3097_v16  ;;  %v3102_v25 = vld [vmem:[%s6560_s30 + $0x48] sm:$0xff] }
 0x7a8   : > { %v2710_v28 = vmax.f32 %v2704_v27, 0.0  ;;  %v5996_v26 = vpack.c.bf16 %v3102_v25, %v3101_v24  ;;  %v3103_v27 = vld [vmem:[%s6560_s30 + $0x50] sm:$0xff] }
 0x7aa   : > { %2717 = vst.msk [vmem:[#allocation2 + $0x1a] sm:$0x7f] %vm2716_vm15, %v2710_v28  ;;  %v3104_v28 = vld [vmem:[%s6560_s30 + $0x58] sm:$0xff] }
 0x7ab   : > { %v2795_v29 = vld [vmem:[#allocation3 + $0x10] sm:$0xff] }
 0x7ac   : > { %5714 = vmatprep.mubr.msk.f32.mxu1 %vm2305_vm4, %v2795_v29  ;;  %v5999_v29 = vpack.c.bf16 %v3104_v28, %v3103_v27 }
 0x7ad   : > { %v2762_v30 = vld [vmem:[#allocation2 + $0xb] sm:$0xff] }
 0x7ae   : > { %v2729_v31 = vld [vmem:[#allocation2 + $0x11] sm:$0xff]  ;;  %2771 = vrot.lane.b32.xlu0 %v2762_v30, %s6484_s26  ;;  %v3105_v30 = vld [vmem:[%s6560_s30 + $0x60] sm:$0xff] }
 0x7af   : > { %v2786_v32 = vld [vmem:[#allocation2 + $0xc] sm:$0xff]  ;;  %2739 = vrot.lane.b32.xlu1 %v2729_v31, %s6484_s26 }
 0x7b0   : > { %2790 = vst.msk [vmem:[#allocation3 + $0x30] sm:$0xff] %vm2305_vm4, %v2786_v32  ;;  %v2721_v34 = vld [vmem:[#allocation2 + $0x10] sm:$0xff]  ;;  %v3106_v31 = vld [vmem:[%s6560_s30 + $0x68] sm:$0xff] }
 0x7b1   : > { %v2755_v13 = vld [vmem:[#allocation2 + $0x12] sm:$0xff]  ;;  %2725 = vst.msk [vmem:[#allocation3 + $0x40] sm:$0xff] %vm2305_vm4, %v2721_v34  ;;  %v2788_v40 = vld [vmem:[#allocation2 + $0x1c] sm:$0x7f]  ;;  %v6002_v32 = vpack.c.bf16 %v3106_v31, %v3105_v30 }
 0x7b2   : > { %2759 = vst.msk [vmem:[#allocation3 + $0x48] sm:$0xff] %vm2305_vm4, %v2755_v13  ;;  %v2763_v36 = vld [vmem:[#allocation2 + $0x13] sm:$0xff]  ;;  %v2764_v46 = vld [vmem:[#allocation2 + $0x1b] sm:$0x7f] }
 0x7b3   : > { %v2730_v37 = vld [vmem:[#allocation2 + $0x19] sm:$0x7f]  ;;  %2773 = vrot.lane.b32.xlu0 %v2763_v36, %s6484_s26  ;;  %2792 = vst.msk [vmem:[#allocation3 + $0x70] sm:$0x7f] %vm2716_vm15, %v2788_v40  ;;  %v3107_v34 = vld [vmem:[%s6560_s30 + $0x70] sm:$0xff]  ;;  %v3109_v36 = vld [vmem:[%s6560_s30 + $0x80] sm:$0xff] }
 0x7b4   : > { %2741 = vrot.lane.b32.xlu1 %v2730_v37, %s6484_s26  ;;  %v2787_v39 = vld [vmem:[#allocation2 + $0x14] sm:$0xff]  ;;  %v3110_v37 = vld [vmem:[%s6560_s30 + $0x88] sm:$0xff] }
 0x7b5   : > { %v2722_v41 = vld [vmem:[#allocation2 + $0x18] sm:$0x7f]  ;;  %2791 = vst.msk [vmem:[#allocation3 + $0x50] sm:$0xff] %vm2305_vm4, %v2787_v39  ;;  %v6008_v38 = vpack.c.bf16 %v3110_v37, %v3109_v36  ;;  %v3111_v39 = vld [vmem:[%s6560_s30 + $0x90] sm:$0xff] }
 0x7b6   : > { %2726 = vst.msk [vmem:[#allocation3 + $0x60] sm:$0x7f] %vm2716_vm15, %v2722_v41  ;;  %v2756_v43 = vld [vmem:[#allocation2 + $0x1a] sm:$0x7f] }
 0x7b7   : > { %2760 = vst.msk [vmem:[#allocation3 + $0x68] sm:$0x7f] %vm2716_vm15, %v2756_v43  ;;  %v2798_v45 = vld [vmem:[#allocation3 + $0x30] sm:$0xff]  ;;  %2775 = vrot.lane.b32.xlu0 %v2764_v46, %s6484_s26 }
 0x7b8   : > { %5715 = vmatmul.mubr.msk.f32.vlgmr.msra.gmra.mrb[32].mxu1 %vm2305_vm4, %v2798_v45  ;;  %3044 = vst.msk [vmem:[#allocation2 + $0x20] sm:$0x1] %vm3038_vm10, %v6475_v1  ;;  %v3108_v13 = vld [vmem:[%s6560_s30 + $0x78] sm:$0xff] }
 0x7b9   : > { %6022 = vmatpush3.bf16.msra.mxu1 %v7207_v0  ;;  %v6005_v35 = vpack.c.bf16 %v3108_v13, %v3107_v34  ;;  %v3112_v40 = vld [vmem:[%s6560_s30 + $0x98] sm:$0xff] }
 0x7ba   : > { %6024 = vmatprep.subr.bf16.mxu1 %v6023_v44  ;;  %v2804_v50 = vld [vmem:[#allocation3 + $0x70] sm:$0x7f]  ;;  %v6011_v41 = vpack.c.bf16 %v3112_v40, %v3111_v39 }
 0x7bc   : > { %v2801_v48 = vld [vmem:[#allocation3 + $0x50] sm:$0xff] }
 0x7bd   : > { %5717 = vmatprep.mubr.msk.f32.mxu1 %vm2305_vm4, %v2801_v48  ;;  %6026 = vmatpush3.bf16.msra.mxu1 %v6023_v44  ;;  %v5167_v44 = vld [vmem:[%s6555_s24] ss:$0 sm:$0xff] }
 0x7be   : > { %5718 = vmatmul.mubr.msk.f32.gmra.mrb[34].mxu1 %vm2305_vm4, %v2804_v50  ;;  %v3113_v50 = vld [vmem:[%s6560_s30 + $0xa0] sm:$0xff] }
 0x7bf   : > { %5728 = vmatprep.mubr.msk.f32.mxu1 %vm1569_vm12, %v7113_v14 }
 0x7c2   : > { %5729 = vmatmul.mubr.msk.f32.vlgmr.msra.gmra.mrb[36].mxu1 %vm1569_vm12, %v7107_v11 }
 0x7c3   : > { %5731 = vmatprep.mubr.msk.f32.mxu1 %vm1569_vm12, %v7123_v22 }
 0x7c6   : > { %5732 = vmatmul.mubr.msk.f32.gmra.mrb[38].mxu1 %vm1569_vm12, %v7119_v19  ;;  %vm2751_vm12 = vcmask 1047040  }
 0x7c7   : > { %5742 = vmatprep.mubr.msk.f32.mxu1 %vm3337_vm11, %v7058_v59 }
 0x802   : > { %v2736_v0 = vpop.permute.xlu1 %2735 }
 0x803   : > { %2748 = vst.msk [vmem:[#allocation3] sm:$0xff] %vm2747_vm0, %v2736_v0  ;;  %v3114_v0 = vld [vmem:[%s6560_s30 + $0xa8] sm:$0xff] }
 0x80a   : > { %v2793_v42 = vld [vmem:[#allocation3] sm:$0xff] }
 0x814   : > { %v2770_v51 = vpop.permute.xlu0 %2769 }
 0x815   : > { %v2738_v52 = vpop.permute.xlu1 %2737  ;;  %2781 = vst.msk [vmem:[#allocation3 + $0x8] sm:$0xff] %vm2747_vm0, %v2770_v51  ;;  %v3115_v51 = vld [vmem:[%s6560_s30 + $0xb0] sm:$0xff] }
 0x816   : > { %2749 = vst.msk [vmem:[#allocation3 + $0x20] sm:$0xff] %vm2747_vm0, %v2738_v52 }
 0x81c   : > { %v2794_v14 = vld [vmem:[#allocation3 + $0x8] sm:$0xff] }
 0x81d   : > { %2928 = vmatprep.mubr.f32.mxu0 %v2794_v14  ;;  %v2796_v56 = vld [vmem:[#allocation3 + $0x20] sm:$0xff]  ;;  %v6014_v14 = vpack.c.bf16 %v3114_v0, %v3113_v50 }
 0x81e   : > { %2929 = vmatmul.mubr.f32.vlgmr.msra.gmra.mrb[12].mxu0 %v2793_v42  ;;  %v3116_v42 = vld [vmem:[%s6560_s30 + $0xb8] sm:$0xff] }
 0x81f   : > { %5985 = vmatpush1.bf16.msra.mxu0 %v5984_v10 }
 0x820   : > { %v2772_v11 = vpop.permute.xlu0 %2771  ;;  %5986 = vmatprep.subr.bf16.mxu0 %v6483_v33 }
 0x821   : > { %v2740_v53 = vpop.permute.xlu1 %2739  ;;  %2782 = vst.msk [vmem:[#allocation3 + $0x28] sm:$0xff] %vm2747_vm0, %v2772_v11 }
 0x822   : > { %2750 = vst.msk [vmem:[#allocation3 + $0x40] sm:$0xff] %vm2747_vm0, %v2740_v53  ;;  %v6017_v53 = vpack.c.bf16 %v3116_v42, %v3115_v51 }
 0x823   : > { %5988 = vmatpush1.bf16.msra.mxu0 %v5987_v15 }
 0x824   : > { %5989 = vmatprep.subr.bf16.mxu0 %v6483_v33 }
 0x825   : > { %v2774_v19 = vpop.permute.xlu0 %2773 }
 0x826   : > { %v2742_v22 = vpop.permute.xlu1 %2741  ;;  %2783 = vst.msk [vmem:[#allocation3 + $0x48] sm:$0xff] %vm2747_vm0, %v2774_v19 }
 0x827   : > { %2752 = vst.msk [vmem:[#allocation3 + $0x60] sm:$0x7f] %vm2751_vm12, %v2742_v22  ;;  %5991 = vmatpush1.bf16.msra.mxu0 %v5990_v18 }
 0x828   : > { %v2797_v55 = vld [vmem:[#allocation3 + $0x28] sm:$0xff]  ;;  %5992 = vmatprep.subr.bf16.mxu0 %v6483_v33 }
 0x829   : > { %v2776_v54 = vpop.permute.xlu0 %2775  ;;  %2933 = vmatprep.mubr.f32.mxu0 %v2797_v55  ;;  %v2799_v58 = vld [vmem:[#allocation3 + $0x40] sm:$0xff] }
 0x82a   : > { %2784 = vst.msk [vmem:[#allocation3 + $0x68] sm:$0x7f] %vm2751_vm12, %v2776_v54  ;;  %2934 = vmatmul.mubr.f32.gmra.mrb[14].mxu0 %v2796_v56 }
 0x82b   : > { %5994 = vmatpush1.bf16.msra.mxu0 %v5993_v23 }
 0x82c   : > { %5995 = vmatprep.subr.bf16.mxu0 %v6483_v33 }
 0x82d   : > { %v2800_v57 = vld [vmem:[#allocation3 + $0x48] sm:$0xff] }
 0x82e   : > { %2938 = vmatprep.mubr.f32.mxu0 %v2800_v57  ;;  %v2802_v60 = vld [vmem:[#allocation3 + $0x60] sm:$0x7f] }
 0x82f   : > { %2939 = vmatmul.mubr.f32.gmra.mrb[16].mxu0 %v2799_v58 }
 0x830   : > { %5997 = vmatpush1.bf16.msra.mxu0 %v5996_v26 }
 0x831   : > { %v2803_v49 = vld [vmem:[#allocation3 + $0x68] sm:$0x7f]  ;;  %5998 = vmatprep.subr.bf16.mxu0 %v6483_v33 }
 0x832   : > { %2943 = vmatprep.mubr.f32.mxu0 %v2803_v49 }
 0x833   : > { %2944 = vmatmul.mubr.f32.gmra.mrb[18].mxu0 %v2802_v60 }
 0x834   : > { %6000 = vmatpush1.bf16.msra.mxu0 %v5999_v29 }
 0x835   : > { %6001 = vmatprep.subr.bf16.mxu0 %v6483_v33 }
 0x838   : > { %6003 = vmatpush1.bf16.msra.mxu0 %v6002_v32 }
 0x839   : > { %6004 = vmatprep.subr.bf16.mxu0 %v6483_v33 }
 0x83c   : > { %6006 = vmatpush1.bf16.msra.mxu0 %v6005_v35 }
 0x83d   : > { %6007 = vmatprep.subr.bf16.mxu0 %v6483_v33 }
 0x840   : > { %6009 = vmatpush1.bf16.msra.mxu0 %v6008_v38 }
 0x841   : > { %6010 = vmatprep.subr.bf16.mxu0 %v6483_v33 }
 0x844   : > { %6012 = vmatpush1.bf16.msra.mxu0 %v6011_v41  ;;  %v5177_v41 = vld [vmem:[%s7898_s7] ss:$0 sm:$0xff]  ;;  %s7910_s7 = sld [smem:[#allocation14_spill]] }
 0x845   : > { %6013 = vmatprep.subr.bf16.mxu0 %v6483_v33 }
 0x848   : > { %6015 = vmatpush1.bf16.msra.mxu0 %v6014_v14 }
 0x849   : > { %6016 = vmatprep.subr.bf16.mxu0 %v6483_v33 }
 0x84c   : > { %6018 = vmatpush1.bf16.msra.mxu0 %v6017_v53 }
 0x88b   : > { %v7297_v61 = vpop.f32.mrb[32].mxu1 }
 0x88c   : > { %v7299_v62 = vpop.f32.mrb[33].mxu1 }
 0x891   : > { %v7305_v63 = vpop.f32.mrb[34].mxu1 }
 0x892   : > { %v7307_v2 = vpop.f32.mrb[35].mxu1 }
 0x895   : > { %v7309_v3 = vpop.f32.mrb[36].mxu1 }
 0x896   : > { %v7311_v4 = vpop.f32.mrb[37].mxu1  ;;  %v3316_v51 = vadd.f32 %v7309_v3, %v5177_v41 }
 0x899   : > { %v7313_v5 = vpop.f32.mrb[38].mxu1 }
 0x89a   : > { %v7318_v9 = vpop.f32.mrb[39].mxu1 }
 0x89b   : > { %v3321_v53 = vadd.f32 %v5177_v41, %v7318_v9 }
 0x8f1   : > { %v5326_v43 = vpop.f32.mrb[12].mxu0 }
 0x8f2   : > { %v5327_v45 = vpop.f32.mrb[13].mxu0 }
 0x8f3   : > { %v5328_v46 = vadd.f32 %v5327_v45, %v5326_v43  ;;  %v5172_v43 = vld [vmem:[%s7899_s15] ss:$0 sm:$0xff]  ;;  %v3311_v45 = vadd.f32 %v5177_v41, %v7311_v4  ;;  %v3326_v4 = vadd.f32 %v7313_v5, %v5177_v41  ;;  %v3552_v41 = vld [vmem:[%s7900_s16 + $0x1a8] sm:$0xff]  ;;  %s7911_s15 = sld [smem:[#allocation16_spill]] }
 0x8f5   : > { %v2931_v48 = vadd.f32 %v5328_v46, %v5167_v44 }
 0x8f7   : > { %v3016_v52 = vadd.f32 %v7299_v62, %v2931_v48 }
 0x8f9   : > { %v3034_v11 = vmax.f32 %v3016_v52, 0.0 }
 0x8fb   : > { %3040 = vst.msk [vmem:[#allocation2 + $0x1] sm:$0xff] %vm2305_vm4, %v3034_v11 }
 0x8fd   : > { %v5329_v19 = vpop.f32.mrb[14].mxu0 }
 0x8fe   : > { %v5330_v22 = vpop.f32.mrb[15].mxu0 }
 0x8ff   : > { %v5331_v54 = vadd.f32 %v5330_v22, %v5329_v19 }
 0x901   : > { %v2936_v55 = vadd.f32 %v5331_v54, %v5167_v44 }
 0x902   : > { %v5332_v56 = vpop.f32.mrb[16].mxu0  ;;  %v3053_v58 = vld [vmem:[#allocation2 + $0x1] sm:$0xff] }
 0x903   : > { %v5333_v57 = vpop.f32.mrb[17].mxu0  ;;  %v3045_v49 = vld [vmem:[#allocation2] sm:$0xff]  ;;  %v3021_v60 = vadd.f32 %v7297_v61, %v2936_v55  ;;  %3061 = vrot.lane.b32.xlu0 %v3053_v58, %s6484_s26 }
 0x904   : > { %v5334_v62 = vadd.f32 %v5333_v57, %v5332_v56  ;;  %3049 = vst.msk [vmem:[#allocation3] sm:$0xff] %vm2305_vm4, %v3045_v49 }
 0x905   : > { %v3035_v6 = vmax.f32 %v3021_v60, 0.0 }
 0x906   : > { %v2941_v7 = vadd.f32 %v5334_v62, %v5167_v44  ;;  %v5335_v8 = vpop.f32.mrb[18].mxu0 }
 0x907   : > { %v5336_v10 = vpop.f32.mrb[19].mxu0  ;;  %3041 = vst.msk [vmem:[#allocation2 + $0x9] sm:$0xff] %vm2305_vm4, %v3035_v6  ;;  %v4376_v6 = vld [vmem:[%s7910_s7 + $0x180] sm:$0xff] }
 0x908   : > { %v3026_v12 = vadd.f32 %v7307_v2, %v2941_v7  ;;  %v5337_v15 = vadd.f32 %v5336_v10, %v5335_v8  ;;  %v3515_v7 = vld [vmem:[%s7900_s16 + $0x80] sm:$0xff]  ;;  %v3516_v8 = vld [vmem:[%s7900_s16 + $0x88] sm:$0xff] }
 0x909   : > { %v3499_v10 = vld [vmem:[%s7900_s16] sm:$0xff] }
 0x90a   : > { %v3036_v16 = vmax.f32 %v3026_v12, 0.0  ;;  %v2946_v17 = vadd.f32 %v5337_v15, %v5167_v44  ;;  %v6037_v12 = vpack.c.bf16 %v3516_v8, %v3515_v7  ;;  %v3500_v15 = vld [vmem:[%s7900_s16 + $0x8] sm:$0xff]  ;;  %v3510_v7 = vld [vmem:[%s7900_s16 + $0x58] sm:$0xff] }
 0x90c   : > { %3042 = vst.msk [vmem:[#allocation2 + $0x11] sm:$0xff] %vm2305_vm4, %v3036_v16  ;;  %v3031_v61 = vadd.f32 %v7305_v63, %v2946_v17  ;;  %v3517_v16 = vld [vmem:[%s7900_s16 + $0x90] sm:$0xff]  ;;  %v6039_v17 = vpack.c.bf16 %v3500_v15, %v3499_v10  ;;  %v3540_v15 = vld [vmem:[%s7900_s16 + $0x148] sm:$0xff] }
 0x90e   : > { %v3037_v18 = vmax.f32 %v3031_v61, 0.0  ;;  %v3054_v20 = vld [vmem:[#allocation2 + $0x9] sm:$0xff] }
 0x90f   : > { %v3077_v21 = vld [vmem:[#allocation2 + $0x2] sm:$0xff]  ;;  %3063 = vrot.lane.b32.xlu1 %v3054_v20, %s6484_s26 }
 0x910   : > { %v3046_v23 = vld [vmem:[#allocation2 + $0x8] sm:$0xff]  ;;  %3043 = vst.msk [vmem:[#allocation2 + $0x19] sm:$0x7f] %vm2716_vm15, %v3037_v18  ;;  %v3547_v18 = vld [vmem:[%s7900_s16 + $0x180] sm:$0xff] }
 0x911   : > { %3081 = vst.msk [vmem:[#allocation3 + $0x8] sm:$0xff] %vm2305_vm4, %v3077_v21  ;;  %3050 = vst.msk [vmem:[#allocation3 + $0x20] sm:$0xff] %vm2305_vm4, %v3046_v23  ;;  %v3548_v20 = vld [vmem:[%s7900_s16 + $0x188] sm:$0xff]  ;;  %v3501_v21 = vld [vmem:[%s7900_s16 + $0x10] sm:$0xff] }
 0x912   : > { %3422 = vst.msk [vmem:[#allocation2] sm:$0x7] %vm3421_vm3, %v6475_v1  ;;  %v6069_v23 = vpack.c.bf16 %v3548_v20, %v3547_v18  ;;  %v3528_v18 = vld [vmem:[%s7900_s16 + $0xe8] sm:$0xff]  ;;  %v3557_v20 = vld [vmem:[%s7900_s16 + $0x1d0] sm:$0xff] }
 0x913   : > { %v3055_v2 = vld [vmem:[#allocation2 + $0x11] sm:$0xff] }
 0x914   : > { %v3078_v24 = vld [vmem:[#allocation2 + $0xa] sm:$0xff]  ;;  %3065 = vrot.lane.b32.xlu0 %v3055_v2, %s6484_s26  ;;  %v3502_v2 = vld [vmem:[%s7900_s16 + $0x18] sm:$0xff]  ;;  %6070 = vmatprep.subr.bf16.mxu0 %v6069_v23 }
 0x915   : > { %v3047_v25 = vld [vmem:[#allocation2 + $0x10] sm:$0xff]  ;;  %3082 = vst.msk [vmem:[#allocation3 + $0x28] sm:$0xff] %vm2305_vm4, %v3078_v24  ;;  %v3531_v24 = vld [vmem:[%s7900_s16 + $0x100] sm:$0xff]  ;;  %v3558_v23 = vld [vmem:[%s7900_s16 + $0x1d8] sm:$0xff] }
 0x916   : > { %3051 = vst.msk [vmem:[#allocation3 + $0x40] sm:$0xff] %vm2305_vm4, %v3047_v25  ;;  %v3532_v25 = vld [vmem:[%s7900_s16 + $0x108] sm:$0xff] }
 0x917   : > { %v3056_v26 = vld [vmem:[#allocation2 + $0x19] sm:$0x7f] }
 0x918   : > { %v3086_v63 = vld [vmem:[#allocation3 + $0x8] sm:$0xff]  ;;  %v3048_v27 = vld [vmem:[#allocation2 + $0x18] sm:$0x7f]  ;;  %3067 = vrot.lane.b32.xlu1 %v3056_v26, %s6484_s26  ;;  %v6071_v26 = vpack.c.bf16 %v3532_v25, %v3531_v24  ;;  %v3512_v24 = vld [vmem:[%s7900_s16 + $0x68] sm:$0xff]  ;;  %v6089_v25 = vpack.c.bf16 %v3558_v23, %v3557_v20 }
 0x919   : > { %5173 = vmatprep.mubr.msk.f32.mxu0 %vm2305_vm4, %v3086_v63  ;;  %3052 = vst.msk [vmem:[#allocation3 + $0x60] sm:$0x7f] %vm2716_vm15, %v3048_v27  ;;  %v3079_v28 = vld [vmem:[#allocation2 + $0x12] sm:$0xff]  ;;  %v3080_v29 = vld [vmem:[#allocation2 + $0x1a] sm:$0x7f]  ;;  %v6043_v63 = vpack.c.bf16 %v3502_v2, %v3501_v21 }
 0x91a   : > { %3083 = vst.msk [vmem:[#allocation3 + $0x48] sm:$0xff] %vm2305_vm4, %v3079_v28  ;;  %v3519_v27 = vld [vmem:[%s7900_s16 + $0xa0] sm:$0xff]  ;;  %v3520_v28 = vld [vmem:[%s7900_s16 + $0xa8] sm:$0xff] }
 0x91b   : > { %3084 = vst.msk [vmem:[#allocation3 + $0x68] sm:$0x7f] %vm2716_vm15, %v3080_v29  ;;  %v3549_v29 = vld [vmem:[%s7900_s16 + $0x190] sm:$0xff]  ;;  %v3511_v2 = vld [vmem:[%s7900_s16 + $0x60] sm:$0xff] }
 0x91c   : > { %v3088_v32 = vld [vmem:[#allocation3 + $0x28] sm:$0xff]  ;;  %3426 = vst.msk [vmem:[#allocation2 + $0x12] sm:$0xf] %vm3425_vm5, %v6475_v1  ;;  %v3800_v23 = vld [vmem:[%s7903_s18 + $0x100] sm:$0xff] }
 0x921   : > { %v3090_v37 = vld [vmem:[#allocation3 + $0x48] sm:$0xff] }
 0x922   : > { %v3092_v39 = vld [vmem:[#allocation3 + $0x68] sm:$0x7f] }
 0x975   : > { %v3062_v30 = vpop.permute.xlu0 %3061 }
 0x976   : > { %3073 = vst.msk [vmem:[#allocation3] sm:$0xff] %vm2747_vm0, %v3062_v30  ;;  %v6045_v30 = vpack.c.bf16 %v3520_v28, %v3519_v27  ;;  %v3542_v27 = vld [vmem:[%s7900_s16 + $0x158] sm:$0xff] }
 0x97d   : > { %v3085_v31 = vld [vmem:[#allocation3] sm:$0xff] }
 0x97e   : > { %3201 = vmatmul.mubr.f32.vlgmr.msra.gmra.mrb[20].mxu0 %v3085_v31  ;;  %v3550_v31 = vld [vmem:[%s7900_s16 + $0x198] sm:$0xff] }
 0x97f   : > { %5174 = vmatprep.mubr.msk.f32.mxu0 %vm2305_vm4, %v3088_v32  ;;  %v3503_v32 = vld [vmem:[%s7900_s16 + $0x20] sm:$0xff]  ;;  %6072 = vmatpush3.bf16.msra.mxu0 %v6071_v26  ;;  %v3541_v26 = vld [vmem:[%s7900_s16 + $0x150] sm:$0xff] }
 0x980   : > { %v6091_v28 = vpack.c.bf16 %v3542_v27, %v3541_v26  ;;  %v3804_v27 = vld [vmem:[%s7903_s18 + $0x120] sm:$0xff] }
 0x981   : > { %v3064_v34 = vpop.permute.xlu1 %3063 }
 0x982   : > { %3074 = vst.msk [vmem:[#allocation3 + $0x20] sm:$0xff] %vm2747_vm0, %v3064_v34  ;;  %v3504_v34 = vld [vmem:[%s7900_s16 + $0x28] sm:$0xff] }
 0x986   : > { %v3066_v13 = vpop.permute.xlu0 %3065 }
 0x987   : > { %3075 = vst.msk [vmem:[#allocation3 + $0x40] sm:$0xff] %vm2747_vm0, %v3066_v13  ;;  %v6073_v13 = vpack.c.bf16 %v3550_v31, %v3549_v29  ;;  %v3529_v29 = vld [vmem:[%s7900_s16 + $0xf0] sm:$0xff]  ;;  %v3559_v31 = vld [vmem:[%s7900_s16 + $0x1e0] sm:$0xff] }
 0x989   : > { %v3087_v36 = vld [vmem:[#allocation3 + $0x20] sm:$0xff]  ;;  %6074 = vmatprep.subr.bf16.mxu0 %v6073_v13  ;;  %v3513_v13 = vld [vmem:[%s7900_s16 + $0x70] sm:$0xff] }
 0x98a   : > { %v3068_v35 = vpop.permute.xlu1 %3067  ;;  %3206 = vmatmul.mubr.f32.gmra.mrb[22].mxu0 %v3087_v36  ;;  %v3534_v36 = vld [vmem:[%s7900_s16 + $0x118] sm:$0xff] }
 0x98b   : > { %3076 = vst.msk [vmem:[#allocation3 + $0x60] sm:$0x7f] %vm2751_vm12, %v3068_v35  ;;  %5175 = vmatprep.mubr.msk.f32.mxu0 %vm2305_vm4, %v3090_v37  ;;  %v3533_v35 = vld [vmem:[%s7900_s16 + $0x110] sm:$0xff] }
 0x98c   : > { %v3521_v37 = vld [vmem:[%s7900_s16 + $0xb0] sm:$0xff] }
 0x98e   : > { %v3089_v38 = vld [vmem:[#allocation3 + $0x40] sm:$0xff] }
 0x98f   : > { %3211 = vmatmul.mubr.f32.gmra.mrb[24].mxu0 %v3089_v38  ;;  %v6075_v38 = vpack.c.bf16 %v3534_v36, %v3533_v35  ;;  %v3514_v35 = vld [vmem:[%s7900_s16 + $0x78] sm:$0xff] }
 0x990   : > { %5176 = vmatprep.mubr.msk.f32.mxu0 %vm2305_vm4, %v3092_v39  ;;  %v3522_v39 = vld [vmem:[%s7900_s16 + $0xb8] sm:$0xff] }
 0x991   : > { %6076 = vmatpush3.bf16.msra.mxu0 %v6075_v38  ;;  %v3543_v38 = vld [vmem:[%s7900_s16 + $0x160] sm:$0xff] }
 0x992   : > { %v3091_v40 = vld [vmem:[#allocation3 + $0x60] sm:$0x7f] }
 0x993   : > { %3216 = vmatmul.mubr.f32.gmra.mrb[26].mxu0 %v3091_v40  ;;  %v3551_v40 = vld [vmem:[%s7900_s16 + $0x1a0] sm:$0xff] }
 0xa51   : > { %v3202_v44 = vpop.f32.mrb[20].mxu0 }
 0xa52   : > { %v3203_v46 = vadd.f32 %v5172_v43, %v3202_v44  ;;  %v3204_v48 = vpop.f32.mrb[21].mxu0  ;;  %v6077_v44 = vpack.c.bf16 %v3552_v41, %v3551_v40 }
 0xa53   : > { %v6049_v48 = vpack.c.bf16 %v3522_v39, %v3521_v37  ;;  %v6067_v37 = vpack.c.bf16 %v3514_v35, %v3513_v13  ;;  %v3544_v39 = vld [vmem:[%s7900_s16 + $0x168] sm:$0xff] }
 0xa54   : > { %v3329_v50 = vadd.f32 %v3311_v45, %v3203_v46  ;;  %v3505_v45 = vld [vmem:[%s7900_s16 + $0x30] sm:$0xff]  ;;  %v3535_v46 = vld [vmem:[%s7900_s16 + $0x120] sm:$0xff]  ;;  %6078 = vmatprep.subr.bf16.mxu0 %v6077_v44  ;;  %v6095_v41 = vpack.c.bf16 %v3544_v39, %v3543_v38  ;;  %v4114_v13 = vld [vmem:[%s7904_s22 + $0x8] sm:$0xff] }
 0xa55   : > { %v3768_v38 = vld [vmem:[%s7903_s18] sm:$0xff] }
 0xa56   : > { %v3333_v19 = vmax.f32 %v3329_v50, 0.0  ;;  %v3506_v50 = vld [vmem:[%s7900_s16 + $0x38] sm:$0xff] }
 0xa5d   : > { %v3207_v0 = vpop.f32.mrb[22].mxu0 }
 0xa5e   : > { %v3208_v52 = vadd.f32 %v5172_v43, %v3207_v0  ;;  %v3209_v14 = vpop.f32.mrb[23].mxu0  ;;  %v3536_v0 = vld [vmem:[%s7900_s16 + $0x128] sm:$0xff] }
 0xa5f   : > { %v3524_v14 = vld [vmem:[%s7900_s16 + $0xc8] sm:$0xff] }
 0xa60   : > { %v3330_v42 = vadd.f32 %v3316_v51, %v3208_v52  ;;  %v3523_v51 = vld [vmem:[%s7900_s16 + $0xc0] sm:$0xff]  ;;  %v6079_v52 = vpack.c.bf16 %v3536_v0, %v3535_v46 }
 0xa62   : > { %v3212_v11 = vpop.f32.mrb[24].mxu0  ;;  %v3334_v22 = vmax.f32 %v3330_v42, 0.0  ;;  %v3553_v42 = vld [vmem:[%s7900_s16 + $0x1b0] sm:$0xff]  ;;  %6080 = vmatpush3.bf16.msra.mxu0 %v6079_v52 }
 0xa63   : > { %v3213_v54 = vadd.f32 %v5172_v43, %v3212_v11  ;;  %v3214_v55 = vpop.f32.mrb[25].mxu0  ;;  %v3554_v11 = vld [vmem:[%s7900_s16 + $0x1b8] sm:$0xff] }
 0xa64   : > { %v6027_v57 = vpack.c.bf16 %v3334_v22, %v3333_v19  ;;  %v3537_v19 = vld [vmem:[%s7900_s16 + $0x130] sm:$0xff]  ;;  %v3538_v22 = vld [vmem:[%s7900_s16 + $0x138] sm:$0xff]  ;;  %v6053_v55 = vpack.c.bf16 %v3524_v14, %v3523_v51 }
 0xa65   : > { %v3331_v56 = vadd.f32 %v3321_v53, %v3213_v54  ;;  %v6081_v53 = vpack.c.bf16 %v3554_v11, %v3553_v42  ;;  %v6051_v54 = vpack.c.bf16 %v3506_v50, %v3505_v45 }
 0xa66   : > { %v3217_v58 = vpop.f32.mrb[26].mxu0  ;;  %6028 = vmatprep.subr.bf16.mxu1 %v6027_v57 }
 0xa67   : > { %v3218_v49 = vadd.f32 %v5172_v43, %v3217_v58  ;;  %v3219_v60 = vpop.f32.mrb[27].mxu0  ;;  %6030 = vmatpush3.bf16.msra.mxu1 %v6027_v57  ;;  %v3335_v62 = vmax.f32 %v3331_v56, 0.0  ;;  %v6047_v43 = vpack.c.bf16 %v3504_v34, %v3503_v32  ;;  %v3507_v56 = vld [vmem:[%s7900_s16 + $0x40] sm:$0xff]  ;;  %v3508_v57 = vld [vmem:[%s7900_s16 + $0x48] sm:$0xff]  ;;  %v6083_v58 = vpack.c.bf16 %v3538_v22, %v3537_v19  ;;  %6082 = vmatprep.subr.bf16.mxu0 %v6081_v53  ;;  %v3561_v19 = vld [vmem:[%s7900_s16 + $0x1f0] sm:$0xff] }
 0xa68   : > { %v3526_v60 = vld [vmem:[%s7900_s16 + $0xd8] sm:$0xff]  ;;  %v3560_v34 = vld [vmem:[%s7900_s16 + $0x1e8] sm:$0xff] }
 0xa69   : > { %v3332_v3 = vadd.f32 %v3326_v4, %v3218_v49  ;;  %v6055_v4 = vpack.c.bf16 %v3508_v57, %v3507_v56  ;;  %6084 = vmatpush3.bf16.msra.mxu0 %v6083_v58  ;;  %v3525_v49 = vld [vmem:[%s7900_s16 + $0xd0] sm:$0xff]  ;;  %v6093_v36 = vpack.c.bf16 %v3560_v34, %v3559_v31  ;;  %v3562_v22 = vld [vmem:[%s7900_s16 + $0x1f8] sm:$0xff]  ;;  %v4113_v34 = vld [vmem:[%s7904_s22] sm:$0xff] }
 0xa6a   : > { %v3546_v56 = vld [vmem:[%s7900_s16 + $0x178] sm:$0xff]  ;;  %v7514_v35 = vpack.c.bf16 %v4114_v13, %v4113_v34  ;;  %v3780_v34 = vld [vmem:[%s7903_s18 + $0x60] sm:$0xff] }
 0xa6b   : > { %v3336_v9 = vmax.f32 %v3332_v3, 0.0  ;;  %v3555_v3 = vld [vmem:[%s7900_s16 + $0x1c0] sm:$0xff]  ;;  %v3807_v31 = vld [vmem:[%s7903_s18 + $0x138] sm:$0xff] }
 0xa6d   : > { %v6031_v5 = vpack.c.bf16 %v3336_v9, %v3335_v62  ;;  %v6057_v62 = vpack.c.bf16 %v3526_v60, %v3525_v49  ;;  %v3556_v9 = vld [vmem:[%s7900_s16 + $0x1c8] sm:$0xff] }
 0xa6e   : > { %v6085_v8 = vpack.c.bf16 %v3556_v9, %v3555_v3 }
 0xa6f   : > { %6033 = vmatprep.subr.msk.bf16.mxu1 %vm7390_vm2, %v6031_v5 }
 0xa70   : > { %6036 = vmatpush3.bf16.msk.msra.mxu1 %vm7390_vm2, %v6031_v5  ;;  %v3509_v5 = vld [vmem:[%s7900_s16 + $0x50] sm:$0xff]  ;;  %6086 = vmatprep.subr.bf16.mxu0 %v6085_v8 }
 0xa71   : > { %6038 = vmatprep.subr.bf16.mxu1 %v6037_v12  ;;  %v6059_v10 = vpack.c.bf16 %v3510_v7, %v3509_v5  ;;  %v3539_v12 = vld [vmem:[%s7900_s16 + $0x140] sm:$0xff] }
 0xa73   : > { %5743 = vmatmul.mubr.msk.f32.vlgmr.msra.gmra.mrb[40].mxu1 %vm3337_vm11, %v7078_v47  ;;  %v3518_v47 = vld [vmem:[%s7900_s16 + $0x98] sm:$0xff] }
 0xa74   : > { %v6041_v61 = vpack.c.bf16 %v3518_v47, %v3517_v16  ;;  %6040 = vmatpush3.bf16.msra.mxu1 %v6039_v17  ;;  %v6087_v47 = vpack.c.bf16 %v3540_v15, %v3539_v12 }
 0xa76   : > { %6042 = vmatprep.subr.bf16.mxu1 %v6041_v61  ;;  %v3527_v61 = vld [vmem:[%s7900_s16 + $0xe0] sm:$0xff]  ;;  %6088 = vmatpush3.bf16.msra.mxu0 %v6087_v47 }
 0xa77   : > { %v6061_v21 = vpack.c.bf16 %v3528_v18, %v3527_v61  ;;  %6090 = vmatprep.subr.bf16.mxu0 %v6089_v25 }
 0xa78   : > { %6044 = vmatpush3.bf16.msra.mxu1 %v6043_v63  ;;  %v6063_v63 = vpack.c.bf16 %v3512_v24, %v3511_v2  ;;  %v3801_v2 = vld [vmem:[%s7903_s18 + $0x108] sm:$0xff]  ;;  %v3802_v24 = vld [vmem:[%s7903_s18 + $0x110] sm:$0xff] }
 0xa79   : > { %6046 = vmatprep.subr.bf16.mxu1 %v6045_v30  ;;  %v3530_v30 = vld [vmem:[%s7900_s16 + $0xf8] sm:$0xff]  ;;  %v6133_v25 = vpack.c.bf16 %v3801_v2, %v3800_v23  ;;  %v3778_v23 = vld [vmem:[%s7903_s18 + $0x50] sm:$0xff] }
 0xa7a   : > { %6092 = vmatpush3.bf16.msra.mxu0 %v6091_v28  ;;  %v6065_v32 = vpack.c.bf16 %v3530_v30, %v3529_v29  ;;  %v3805_v28 = vld [vmem:[%s7903_s18 + $0x128] sm:$0xff]  ;;  %v3806_v30 = vld [vmem:[%s7903_s18 + $0x130] sm:$0xff] }
 0xa7b   : > { %6094 = vmatprep.subr.bf16.mxu0 %v6093_v36  ;;  %v6141_v29 = vpack.c.bf16 %v3805_v28, %v3804_v27  ;;  %v3784_v36 = vld [vmem:[%s7903_s18 + $0x80] sm:$0xff] }
 0xa7c   : > { %6048 = vmatpush3.bf16.msra.mxu1 %v6047_v43 }
 0xa7d   : > { %6050 = vmatprep.subr.bf16.mxu1 %v6049_v48 }
 0xa7e   : > { %6096 = vmatpush3.bf16.msra.mxu0 %v6095_v41  ;;  %v3786_v41 = vld [vmem:[%s7903_s18 + $0x90] sm:$0xff] }
 0xa80   : > { %6052 = vmatpush3.bf16.msra.mxu1 %v6051_v54  ;;  %v6097_v54 = vpack.c.bf16 %v3562_v22, %v3561_v19 }
 0xa81   : > { %6054 = vmatprep.subr.bf16.mxu1 %v6053_v55  ;;  %v3545_v55 = vld [vmem:[%s7900_s16 + $0x170] sm:$0xff] }
 0xa82   : > { %v6099_v57 = vpack.c.bf16 %v3546_v56, %v3545_v55  ;;  %6098 = vmatprep.subr.bf16.mxu0 %v6097_v54  ;;  %v3774_v54 = vld [vmem:[%s7903_s18 + $0x30] sm:$0xff]  ;;  %v3775_v55 = vld [vmem:[%s7903_s18 + $0x38] sm:$0xff]  ;;  %v3792_v56 = vld [vmem:[%s7903_s18 + $0xc0] sm:$0xff] }
 0xa84   : > { %6056 = vmatpush3.bf16.msra.mxu1 %v6055_v4  ;;  %6100 = vmatpush3.bf16.msra.mxu0 %v6099_v57  ;;  %v3793_v57 = vld [vmem:[%s7903_s18 + $0xc8] sm:$0xff] }
 0xa85   : > { %6058 = vmatprep.subr.bf16.mxu1 %v6057_v62  ;;  %6134 = vmatprep.subr.bf16.mxu0 %v6133_v25 }
 0xa88   : > { %6060 = vmatpush3.bf16.msra.mxu1 %v6059_v10 }
 0xa89   : > { %6062 = vmatprep.subr.bf16.mxu1 %v6061_v21 }
 0xa8c   : > { %6064 = vmatpush3.bf16.msra.mxu1 %v6063_v63  ;;  %v3803_v63 = vld [vmem:[%s7903_s18 + $0x118] sm:$0xff] }
 0xa8d   : > { %6066 = vmatprep.subr.bf16.mxu1 %v6065_v32  ;;  %v6137_v26 = vpack.c.bf16 %v3803_v63, %v3802_v24  ;;  %v6145_v32 = vpack.c.bf16 %v3807_v31, %v3806_v30  ;;  %v3779_v63 = vld [vmem:[%s7903_s18 + $0x58] sm:$0xff]  ;;  %v3796_v31 = vld [vmem:[%s7903_s18 + $0xe0] sm:$0xff] }
 0xa8e   : > { %v6123_v27 = vpack.c.bf16 %v3779_v63, %v3778_v23  ;;  %v4006_v63 = vld [vmem:[%s7906_s0 + $0x28] sm:$0xff] }
 0xa90   : > { %6068 = vmatpush3.bf16.msra.mxu1 %v6067_v37  ;;  %v3785_v37 = vld [vmem:[%s7903_s18 + $0x88] sm:$0xff] }
 0xa91   : > { %v6101_v39 = vpack.c.bf16 %v3785_v37, %v3784_v36  ;;  %v3781_v37 = vld [vmem:[%s7903_s18 + $0x68] sm:$0xff] }
 0xa93   : > { %6102 = vmatprep.subr.bf16.mxu1 %v6101_v39 }
 0xb46   : > { %v7448_v16 = vpop.f32.mrb[40].mxu1 }
 0xb47   : > { %3424 = vst.msk [vmem:[#allocation2 + $0xb] sm:$0x7f] %vm2716_vm15, %v7448_v16  ;;  %v7452_v17 = vpop.f32.mrb[41].mxu1 }
 0xb48   : > { %3423 = vst.msk [vmem:[#allocation2 + $0x3] sm:$0xff] %vm2305_vm4, %v7452_v17 }
 0xb4e   : > { %v3448_v40 = vld [vmem:[#allocation2 + $0xb] sm:$0x7f] }
 0xb4f   : > { %3453 = vrot.lane.b32.xlu0 %v3448_v40, %s6484_s26  ;;  %v3431_v43 = vld [vmem:[#allocation2 + $0x1] sm:$0xff]  ;;  %v3444_v45 = vld [vmem:[#allocation2 + $0xa] sm:$0x7f] }
 0xb50   : > { %3435 = vrot.lane.b32.xlu1 %v3431_v43, %s6484_s26  ;;  %v3447_v44 = vld [vmem:[#allocation2 + $0x3] sm:$0xff]  ;;  %v3480_v48 = vld [vmem:[#allocation2 + $0xf] sm:$0x7f]  ;;  %3446 = vst.msk [vmem:[#allocation3 + $0x28] sm:$0x7f] %vm2716_vm15, %v3444_v45  ;;  %v3787_v43 = vld [vmem:[%s7903_s18 + $0x98] sm:$0xff] }
 0xb51   : > { %v3463_v46 = vld [vmem:[#allocation2 + $0x5] sm:$0xff]  ;;  %v3464_v50 = vld [vmem:[#allocation2 + $0xd] sm:$0x7f]  ;;  %v6105_v45 = vpack.c.bf16 %v3787_v43, %v3786_v41  ;;  %v3799_v41 = vld [vmem:[%s7903_s18 + $0xf8] sm:$0xff] }
 0xb52   : > { %v3427_v0 = vld [vmem:[#allocation2] sm:$0xff]  ;;  %v3428_v42 = vld [vmem:[#allocation2 + $0x8] sm:$0x7f]  ;;  %v3782_v43 = vld [vmem:[%s7903_s18 + $0x70] sm:$0xff] }
 0xb53   : > { %v3443_v51 = vld [vmem:[#allocation2 + $0x2] sm:$0xff]  ;;  %3429 = vst.msk [vmem:[#allocation3] sm:$0xff] %vm2305_vm4, %v3427_v0  ;;  %v3476_v11 = vld [vmem:[#allocation2 + $0xe] sm:$0x7f]  ;;  %3451 = vrot.lane.b32.xlu0 %v3447_v44, %s6484_s26 }
 0xb54   : > { %v3459_v52 = vld [vmem:[#allocation2 + $0x4] sm:$0xff]  ;;  %3722 = vst.msk [vmem:[#allocation2] sm:$0x3] %vm2711_vm7, %v6475_v1  ;;  %v3460_v53 = vld [vmem:[#allocation2 + $0xc] sm:$0x7f]  ;;  %3467 = vrot.lane.b32.xlu1 %v3463_v46, %s6484_s26 }
 0xb55   : > { %3445 = vst.msk [vmem:[#allocation3 + $0x8] sm:$0xff] %vm2305_vm4, %v3443_v51  ;;  %3461 = vst.msk [vmem:[#allocation3 + $0x10] sm:$0xff] %vm2305_vm4, %v3459_v52  ;;  %v3475_v14 = vld [vmem:[#allocation2 + $0x6] sm:$0xff]  ;;  %v3770_v46 = vld [vmem:[%s7903_s18 + $0x10] sm:$0xff] }
 0xb56   : > { %3477 = vst.msk [vmem:[#allocation3 + $0x18] sm:$0xff] %vm2305_vm4, %v3475_v14  ;;  %v3479_v58 = vld [vmem:[#allocation2 + $0x7] sm:$0xff] }
 0xb57   : > { %3430 = vst.msk [vmem:[#allocation3 + $0x20] sm:$0x7f] %vm2716_vm15, %v3428_v42  ;;  %3478 = vst.msk [vmem:[#allocation3 + $0x38] sm:$0x7f] %vm2716_vm15, %v3476_v11  ;;  %3483 = vrot.lane.b32.xlu0 %v3479_v58, %s6484_s26  ;;  %v3432_v4 = vld [vmem:[#allocation2 + $0x9] sm:$0x7f]  ;;  %v6115_v58 = vpack.c.bf16 %v3775_v55, %v3774_v54 }
 0xb58   : > { %3462 = vst.msk [vmem:[#allocation3 + $0x30] sm:$0x7f] %vm2716_vm15, %v3460_v53  ;;  %3437 = vrot.lane.b32.xlu1 %v3432_v4, %s6484_s26  ;;  %v3769_v40 = vld [vmem:[%s7903_s18 + $0x8] sm:$0xff]  ;;  %v3772_v14 = vld [vmem:[%s7903_s18 + $0x20] sm:$0xff]  ;;  %v3790_v11 = vld [vmem:[%s7903_s18 + $0xb0] sm:$0xff]  ;;  %v6117_v4 = vpack.c.bf16 %v3793_v57, %v3792_v56 }
 0xb59   : > { %3725 = vst.msk [vmem:[#allocation2 + $0x11] sm:$0x3] %vm2711_vm7, %v6475_v1  ;;  %v6103_v44 = vpack.c.bf16 %v3769_v40, %v3768_v38  ;;  %v3789_v0 = vld [vmem:[%s7903_s18 + $0xa8] sm:$0xff]  ;;  %v3791_v53 = vld [vmem:[%s7903_s18 + $0xb8] sm:$0xff]  ;;  %v6127_v38 = vpack.c.bf16 %v3781_v37, %v3780_v34  ;;  %v3798_v40 = vld [vmem:[%s7903_s18 + $0xf0] sm:$0xff] }
 0xb5a   : > { %v3773_v42 = vld [vmem:[%s7903_s18 + $0x28] sm:$0xff]  ;;  %v6113_v22 = vpack.c.bf16 %v3791_v53, %v3790_v11  ;;  %v4116_v54 = vld [vmem:[%s7904_s22 + $0x18] sm:$0xff]  ;;  %v4011_v34 = vld [vmem:[%s7906_s0 + $0x50] sm:$0xff] }
 0xb5b   : > { %3485 = vrot.lane.b32.xlu0 %v3480_v48, %s6484_s26  ;;  %v3771_v48 = vld [vmem:[%s7903_s18 + $0x18] sm:$0xff]  ;;  %v6111_v19 = vpack.c.bf16 %v3773_v42, %v3772_v14  ;;  %v4013_v37 = vld [vmem:[%s7906_s0 + $0x60] sm:$0xff] }
 0xb5c   : > { %3469 = vrot.lane.b32.xlu1 %v3464_v50, %s6484_s26  ;;  %v3788_v50 = vld [vmem:[%s7903_s18 + $0xa0] sm:$0xff]  ;;  %v6107_v51 = vpack.c.bf16 %v3771_v48, %v3770_v46 }
 0xb5d   : > { %v6109_v52 = vpack.c.bf16 %v3789_v0, %v3788_v50 }
 0xbc1   : > { %v3454_v49 = vpop.permute.xlu0 %3453 }
 0xbc2   : > { %3458 = vst.msk [vmem:[#allocation3 + $0x28] sm:$0x7f] %vm2751_vm12, %v3454_v49  ;;  %v3436_v60 = vpop.permute.xlu1 %3435  ;;  %v3776_v49 = vld [vmem:[%s7903_s18 + $0x40] sm:$0xff] }
 0xbc3   : > { %3441 = vst.msk [vmem:[#allocation3] sm:$0xff] %vm2747_vm0, %v3436_v60  ;;  %v3777_v60 = vld [vmem:[%s7903_s18 + $0x48] sm:$0xff] }
 0xbc5   : > { %v3452_v3 = vpop.permute.xlu0 %3451 }
 0xbc6   : > { %3457 = vst.msk [vmem:[#allocation3 + $0x8] sm:$0xff] %vm2747_vm0, %v3452_v3  ;;  %v3468_v62 = vpop.permute.xlu1 %3467  ;;  %v6119_v3 = vpack.c.bf16 %v3777_v60, %v3776_v49  ;;  %v4119_v60 = vld [vmem:[%s7904_s22 + $0x30] sm:$0xff] }
 0xbc7   : > { %3473 = vst.msk [vmem:[#allocation3 + $0x10] sm:$0xff] %vm2747_vm0, %v3468_v62 }
 0xbc9   : > { %v3484_v9 = vpop.permute.xlu0 %3483  ;;  %v3496_v15 = vld [vmem:[#allocation3 + $0x28] sm:$0x7f] }
 0xbca   : > { %3489 = vst.msk [vmem:[#allocation3 + $0x18] sm:$0xff] %vm2747_vm0, %v3484_v9  ;;  %v3438_v5 = vpop.permute.xlu1 %3437  ;;  %v3491_v12 = vld [vmem:[#allocation3] sm:$0xff] }
 0xbcb   : > { %3442 = vst.msk [vmem:[#allocation3 + $0x20] sm:$0x7f] %vm2751_vm12, %v3438_v5 }
 0xbcd   : > { %v3486_v7 = vpop.permute.xlu0 %3485  ;;  %v3492_v8 = vld [vmem:[#allocation3 + $0x8] sm:$0xff] }
 0xbce   : > { %3490 = vst.msk [vmem:[#allocation3 + $0x38] sm:$0x7f] %vm2751_vm12, %v3486_v7  ;;  %3634 = vmatprep.mubr.f32.mxu1 %v3492_v8  ;;  %v3470_v10 = vpop.permute.xlu1 %3469  ;;  %v3493_v18 = vld [vmem:[#allocation3 + $0x10] sm:$0xff]  ;;  %v5185_v7 = vld [vmem:[%s7905_s23] ss:$0 sm:$0xff]  ;;  %s7912_s23 = sld [smem:[#allocation15_spill]] }
 0xbcf   : > { %3474 = vst.msk [vmem:[#allocation3 + $0x30] sm:$0x7f] %vm2751_vm12, %v3470_v10  ;;  %3635 = vmatmul.mubr.f32.vlgmr.msra.gmra.mrb[42].mxu1 %v3491_v12 }
 0xbd0   : > { %3639 = vmatprep.mubr.f32.mxu1 %v3496_v15  ;;  %6104 = vmatpush3.bf16.msra.mxu1 %v6103_v44  ;;  %v6129_v44 = vpack.c.bf16 %v3799_v41, %v3798_v40  ;;  %v4015_v40 = vld [vmem:[%s7906_s0 + $0x70] sm:$0xff]  ;;  %v4016_v41 = vld [vmem:[%s7906_s0 + $0x78] sm:$0xff] }
 0xbd1   : > { %v3494_v47 = vld [vmem:[#allocation3 + $0x18] sm:$0xff]  ;;  %6106 = vmatprep.subr.bf16.mxu1 %v6105_v45  ;;  %v3783_v45 = vld [vmem:[%s7903_s18 + $0x78] sm:$0xff] }
 0xbd2   : > { %3709 = vmatprep.mubr.f32.mxu0 %v3494_v47  ;;  %v3495_v61 = vld [vmem:[#allocation3 + $0x20] sm:$0x7f]  ;;  %v6131_v46 = vpack.c.bf16 %v3783_v45, %v3782_v43  ;;  %v6171_v43 = vpack.c.bf16 %v4016_v41, %v4015_v40  ;;  %v4346_v40 = vld [vmem:[%s7910_s7 + $0x90] sm:$0xff]  ;;  %v4347_v41 = vld [vmem:[%s7910_s7 + $0x98] sm:$0xff] }
 0xbd3   : > { %3640 = vmatmul.mubr.f32.gmra.mrb[44].mxu1 %v3495_v61  ;;  %3710 = vmatmul.mubr.f32.vlgmr.msra.gmra.mrb[28].mxu0 %v3493_v18  ;;  %v4018_v45 = vld [vmem:[%s7906_s0 + $0x88] sm:$0xff] }
 0xbd4   : > { %6136 = vmatpush3.bf16.msra.mxu0 %v6133_v25  ;;  %6108 = vmatpush3.bf16.msra.mxu1 %v6107_v51 }
 0xbd5   : > { %v3498_v20 = vld [vmem:[#allocation3 + $0x38] sm:$0x7f]  ;;  %6138 = vmatprep.subr.bf16.mxu0 %v6137_v26  ;;  %6110 = vmatprep.subr.bf16.mxu1 %v6109_v52 }
 0xbd6   : > { %3714 = vmatprep.mubr.f32.mxu0 %v3498_v20  ;;  %v3497_v21 = vld [vmem:[#allocation3 + $0x30] sm:$0x7f]  ;;  %v3794_v20 = vld [vmem:[%s7903_s18 + $0xd0] sm:$0xff] }
 0xbd7   : > { %3715 = vmatmul.mubr.f32.gmra.mrb[30].mxu0 %v3497_v21  ;;  %v3795_v21 = vld [vmem:[%s7903_s18 + $0xd8] sm:$0xff] }
 0xbd8   : > { %6140 = vmatpush3.bf16.msra.mxu0 %v6137_v26  ;;  %6112 = vmatpush3.bf16.msra.mxu1 %v6111_v19  ;;  %v6121_v25 = vpack.c.bf16 %v3795_v21, %v3794_v20  ;;  %v4003_v20 = vld [vmem:[%s7906_s0 + $0x10] sm:$0xff] }
 0xbd9   : > { %6142 = vmatprep.subr.bf16.mxu0 %v6141_v29  ;;  %6114 = vmatprep.subr.bf16.mxu1 %v6113_v22  ;;  %v4115_v22 = vld [vmem:[%s7904_s22 + $0x10] sm:$0xff] }
 0xbda   : > { %v6189_v57 = vpack.c.bf16 %v4116_v54, %v4115_v22  ;;  %v4021_v22 = vld [vmem:[%s7906_s0 + $0xa0] sm:$0xff]  ;;  %v4022_v54 = vld [vmem:[%s7906_s0 + $0xa8] sm:$0xff] }
 0xbdc   : > { %6144 = vmatpush3.bf16.msra.mxu0 %v6141_v29  ;;  %6116 = vmatpush3.bf16.msra.mxu1 %v6115_v58  ;;  %v4117_v58 = vld [vmem:[%s7904_s22 + $0x20] sm:$0xff] }
 0xbdd   : > { %6146 = vmatprep.subr.bf16.mxu0 %v6145_v32  ;;  %6118 = vmatprep.subr.bf16.mxu1 %v6117_v4  ;;  %v4118_v4 = vld [vmem:[%s7904_s22 + $0x28] sm:$0xff] }
 0xbde   : > { %v6193_v49 = vpack.c.bf16 %v4118_v4, %v4117_v58 }
 0xbe0   : > { %6148 = vmatpush3.bf16.msra.mxu0 %v6145_v32  ;;  %6120 = vmatpush3.bf16.msra.mxu1 %v6119_v3  ;;  %v3797_v32 = vld [vmem:[%s7903_s18 + $0xe8] sm:$0xff]  ;;  %v4120_v3 = vld [vmem:[%s7904_s22 + $0x38] sm:$0xff] }
 0xbe1   : > { %6186 = vmatprep.subr.bf16.mxu0 %v7514_v35  ;;  %6122 = vmatprep.subr.bf16.mxu1 %v6121_v25  ;;  %v6125_v36 = vpack.c.bf16 %v3797_v32, %v3796_v31  ;;  %v4005_v25 = vld [vmem:[%s7906_s0 + $0x20] sm:$0xff]  ;;  %v4010_v31 = vld [vmem:[%s7906_s0 + $0x48] sm:$0xff] }
 0xbe4   : > { %6124 = vmatpush3.bf16.msra.mxu1 %v6123_v27  ;;  %v4007_v27 = vld [vmem:[%s7906_s0 + $0x30] sm:$0xff] }
 0xbe5   : > { %6126 = vmatprep.subr.bf16.mxu1 %v6125_v36 }
 0xbe8   : > { %6128 = vmatpush3.bf16.msra.mxu1 %v6127_v38  ;;  %v4014_v38 = vld [vmem:[%s7906_s0 + $0x68] sm:$0xff] }
 0xbe9   : > { %6130 = vmatprep.subr.bf16.mxu1 %v6129_v44  ;;  %v4017_v44 = vld [vmem:[%s7906_s0 + $0x80] sm:$0xff] }
 0xbec   : > { %6132 = vmatpush3.bf16.msra.mxu1 %v6131_v46  ;;  %v6174_v46 = vpack.c.bf16 %v4018_v45, %v4017_v44  ;;  %v6209_v44 = vpack.c.bf16 %v4347_v41, %v4346_v40  ;;  %v4377_v45 = vld [vmem:[%s7910_s7 + $0x188] sm:$0xff]  ;;  %v4356_v40 = vld [vmem:[%s7910_s7 + $0xe0] sm:$0xff] }
 0xbed   : > { %6149 = vmatprep.subr.bf16.mxu1 %v6483_v33  ;;  %v4357_v41 = vld [vmem:[%s7910_s7 + $0xe8] sm:$0xff] }
 0xca2   : > { %v5396_v62 = vpop.f32.mrb[42].mxu1 }
 0xca3   : > { %v5397_v9 = vpop.f32.mrb[43].mxu1 }
 0xca4   : > { %v5398_v5 = vadd.f32 %v5397_v9, %v5396_v62  ;;  %v6197_v62 = vpack.c.bf16 %v4120_v3, %v4119_v60  ;;  %v4024_v60 = vld [vmem:[%s7906_s0 + $0xb8] sm:$0xff] }
 0xca6   : > { %v5399_v8 = vpop.f32.mrb[44].mxu1  ;;  %v5434_v10 = vpop.f32.mrb[28].mxu0  ;;  %v3637_v47 = vadd.f32 %v5398_v5, %v5185_v7 }
 0xca7   : > { %v5400_v12 = vpop.f32.mrb[45].mxu1  ;;  %v5435_v15 = vpop.f32.mrb[29].mxu0 }
 0xca8   : > { %v5401_v61 = vadd.f32 %v5400_v12, %v5399_v8  ;;  %v5436_v18 = vadd.f32 %v5435_v15, %v5434_v10 }
 0xcaa   : > { %v3712_v2 = vadd.f32 %v5436_v18, %v3637_v47  ;;  %v5437_v24 = vpop.f32.mrb[30].mxu0  ;;  %v3642_v28 = vadd.f32 %v5401_v61, %v5185_v7  ;;  %v4001_v61 = vld [vmem:[%s7906_s0] sm:$0xff]  ;;  %v4002_v18 = vld [vmem:[%s7906_s0 + $0x8] sm:$0xff] }
 0xcab   : > { %v5438_v26 = vpop.f32.mrb[31].mxu0  ;;  %v6150_v23 = vpack.c.bf16 %v4002_v18, %v4001_v61 }
 0xcac   : > { %v3720_v29 = vmax.f32 %v3712_v2, 0.0  ;;  %v5439_v30 = vadd.f32 %v5438_v26, %v5437_v24  ;;  %v4004_v2 = vld [vmem:[%s7906_s0 + $0x18] sm:$0xff]  ;;  %v6156_v26 = vpack.c.bf16 %v4006_v63, %v4005_v25 }
 0xcad   : > { %v6153_v24 = vpack.c.bf16 %v4004_v2, %v4003_v20  ;;  %v5189_v2 = vld [vmem:[%s7909_s11] ss:$0 sm:$0xff] }
 0xcae   : > { %3723 = vst.msk [vmem:[#allocation2 + $0x2] sm:$0xff] %vm2305_vm4, %v3720_v29  ;;  %v3717_v13 = vadd.f32 %v5439_v30, %v3642_v28  ;;  %v4008_v28 = vld [vmem:[%s7906_s0 + $0x38] sm:$0xff]  ;;  %v4009_v30 = vld [vmem:[%s7906_s0 + $0x40] sm:$0xff] }
 0xcaf   : > { %v6159_v29 = vpack.c.bf16 %v4008_v28, %v4007_v27  ;;  %v6162_v32 = vpack.c.bf16 %v4010_v31, %v4009_v30 }
 0xcb0   : > { %v3721_v39 = vmax.f32 %v3717_v13, 0.0  ;;  %v4012_v13 = vld [vmem:[%s7906_s0 + $0x58] sm:$0xff] }
 0xcb1   : > { %v6165_v36 = vpack.c.bf16 %v4012_v13, %v4011_v34 }
 0xcb2   : > { %3724 = vst.msk [vmem:[#allocation2 + $0xa] sm:$0x7f] %vm2716_vm15, %v3721_v39  ;;  %v6168_v39 = vpack.c.bf16 %v4014_v38, %v4013_v37  ;;  %v4328_v37 = vld [vmem:[%s7910_s7] sm:$0xff] }
 0xcb5   : > { %v3730_v48 = vld [vmem:[#allocation2 + $0x1] sm:$0xff] }
 0xcb6   : > { %v3726_v50 = vld [vmem:[#allocation2] sm:$0xff]  ;;  %3734 = vrot.lane.b32.xlu1 %v3730_v48, %s6484_s26  ;;  %v4019_v48 = vld [vmem:[%s7906_s0 + $0x90] sm:$0xff] }
 0xcb7   : > { %v3742_v0 = vld [vmem:[#allocation2 + $0x2] sm:$0xff]  ;;  %3728 = vst.msk [vmem:[#allocation3] sm:$0xff] %vm2305_vm4, %v3726_v50  ;;  %v4020_v50 = vld [vmem:[%s7906_s0 + $0x98] sm:$0xff] }
 0xcb8   : > { %3973 = vst.msk [vmem:[#allocation2] sm:$0x1] %vm3038_vm10, %v6475_v1 }
 0xcb9   : > { %3744 = vst.msk [vmem:[#allocation3 + $0x8] sm:$0xff] %vm2305_vm4, %v3742_v0  ;;  %v3746_v51 = vld [vmem:[#allocation2 + $0x3] sm:$0xff]  ;;  %v3759_v42 = vld [vmem:[#allocation2 + $0xc] sm:$0x7f]  ;;  %v6177_v0 = vpack.c.bf16 %v4020_v50, %v4019_v48  ;;  %v6237_v48 = vpack.c.bf16 %v4377_v45, %v4376_v6  ;;  %v4331_v50 = vld [vmem:[%s7910_s7 + $0x18] sm:$0xff] }
 0xcba   : > { %v3731_v52 = vld [vmem:[#allocation2 + $0x9] sm:$0x7f]  ;;  %3750 = vrot.lane.b32.xlu0 %v3746_v51, %s6484_s26  ;;  %3761 = vst.msk [vmem:[#allocation3 + $0x30] sm:$0x7f] %vm2716_vm15, %v3759_v42  ;;  %v4387_v6 = vld [vmem:[%s7910_s7 + $0x1d8] sm:$0xff]  ;;  %v4340_v45 = vld [vmem:[%s7910_s7 + $0x60] sm:$0xff] }
 0xcbb   : > { %3736 = vrot.lane.b32.xlu1 %v3731_v52, %s6484_s26  ;;  %v3758_v14 = vld [vmem:[#allocation2 + $0x4] sm:$0xff]  ;;  %v5186_v52 = vld [vmem:[%s7907_s2] ss:$0 sm:$0xff]  ;;  %s7913_s2 = sld [smem:[#allocation18_spill]] }
 0xcbc   : > { %v3727_v11 = vld [vmem:[#allocation2 + $0x8] sm:$0x7f]  ;;  %3760 = vst.msk [vmem:[#allocation3 + $0x10] sm:$0xff] %vm2305_vm4, %v3758_v14 }
 0xcbd   : > { %v3747_v53 = vld [vmem:[#allocation2 + $0xb] sm:$0x7f]  ;;  %3729 = vst.msk [vmem:[#allocation3 + $0x20] sm:$0x7f] %vm2716_vm15, %v3727_v11 }
 0xcbe   : > { %v3743_v19 = vld [vmem:[#allocation2 + $0xa] sm:$0x7f]  ;;  %3752 = vrot.lane.b32.xlu0 %v3747_v53, %s6484_s26 }
 0xcbf   : > { %3745 = vst.msk [vmem:[#allocation3 + $0x28] sm:$0x7f] %vm2716_vm15, %v3743_v19 }
 0xcc0   : > { %3976 = vst.msk [vmem:[#allocation2 + $0x10] sm:$0x1] %vm3038_vm10, %v6475_v1 }
 0xcc1   : > { %v3767_v56 = vld [vmem:[#allocation3 + $0x30] sm:$0x7f] }
 0xcc3   : > { %v3764_v55 = vld [vmem:[#allocation3 + $0x10] sm:$0xff] }
 0xcc4   : > { %5761 = vmatprep.mubr.msk.f32.mxu0 %vm2305_vm4, %v3764_v55 }
 0xcc5   : > { %5762 = vmatmul.mubr.msk.f32.vlgmr.msra.gmra.mrb[32].mxu0 %vm2305_vm4, %v3767_v56 }
 0xcc6   : > { %6188 = vmatpush3.bf16.msra.mxu0 %v7514_v35  ;;  %5780 = vmatprep.mubr.msk.f32.mxu0 %vm2305_vm4, %v7452_v17 }
 0xcc7   : > { %6190 = vmatprep.subr.bf16.mxu0 %v6189_v57 }
 0xcca   : > { %6192 = vmatpush3.bf16.msra.mxu0 %v6189_v57  ;;  %v6180_v57 = vpack.c.bf16 %v4022_v54, %v4021_v22  ;;  %v4379_v22 = vld [vmem:[%s7910_s7 + $0x198] sm:$0xff]  ;;  %v4332_v54 = vld [vmem:[%s7910_s7 + $0x20] sm:$0xff] }
 0xccb   : > { %6194 = vmatprep.subr.bf16.mxu0 %v6193_v49 }
 0xcce   : > { %6196 = vmatpush3.bf16.msra.mxu0 %v6193_v49  ;;  %v4023_v49 = vld [vmem:[%s7906_s0 + $0xb0] sm:$0xff] }
 0xccf   : > { %6198 = vmatprep.subr.bf16.mxu0 %v6197_v62 }
 0xcd2   : > { %6200 = vmatpush3.bf16.msra.mxu0 %v6197_v62  ;;  %v6183_v62 = vpack.c.bf16 %v4024_v60, %v4023_v49  ;;  %v4351_v60 = vld [vmem:[%s7910_s7 + $0xb8] sm:$0xff] }
 0xcd3   : > { %6201 = vmatprep.subr.bf16.mxu0 %v6483_v33 }
 0xcd5   : > { %5781 = vmatmul.mubr.msk.f32.vlgmr.msra.gmra.mrb[34].mxu0 %vm2305_vm4, %v7448_v16 }
 0xcd6   : > { %5787 = vmatprep.mubr.msk.f32.mxu0 %vm6491_vm6, %v6475_v1 }
 0xd28   : > { %v3735_v9 = vpop.permute.xlu1 %3734 }
 0xd29   : > { %3740 = vst.msk [vmem:[#allocation3] sm:$0xff] %vm2747_vm0, %v3735_v9 }
 0xd2c   : > { %v3751_v35 = vpop.permute.xlu0 %3750 }
 0xd2d   : > { %v3737_v17 = vpop.permute.xlu1 %3736  ;;  %3756 = vst.msk [vmem:[#allocation3 + $0x8] sm:$0xff] %vm2747_vm0, %v3751_v35 }
 0xd2e   : > { %3741 = vst.msk [vmem:[#allocation3 + $0x20] sm:$0x7f] %vm2751_vm12, %v3737_v17 }
 0xd30   : > { %v3753_v5 = vpop.permute.xlu0 %3752  ;;  %v3762_v8 = vld [vmem:[#allocation3] sm:$0xff] }
 0xd31   : > { %3757 = vst.msk [vmem:[#allocation3 + $0x28] sm:$0x7f] %vm2751_vm12, %v3753_v5 }
 0xd34   : > { %v3763_v7 = vld [vmem:[#allocation3 + $0x8] sm:$0xff] }
 0xd35   : > { %3885 = vmatprep.mubr.f32.mxu1 %v3763_v7  ;;  %v3765_v10 = vld [vmem:[#allocation3 + $0x20] sm:$0x7f] }
 0xd36   : > { %3886 = vmatmul.mubr.f32.vlgmr.msra.gmra.mrb[46].mxu1 %v3762_v8 }
 0xd37   : > { %6151 = vmatpush1.bf16.msra.mxu1 %v6150_v23  ;;  %v5192_v23 = vld [vmem:[%s7908_s10] ss:$0 sm:$0xff]  ;;  %s7914_s10 = sld [smem:[#allocation17_spill]] }
 0xd38   : > { %v3766_v16 = vld [vmem:[#allocation3 + $0x28] sm:$0x7f]  ;;  %6152 = vmatprep.subr.bf16.mxu1 %v6483_v33 }
 0xd39   : > { %3890 = vmatprep.mubr.f32.mxu1 %v3766_v16 }
 0xd3a   : > { %3891 = vmatmul.mubr.f32.gmra.mrb[48].mxu1 %v3765_v10 }
 0xd3b   : > { %6154 = vmatpush1.bf16.msra.mxu1 %v6153_v24 }
 0xd3c   : > { %6155 = vmatprep.subr.bf16.mxu1 %v6483_v33 }
 0xd3f   : > { %6157 = vmatpush1.bf16.msra.mxu1 %v6156_v26 }
 0xd40   : > { %6158 = vmatprep.subr.bf16.mxu1 %v6483_v33 }
 0xd43   : > { %6160 = vmatpush1.bf16.msra.mxu1 %v6159_v29 }
 0xd44   : > { %6161 = vmatprep.subr.bf16.mxu1 %v6483_v33 }
 0xd47   : > { %6163 = vmatpush1.bf16.msra.mxu1 %v6162_v32 }
 0xd48   : > { %6164 = vmatprep.subr.bf16.mxu1 %v6483_v33 }
 0xd4b   : > { %6166 = vmatpush1.bf16.msra.mxu1 %v6165_v36  ;;  %v4344_v36 = vld [vmem:[%s7910_s7 + $0x80] sm:$0xff] }
 0xd4c   : > { %6167 = vmatprep.subr.bf16.mxu1 %v6483_v33 }
 0xd4f   : > { %6169 = vmatpush1.bf16.msra.mxu1 %v6168_v39  ;;  %v4329_v39 = vld [vmem:[%s7910_s7 + $0x8] sm:$0xff] }
 0xd50   : > { %6170 = vmatprep.subr.bf16.mxu1 %v6483_v33 }
 0xd53   : > { %6172 = vmatpush1.bf16.msra.mxu1 %v6171_v43  ;;  %v6207_v43 = vpack.c.bf16 %v4329_v39, %v4328_v37  ;;  %v4339_v37 = vld [vmem:[%s7910_s7 + $0x58] sm:$0xff] }
 0xd54   : > { %6173 = vmatprep.subr.bf16.mxu1 %v6483_v33 }
 0xd57   : > { %6175 = vmatpush1.bf16.msra.mxu1 %v6174_v46  ;;  %v4330_v46 = vld [vmem:[%s7910_s7 + $0x10] sm:$0xff] }
 0xd58   : > { %6176 = vmatprep.subr.bf16.mxu1 %v6483_v33 }
 0xd5b   : > { %6178 = vmatpush1.bf16.msra.mxu1 %v6177_v0  ;;  %v4360_v0 = vld [vmem:[%s7910_s7 + $0x100] sm:$0xff] }
 0xd5c   : > { %6179 = vmatprep.subr.bf16.mxu1 %v6483_v33 }
 0xd5f   : > { %6181 = vmatpush1.bf16.msra.mxu1 %v6180_v57  ;;  %v4362_v57 = vld [vmem:[%s7910_s7 + $0x110] sm:$0xff] }
 0xd60   : > { %6182 = vmatprep.subr.bf16.mxu1 %v6483_v33 }
 0xd63   : > { %6184 = vmatpush1.bf16.msra.mxu1 %v6183_v62  ;;  %v4381_v62 = vld [vmem:[%s7910_s7 + $0x1a8] sm:$0xff] }
 0xd64   : > { %6238 = vmatprep.subr.bf16.mxu1 %v6237_v48 }
 0xd98   : > { %v7585_v12 = vpop.f32.mrb[32].mxu0 }
 0xd99   : > { %v3962_v15 = vpop.f32.mrb[33].mxu0 }
 0xda8   : > { %v7587_v47 = vpop.f32.mrb[34].mxu0 }
 0xda9   : > { %v7592_v21 = vpop.f32.mrb[35].mxu0  ;;  %v4206_v29 = vadd.f32 %v7587_v47, %v5192_v23  ;;  %v4345_v47 = vld [vmem:[%s7910_s7 + $0x88] sm:$0xff] }
 0xdaa   : > { %v4201_v25 = vadd.f32 %v5192_v23, %v7592_v21  ;;  %v6205_v38 = vpack.c.bf16 %v4345_v47, %v4344_v36  ;;  %v4366_v23 = vld [vmem:[%s7910_s7 + $0x130] sm:$0xff] }
 0xdab   : > { %v4338_v47 = vld [vmem:[%s7910_s7 + $0x50] sm:$0xff] }
 0xdac   : > { %v6227_v39 = vpack.c.bf16 %v4339_v37, %v4338_v47  ;;  %v4603_v37 = vld [vmem:[%s7911_s15 + $0x138] sm:$0xff] }
 0xe09   : > { %v5472_v51 = vpop.f32.mrb[46].mxu1 }
 0xe0a   : > { %v5473_v14 = vpop.f32.mrb[47].mxu1 }
 0xe0b   : > { %v5474_v42 = vadd.f32 %v5473_v14, %v5472_v51  ;;  %v4361_v51 = vld [vmem:[%s7910_s7 + $0x108] sm:$0xff] }
 0xe0c   : > { %v6239_v14 = vpack.c.bf16 %v4361_v51, %v4360_v0  ;;  %v4370_v0 = vld [vmem:[%s7910_s7 + $0x150] sm:$0xff]  ;;  %v4371_v51 = vld [vmem:[%s7910_s7 + $0x158] sm:$0xff] }
 0xe0d   : > { %v3888_v11 = vadd.f32 %v5474_v42, %v5186_v52  ;;  %v5475_v53 = vpop.f32.mrb[48].mxu1  ;;  %v4348_v42 = vld [vmem:[%s7910_s7 + $0xa0] sm:$0xff] }
 0xe0e   : > { %v5476_v19 = vpop.f32.mrb[49].mxu1 }
 0xe0f   : > { %v3963_v55 = vadd.f32 %v3962_v15, %v3888_v11  ;;  %v5477_v56 = vadd.f32 %v5476_v19, %v5475_v53  ;;  %v4349_v11 = vld [vmem:[%s7910_s7 + $0xa8] sm:$0xff]  ;;  %v4378_v53 = vld [vmem:[%s7910_s7 + $0x190] sm:$0xff] }
 0xe10   : > { %v6213_v19 = vpack.c.bf16 %v4349_v11, %v4348_v42  ;;  %v4358_v42 = vld [vmem:[%s7910_s7 + $0xf0] sm:$0xff]  ;;  %v4359_v11 = vld [vmem:[%s7910_s7 + $0xf8] sm:$0xff] }
 0xe11   : > { %v3971_v58 = vmax.f32 %v3963_v55, 0.0  ;;  %v3893_v4 = vadd.f32 %v5477_v56, %v5186_v52  ;;  %v6211_v52 = vpack.c.bf16 %v4331_v50, %v4330_v46  ;;  %v4333_v55 = vld [vmem:[%s7910_s7 + $0x28] sm:$0xff]  ;;  %v6241_v56 = vpack.c.bf16 %v4379_v22, %v4378_v53  ;;  %v4388_v53 = vld [vmem:[%s7910_s7 + $0x1e0] sm:$0xff] }
 0xe12   : > { %v4341_v46 = vld [vmem:[%s7910_s7 + $0x68] sm:$0xff]  ;;  %v6233_v22 = vpack.c.bf16 %v4359_v11, %v4358_v42 }
 0xe13   : > { %3974 = vst.msk [vmem:[#allocation2 + $0x1] sm:$0xff] %vm2305_vm4, %v3971_v58  ;;  %v3968_v3 = vadd.f32 %v7585_v12, %v3893_v4  ;;  %v4363_v58 = vld [vmem:[%s7910_s7 + $0x118] sm:$0xff]  ;;  %v4350_v4 = vld [vmem:[%s7910_s7 + $0xb0] sm:$0xff]  ;;  %v6231_v50 = vpack.c.bf16 %v4341_v46, %v4340_v45 }
 0xe14   : > { %v6243_v49 = vpack.c.bf16 %v4363_v58, %v4362_v57  ;;  %v4583_v45 = vld [vmem:[%s7911_s15 + $0x98] sm:$0xff] }
 0xe15   : > { %v3972_v9 = vmax.f32 %v3968_v3, 0.0  ;;  %v4380_v3 = vld [vmem:[%s7910_s7 + $0x1a0] sm:$0xff] }
 0xe17   : > { %3975 = vst.msk [vmem:[#allocation2 + $0x9] sm:$0x7f] %vm2716_vm15, %v3972_v9  ;;  %v6215_v9 = vpack.c.bf16 %v4333_v55, %v4332_v54  ;;  %v4389_v54 = vld [vmem:[%s7910_s7 + $0x1e8] sm:$0xff]  ;;  %v4342_v55 = vld [vmem:[%s7910_s7 + $0x70] sm:$0xff] }
 0xe18   : > { %v6261_v57 = vpack.c.bf16 %v4389_v54, %v4388_v53  ;;  %v4568_v53 = vld [vmem:[%s7911_s15 + $0x20] sm:$0xff]  ;;  %v4587_v54 = vld [vmem:[%s7911_s15 + $0xb8] sm:$0xff] }
 0xe1a   : > { %v3981_v35 = vld [vmem:[#allocation2 + $0x1] sm:$0xff] }
 0xe1b   : > { %v3977_v17 = vld [vmem:[#allocation2] sm:$0xff]  ;;  %3985 = vrot.lane.b32.xlu0 %v3981_v35, %s6484_s26  ;;  %v6245_v35 = vpack.c.bf16 %v4381_v62, %v4380_v3  ;;  %v4390_v3 = vld [vmem:[%s7910_s7 + $0x1f0] sm:$0xff]  ;;  %v4391_v62 = vld [vmem:[%s7910_s7 + $0x1f8] sm:$0xff] }
 0xe1c   : > { %3979 = vst.msk [vmem:[#allocation3] sm:$0xff] %vm2305_vm4, %v3977_v17  ;;  %v4334_v17 = vld [vmem:[%s7910_s7 + $0x30] sm:$0xff] }
 0xe1e   : > { %v3982_v5 = vld [vmem:[#allocation2 + $0x9] sm:$0x7f] }
 0xe1f   : > { %v3993_v7 = vld [vmem:[#allocation2 + $0x2] sm:$0xff]  ;;  %3987 = vrot.lane.b32.xlu1 %v3982_v5, %s6484_s26  ;;  %v3994_v16 = vld [vmem:[#allocation2 + $0xa] sm:$0x7f] }
 0xe20   : > { %v3978_v8 = vld [vmem:[#allocation2 + $0x8] sm:$0x7f]  ;;  %3995 = vst.msk [vmem:[#allocation3 + $0x8] sm:$0xff] %vm2305_vm4, %v3993_v7  ;;  %v4364_v5 = vld [vmem:[%s7910_s7 + $0x120] sm:$0xff]  ;;  %v6217_v7 = vpack.c.bf16 %v4351_v60, %v4350_v4 }
 0xe21   : > { %4289 = vst.msk [vmem:[#allocation2] sm:$0x7] %vm3421_vm3, %v6475_v1  ;;  %v4372_v4 = vld [vmem:[%s7910_s7 + $0x160] sm:$0xff] }
 0xe22   : > { %3980 = vst.msk [vmem:[#allocation3 + $0x20] sm:$0x7f] %vm2716_vm15, %v3978_v8  ;;  %3996 = vst.msk [vmem:[#allocation3 + $0x28] sm:$0x7f] %vm2716_vm15, %v3994_v16  ;;  %v4335_v8 = vld [vmem:[%s7910_s7 + $0x38] sm:$0xff]  ;;  %v4365_v16 = vld [vmem:[%s7910_s7 + $0x128] sm:$0xff] }
 0xe23   : > { %4291 = vst.msk [vmem:[#allocation2 + $0xa] sm:$0xf] %vm3425_vm5, %v6475_v1 }
 0xe27   : > { %v3998_v10 = vld [vmem:[#allocation3 + $0x8] sm:$0xff] }
 0xe28   : > { %5190 = vmatprep.mubr.msk.f32.mxu1 %vm2305_vm4, %v3998_v10  ;;  %v4352_v10 = vld [vmem:[%s7910_s7 + $0xc0] sm:$0xff] }
 0xe29   : > { %v4000_v18 = vld [vmem:[#allocation3 + $0x28] sm:$0x7f] }
 0xe8d   : > { %v3986_v12 = vpop.permute.xlu0 %3985 }
 0xe8e   : > { %3991 = vst.msk [vmem:[#allocation3] sm:$0xff] %vm2747_vm0, %v3986_v12  ;;  %v6247_v12 = vpack.c.bf16 %v4365_v16, %v4364_v5 }
 0xe91   : > { %v3988_v15 = vpop.permute.xlu1 %3987 }
 0xe92   : > { %3992 = vst.msk [vmem:[#allocation3 + $0x20] sm:$0x7f] %vm2751_vm12, %v3988_v15  ;;  %v4353_v15 = vld [vmem:[%s7910_s7 + $0xc8] sm:$0xff] }
 0xe95   : > { %v3997_v61 = vld [vmem:[#allocation3] sm:$0xff] }
 0xe96   : > { %4103 = vmatmul.mubr.f32.vlgmr.msra.gmra.mrb[50].mxu1 %v3997_v61  ;;  %v4382_v61 = vld [vmem:[%s7910_s7 + $0x1b0] sm:$0xff] }
 0xe97   : > { %5191 = vmatprep.mubr.msk.f32.mxu1 %vm2305_vm4, %v4000_v18  ;;  %6240 = vmatpush3.bf16.msra.mxu1 %v6239_v14  ;;  %v4383_v18 = vld [vmem:[%s7910_s7 + $0x1b8] sm:$0xff] }
 0xe98   : > { %6242 = vmatprep.subr.bf16.mxu1 %v6241_v56  ;;  %v4343_v56 = vld [vmem:[%s7910_s7 + $0x78] sm:$0xff] }
 0xe99   : > { %v3999_v20 = vld [vmem:[#allocation3 + $0x20] sm:$0x7f]  ;;  %v6235_v58 = vpack.c.bf16 %v4343_v56, %v4342_v55 }
 0xe9a   : > { %4108 = vmatmul.mubr.f32.gmra.mrb[52].mxu1 %v3999_v20  ;;  %v6249_v20 = vpack.c.bf16 %v4383_v18, %v4382_v61 }
 0xe9b   : > { %6244 = vmatpush3.bf16.msra.mxu1 %v6243_v49  ;;  %v4373_v49 = vld [vmem:[%s7910_s7 + $0x168] sm:$0xff] }
 0xe9c   : > { %6246 = vmatprep.subr.bf16.mxu1 %v6245_v35  ;;  %v6263_v60 = vpack.c.bf16 %v4373_v49, %v4372_v4  ;;  %v6265_v35 = vpack.c.bf16 %v4391_v62, %v4390_v3  ;;  %v4588_v4 = vld [vmem:[%s7911_s15 + $0xc0] sm:$0xff]  ;;  %v4589_v49 = vld [vmem:[%s7911_s15 + $0xc8] sm:$0xff] }
 0xe9d   : > { %v6285_v3 = vpack.c.bf16 %v4589_v49, %v4588_v4  ;;  %v4572_v62 = vld [vmem:[%s7911_s15 + $0x40] sm:$0xff]  ;;  %v4779_v4 = vld [vmem:[%s7913_s2 + $0x48] sm:$0xff] }
 0xe9f   : > { %6248 = vmatpush3.bf16.msra.mxu1 %v6247_v12 }
 0xea0   : > { %6250 = vmatprep.subr.bf16.mxu1 %v6249_v20 }
 0xf69   : > { %v4104_v24 = vpop.f32.mrb[50].mxu1 }
 0xf6a   : > { %v4105_v63 = vadd.f32 %v5189_v2, %v4104_v24  ;;  %v4106_v26 = vpop.f32.mrb[51].mxu1  ;;  %v6219_v24 = vpack.c.bf16 %v4335_v8, %v4334_v17  ;;  %v4375_v17 = vld [vmem:[%s7910_s7 + $0x178] sm:$0xff] }
 0xf6b   : > { %v4336_v26 = vld [vmem:[%s7910_s7 + $0x40] sm:$0xff] }
 0xf6c   : > { %v4209_v27 = vadd.f32 %v4201_v25, %v4105_v63  ;;  %v4384_v25 = vld [vmem:[%s7910_s7 + $0x1c0] sm:$0xff]  ;;  %v6221_v63 = vpack.c.bf16 %v4353_v15, %v4352_v10 }
 0xf6d   : > { %v4109_v28 = vpop.f32.mrb[52].mxu1 }
 0xf6e   : > { %v4110_v30 = vadd.f32 %v5189_v2, %v4109_v28  ;;  %v4111_v31 = vpop.f32.mrb[53].mxu1  ;;  %v4211_v34 = vmax.f32 %v4209_v27, 0.0  ;;  %v4367_v2 = vld [vmem:[%s7910_s7 + $0x138] sm:$0xff]  ;;  %v4337_v27 = vld [vmem:[%s7910_s7 + $0x48] sm:$0xff] }
 0xf6f   : > { %v4385_v28 = vld [vmem:[%s7910_s7 + $0x1c8] sm:$0xff]  ;;  %v4355_v31 = vld [vmem:[%s7910_s7 + $0xd8] sm:$0xff] }
 0xf70   : > { %v4210_v32 = vadd.f32 %v4206_v29, %v4110_v30  ;;  %v6251_v29 = vpack.c.bf16 %v4367_v2, %v4366_v23  ;;  %v4354_v30 = vld [vmem:[%s7910_s7 + $0xd0] sm:$0xff] }
 0xf71   : > { %v6225_v36 = vpack.c.bf16 %v4355_v31, %v4354_v30  ;;  %v4598_v30 = vld [vmem:[%s7911_s15 + $0x110] sm:$0xff] }
 0xf72   : > { %v4212_v13 = vmax.f32 %v4210_v32, 0.0  ;;  %v6253_v32 = vpack.c.bf16 %v4385_v28, %v4384_v25  ;;  %6252 = vmatpush3.bf16.msra.mxu1 %v6251_v29  ;;  %v4596_v28 = vld [vmem:[%s7911_s15 + $0x100] sm:$0xff]  ;;  %v4597_v29 = vld [vmem:[%s7911_s15 + $0x108] sm:$0xff] }
 0xf73   : > { %v6302_v31 = vpack.c.bf16 %v4597_v29, %v4596_v28  ;;  %v4577_v29 = vld [vmem:[%s7911_s15 + $0x68] sm:$0xff] }
 0xf74   : > { %v6202_v21 = vpack.c.bf16 %v4212_v13, %v4211_v34  ;;  %v4368_v34 = vld [vmem:[%s7910_s7 + $0x140] sm:$0xff]  ;;  %v4369_v13 = vld [vmem:[%s7910_s7 + $0x148] sm:$0xff]  ;;  %6254 = vmatprep.subr.bf16.mxu1 %v6253_v32  ;;  %v4599_v32 = vld [vmem:[%s7911_s15 + $0x118] sm:$0xff] }
 0xf76   : > { %6204 = vmatpush3.bf16.msk.msra.mxu0 %vm7390_vm2, %v6202_v21  ;;  %v6223_v21 = vpack.c.bf16 %v4337_v27, %v4336_v26 }
 0xf77   : > { %6206 = vmatprep.subr.bf16.mxu0 %v6205_v38  ;;  %v6255_v38 = vpack.c.bf16 %v4369_v13, %v4368_v34  ;;  %v6305_v34 = vpack.c.bf16 %v4599_v32, %v4598_v30  ;;  %v4600_v13 = vld [vmem:[%s7911_s15 + $0x120] sm:$0xff]  ;;  %v4594_v30 = vld [vmem:[%s7911_s15 + $0xf0] sm:$0xff] }
 0xf79   : > { %5788 = vmatmul.mubr.msk.f32.vlgmr.msra.gmra.mrb[36].mxu0 %vm4213_vm8, %v7058_v59  ;;  %6256 = vmatpush3.bf16.msra.mxu1 %v6255_v38 }
 0xf7a   : > { %6208 = vmatpush3.bf16.msra.mxu0 %v6207_v43  ;;  %v4386_v43 = vld [vmem:[%s7910_s7 + $0x1d0] sm:$0xff] }
 0xf7b   : > { %6210 = vmatprep.subr.bf16.mxu0 %v6209_v44  ;;  %v6229_v44 = vpack.c.bf16 %v4357_v41, %v4356_v40  ;;  %v6257_v48 = vpack.c.bf16 %v4387_v6, %v4386_v43  ;;  %v4581_v40 = vld [vmem:[%s7911_s15 + $0x88] sm:$0xff]  ;;  %v4564_v41 = vld [vmem:[%s7911_s15] sm:$0xff]  ;;  %v4582_v6 = vld [vmem:[%s7911_s15 + $0x90] sm:$0xff] }
 0xf7d   : > { %6258 = vmatprep.subr.bf16.mxu1 %v6257_v48  ;;  %v6273_v48 = vpack.c.bf16 %v4583_v45, %v4582_v6 }
 0xf7e   : > { %6212 = vmatpush3.bf16.msra.mxu0 %v6211_v52  ;;  %v6259_v52 = vpack.c.bf16 %v4371_v51, %v4370_v0  ;;  %v4567_v0 = vld [vmem:[%s7911_s15 + $0x18] sm:$0xff]  ;;  %v4584_v51 = vld [vmem:[%s7911_s15 + $0xa0] sm:$0xff] }
 0xf7f   : > { %6214 = vmatprep.subr.bf16.mxu0 %v6213_v19 }
 0xf80   : > { %6260 = vmatpush3.bf16.msra.mxu1 %v6259_v52  ;;  %v4585_v52 = vld [vmem:[%s7911_s15 + $0xa8] sm:$0xff] }
 0xf81   : > { %6262 = vmatprep.subr.bf16.mxu1 %v6261_v57  ;;  %v6277_v11 = vpack.c.bf16 %v4585_v52, %v4584_v51  ;;  %v4570_v57 = vld [vmem:[%s7911_s15 + $0x30] sm:$0xff]  ;;  %v4771_v51 = vld [vmem:[%s7913_s2 + $0x8] sm:$0xff] }
 0xf82   : > { %6216 = vmatpush3.bf16.msra.mxu0 %v6215_v9  ;;  %v4374_v9 = vld [vmem:[%s7910_s7 + $0x170] sm:$0xff] }
 0xf83   : > { %6218 = vmatprep.subr.bf16.mxu0 %v6217_v7  ;;  %v6267_v5 = vpack.c.bf16 %v4375_v17, %v4374_v9  ;;  %v4573_v9 = vld [vmem:[%s7911_s15 + $0x48] sm:$0xff]  ;;  %v4591_v17 = vld [vmem:[%s7911_s15 + $0xd8] sm:$0xff]  ;;  %v4772_v52 = vld [vmem:[%s7913_s2 + $0x10] sm:$0xff] }
 0xf84   : > { %6264 = vmatpush3.bf16.msra.mxu1 %v6263_v60 }
 0xf85   : > { %6266 = vmatprep.subr.bf16.mxu1 %v6265_v35  ;;  %v4590_v35 = vld [vmem:[%s7911_s15 + $0xd0] sm:$0xff] }
 0xf86   : > { %6220 = vmatpush3.bf16.msra.mxu0 %v6219_v24 }
 0xf87   : > { %6222 = vmatprep.subr.bf16.mxu0 %v6221_v63 }
 0xf88   : > { %6268 = vmatpush3.bf16.msra.mxu1 %v6267_v5  ;;  %v6287_v5 = vpack.c.bf16 %v4573_v9, %v4572_v62  ;;  %v4782_v9 = vld [vmem:[%s7913_s2 + $0x60] sm:$0xff] }
 0xf89   : > { %6301 = vmatprep.subr.bf16.mxu1 %v6483_v33 }
 0xf8a   : > { %6224 = vmatpush3.bf16.msra.mxu0 %v6223_v21  ;;  %v4601_v21 = vld [vmem:[%s7911_s15 + $0x128] sm:$0xff] }
 0xf8b   : > { %6226 = vmatprep.subr.bf16.mxu0 %v6225_v36  ;;  %v4602_v36 = vld [vmem:[%s7911_s15 + $0x130] sm:$0xff]  ;;  %v6308_v47 = vpack.c.bf16 %v4601_v21, %v4600_v13  ;;  %v4579_v21 = vld [vmem:[%s7911_s15 + $0x78] sm:$0xff] }
 0xf8c   : > { %v6311_v38 = vpack.c.bf16 %v4603_v37, %v4602_v36  ;;  %v4578_v13 = vld [vmem:[%s7911_s15 + $0x70] sm:$0xff] }
 0xf8e   : > { %6228 = vmatpush3.bf16.msra.mxu0 %v6227_v39  ;;  %v4580_v39 = vld [vmem:[%s7911_s15 + $0x80] sm:$0xff] }
 0xf8f   : > { %6230 = vmatprep.subr.bf16.mxu0 %v6229_v44  ;;  %v6269_v43 = vpack.c.bf16 %v4581_v40, %v4580_v39  ;;  %v4565_v44 = vld [vmem:[%s7911_s15 + $0x8] sm:$0xff] }
 0xf90   : > { %v6271_v46 = vpack.c.bf16 %v4565_v44, %v4564_v41 }
 0xf92   : > { %6232 = vmatpush3.bf16.msra.mxu0 %v6231_v50  ;;  %v4566_v50 = vld [vmem:[%s7911_s15 + $0x10] sm:$0xff] }
 0xf93   : > { %6234 = vmatprep.subr.bf16.mxu0 %v6233_v22  ;;  %v6275_v42 = vpack.c.bf16 %v4567_v0, %v4566_v50  ;;  %v4586_v22 = vld [vmem:[%s7911_s15 + $0xb0] sm:$0xff]  ;;  %v4770_v0 = vld [vmem:[%s7913_s2] sm:$0xff] }
 0xf94   : > { %v6281_v56 = vpack.c.bf16 %v4587_v54, %v4586_v22  ;;  %v4775_v22 = vld [vmem:[%s7913_s2 + $0x28] sm:$0xff] }
 0xf96   : > { %6236 = vmatpush3.bf16.msra.mxu0 %v6235_v58  ;;  %v4571_v58 = vld [vmem:[%s7911_s15 + $0x38] sm:$0xff] }
 0xf97   : > { %6270 = vmatprep.subr.bf16.mxu0 %v6269_v43  ;;  %v6283_v60 = vpack.c.bf16 %v4571_v58, %v4570_v57  ;;  %v4778_v58 = vld [vmem:[%s7913_s2 + $0x40] sm:$0xff] }
 0xf98   : > { %v6326_v49 = vpack.c.bf16 %v4779_v4, %v4778_v58 }
0x104c   : > { %v7705_v14 = vpop.f32.mrb[36].mxu0 }
0x104d   : > { %4290 = vst.msk [vmem:[#allocation2 + $0x3] sm:$0x7f] %vm2716_vm15, %v7705_v14  ;;  %v5789_v19 = vpop.f32.mrb[37].mxu0 }
0x104e   : > { %v4569_v19 = vld [vmem:[%s7911_s15 + $0x28] sm:$0xff] }
0x104f   : > { %v6279_v55 = vpack.c.bf16 %v4569_v19, %v4568_v53  ;;  %v4774_v19 = vld [vmem:[%s7913_s2 + $0x20] sm:$0xff] }
0x1050   : > { %v6320_v54 = vpack.c.bf16 %v4775_v22, %v4774_v19 }
0x1054   : > { %v4302_v7 = vld [vmem:[#allocation2 + $0x3] sm:$0x7f] }
0x1055   : > { %v4294_v8 = vld [vmem:[#allocation2 + $0x1] sm:$0x7f]  ;;  %4304 = vrot.lane.b32.xlu0 %v4302_v7, %s6484_s26  ;;  %v6289_v7 = vpack.c.bf16 %v4591_v17, %v4590_v35  ;;  %v4783_v35 = vld [vmem:[%s7913_s2 + $0x68] sm:$0xff] }
0x1056   : > { %4296 = vrot.lane.b32.xlu1 %v4294_v8, %s6484_s26  ;;  %v4318_v16 = vld [vmem:[#allocation2 + $0x7] sm:$0x7f]  ;;  %v4292_v12 = vld [vmem:[#allocation2] sm:$0x7f]  ;;  %v4574_v8 = vld [vmem:[%s7911_s15 + $0x50] sm:$0xff]  ;;  %v6332_v17 = vpack.c.bf16 %v4783_v35, %v4782_v9 }
0x1057   : > { %v4300_v10 = vld [vmem:[#allocation2 + $0x2] sm:$0x7f]  ;;  %4293 = vst.msk [vmem:[#allocation3] sm:$0x7f] %vm2716_vm15, %v4292_v12 }
0x1058   : > { %v4310_v15 = vld [vmem:[#allocation2 + $0x5] sm:$0x7f]  ;;  %4301 = vst.msk [vmem:[#allocation3 + $0x8] sm:$0x7f] %vm2716_vm15, %v4300_v10 }
0x1059   : > { %4540 = vst.msk [vmem:[#allocation2] sm:$0x3] %vm2711_vm7, %v6475_v1  ;;  %v4316_v61 = vld [vmem:[#allocation2 + $0x6] sm:$0x7f]  ;;  %4320 = vrot.lane.b32.xlu0 %v4318_v16, %s6484_s26  ;;  %v4575_v16 = vld [vmem:[%s7911_s15 + $0x58] sm:$0xff] }
0x105a   : > { %v4308_v18 = vld [vmem:[#allocation2 + $0x4] sm:$0x7f]  ;;  %4317 = vst.msk [vmem:[#allocation3 + $0x18] sm:$0x7f] %vm2716_vm15, %v4316_v61  ;;  %4312 = vrot.lane.b32.xlu1 %v4310_v15, %s6484_s26  ;;  %v6291_v10 = vpack.c.bf16 %v4575_v16, %v4574_v8 }
0x105b   : > { %4309 = vst.msk [vmem:[#allocation3 + $0x10] sm:$0x7f] %vm2716_vm15, %v4308_v18  ;;  %v5197_v18 = vld [vmem:[%s7912_s23] ss:$0 sm:$0xff] }
0x105c   : > { %4542 = vst.msk [vmem:[#allocation2 + $0x9] sm:$0x3] %vm2711_vm7, %v6475_v1  ;;  %v4786_v16 = vld [vmem:[%s7913_s2 + $0x80] sm:$0xff]  ;;  %vm4964_vm7 = vcmask 56320  }
0x10c7   : > { %v4305_v20 = vpop.permute.xlu0 %4304 }
0x10c8   : > { %v4297_v23 = vpop.permute.xlu1 %4296  ;;  %4307 = vst.msk [vmem:[#allocation3 + $0x8] sm:$0x7f] %vm2751_vm12, %v4305_v20 }
0x10c9   : > { %4299 = vst.msk [vmem:[#allocation3] sm:$0x7f] %vm2751_vm12, %v4297_v23 }
0x10cb   : > { %v4321_v2 = vpop.permute.xlu0 %4320 }
0x10cc   : > { %v4313_v24 = vpop.permute.xlu1 %4312  ;;  %4323 = vst.msk [vmem:[#allocation3 + $0x18] sm:$0x7f] %vm2751_vm12, %v4321_v2 }
0x10cd   : > { %4315 = vst.msk [vmem:[#allocation3 + $0x10] sm:$0x7f] %vm2751_vm12, %v4313_v24 }
0x10cf   : > { %v4325_v25 = vld [vmem:[#allocation3 + $0x8] sm:$0x7f] }
0x10d0   : > { %v4324_v63 = vld [vmem:[#allocation3] sm:$0x7f]  ;;  %4463 = vmatprep.mubr.f32.mxu0 %v4325_v25  ;;  %v4592_v25 = vld [vmem:[%s7911_s15 + $0xe0] sm:$0xff] }
0x10d1   : > { %4464 = vmatmul.mubr.f32.vlgmr.msra.gmra.mrb[38].mxu0 %v4324_v63  ;;  %v4593_v63 = vld [vmem:[%s7911_s15 + $0xe8] sm:$0xff] }
0x10d2   : > { %6272 = vmatpush3.bf16.msra.mxu0 %v6271_v46  ;;  %v6293_v28 = vpack.c.bf16 %v4593_v63, %v4592_v25  ;;  %v4790_v63 = vld [vmem:[%s7913_s2 + $0xa0] sm:$0xff] }
0x10d3   : > { %v4327_v26 = vld [vmem:[#allocation3 + $0x18] sm:$0x7f]  ;;  %6274 = vmatprep.subr.bf16.mxu0 %v6273_v48 }
0x10d4   : > { %v4326_v27 = vld [vmem:[#allocation3 + $0x10] sm:$0x7f]  ;;  %4533 = vmatprep.mubr.f32.mxu1 %v4327_v26  ;;  %v4576_v26 = vld [vmem:[%s7911_s15 + $0x60] sm:$0xff] }
0x10d5   : > { %4534 = vmatmul.mubr.f32.vlgmr.msra.gmra.mrb[54].mxu1 %v4326_v27  ;;  %v6295_v32 = vpack.c.bf16 %v4577_v29, %v4576_v26  ;;  %v4791_v26 = vld [vmem:[%s7913_s2 + $0xa8] sm:$0xff] }
0x10d6   : > { %5806 = vmatprep.mubr.msk.f32.mxu1 %vm6491_vm6, %v6475_v1  ;;  %6303 = vmatpush3.bf16.msra.mxu1 %v6302_v31  ;;  %v4595_v31 = vld [vmem:[%s7911_s15 + $0xf8] sm:$0xff]  ;;  %v6344_v29 = vpack.c.bf16 %v4791_v26, %v4790_v63 }
0x10d7   : > { %6304 = vmatprep.subr.bf16.mxu1 %v6483_v33  ;;  %6276 = vmatpush3.bf16.msra.mxu0 %v6275_v42  ;;  %v6314_v42 = vpack.c.bf16 %v4771_v51, %v4770_v0  ;;  %v5200_v51 = vld [vmem:[%s6645_s4] ss:$0 sm:$0xff] }
0x10d8   : > { %6278 = vmatprep.subr.bf16.mxu0 %v6277_v11  ;;  %v4773_v11 = vld [vmem:[%s7913_s2 + $0x18] sm:$0xff] }
0x10d9   : > { %v6317_v53 = vpack.c.bf16 %v4773_v11, %v4772_v52  ;;  %v5202_v52 = vld [vmem:[%s6655_s20] ss:$0 sm:$0xff] }
0x10da   : > { %6306 = vmatpush3.bf16.msra.mxu1 %v6305_v34  ;;  %v6297_v34 = vpack.c.bf16 %v4595_v31, %v4594_v30  ;;  %v4793_v30 = vld [vmem:[%s7913_s2 + $0xb8] sm:$0xff] }
0x10db   : > { %6307 = vmatprep.subr.bf16.mxu1 %v6483_v33  ;;  %6280 = vmatpush3.bf16.msra.mxu0 %v6279_v55  ;;  %v4776_v55 = vld [vmem:[%s7913_s2 + $0x30] sm:$0xff] }
0x10dc   : > { %6282 = vmatprep.subr.bf16.mxu0 %v6281_v56  ;;  %v4777_v56 = vld [vmem:[%s7913_s2 + $0x38] sm:$0xff] }
0x10dd   : > { %v6323_v57 = vpack.c.bf16 %v4777_v56, %v4776_v55 }
0x10de   : > { %6309 = vmatpush3.bf16.msra.mxu1 %v6308_v47  ;;  %v6299_v47 = vpack.c.bf16 %v4579_v21, %v4578_v13 }
0x10df   : > { %6310 = vmatprep.subr.bf16.mxu1 %v6483_v33  ;;  %6284 = vmatpush3.bf16.msra.mxu0 %v6283_v60  ;;  %v4780_v60 = vld [vmem:[%s7913_s2 + $0x50] sm:$0xff] }
0x10e0   : > { %6286 = vmatprep.subr.bf16.mxu0 %v6285_v3  ;;  %v4781_v3 = vld [vmem:[%s7913_s2 + $0x58] sm:$0xff] }
0x10e1   : > { %v6329_v62 = vpack.c.bf16 %v4781_v3, %v4780_v60 }
0x10e2   : > { %6312 = vmatpush3.bf16.msra.mxu1 %v6311_v38 }
0x10e3   : > { %6288 = vmatpush3.bf16.msra.mxu0 %v6287_v5  ;;  %v4784_v5 = vld [vmem:[%s7913_s2 + $0x70] sm:$0xff] }
0x10e4   : > { %6290 = vmatprep.subr.bf16.mxu0 %v6289_v7  ;;  %v4785_v7 = vld [vmem:[%s7913_s2 + $0x78] sm:$0xff] }
0x10e5   : > { %v6335_v8 = vpack.c.bf16 %v4785_v7, %v4784_v5 }
0x10e7   : > { %6292 = vmatpush3.bf16.msra.mxu0 %v6291_v10  ;;  %v4787_v10 = vld [vmem:[%s7913_s2 + $0x88] sm:$0xff] }
0x10e8   : > { %6294 = vmatprep.subr.bf16.mxu0 %v6293_v28 }
0x10eb   : > { %6296 = vmatpush3.bf16.msra.mxu0 %v6295_v32 }
0x10ec   : > { %6298 = vmatprep.subr.bf16.mxu0 %v6297_v34 }
0x10ef   : > { %6300 = vmatpush3.bf16.msra.mxu0 %v6299_v47 }
0x10f0   : > { %6313 = vmatprep.subr.bf16.mxu0 %v6483_v33 }
0x11a4   : > { %v5533_v12 = vpop.f32.mrb[38].mxu0 }
0x11a5   : > { %v5534_v15 = vpop.f32.mrb[39].mxu0 }
0x11a6   : > { %v5535_v61 = vadd.f32 %v5534_v15, %v5533_v12  ;;  %v6338_v12 = vpack.c.bf16 %v4787_v10, %v4786_v16  ;;  %v4788_v15 = vld [vmem:[%s7913_s2 + $0x90] sm:$0xff] }
0x11a8   : > { %v5568_v20 = vpop.f32.mrb[54].mxu1  ;;  %v4466_v2 = vadd.f32 %v5535_v61, %v5197_v18  ;;  %v4789_v61 = vld [vmem:[%s7913_s2 + $0x98] sm:$0xff] }
0x11a9   : > { %v5569_v23 = vpop.f32.mrb[55].mxu1  ;;  %v6341_v18 = vpack.c.bf16 %v4789_v61, %v4788_v15 }
0x11aa   : > { %v5570_v24 = vadd.f32 %v5569_v23, %v5568_v20  ;;  %v5198_v23 = vld [vmem:[%s7914_s10] ss:$0 sm:$0xff] }
0x11ac   : > { %v4536_v27 = vadd.f32 %v5570_v24, %v4466_v2 }
0x11ae   : > { %v4539_v36 = vmax.f32 %v4536_v27, 0.0  ;;  %v4792_v27 = vld [vmem:[%s7913_s2 + $0xb0] sm:$0xff] }
0x11af   : > { %v6347_v32 = vpack.c.bf16 %v4793_v30, %v4792_v27 }
0x11b0   : > { %4541 = vst.msk [vmem:[#allocation2 + $0x2] sm:$0x7f] %vm2716_vm15, %v4539_v36 }
0x11b7   : > { %v4553_v37 = vld [vmem:[#allocation2 + $0x3] sm:$0x7f] }
0x11b8   : > { %v4545_v38 = vld [vmem:[#allocation2 + $0x1] sm:$0x7f]  ;;  %4555 = vrot.lane.b32.xlu0 %v4553_v37, %s6484_s26 }
0x11b9   : > { %v4559_v39 = vld [vmem:[#allocation2 + $0x4] sm:$0x7f]  ;;  %4547 = vrot.lane.b32.xlu1 %v4545_v38, %s6484_s26 }
0x11ba   : > { %4560 = vst.msk [vmem:[#allocation3 + $0x10] sm:$0x7f] %vm2716_vm15, %v4559_v39  ;;  %v4551_v40 = vld [vmem:[#allocation2 + $0x2] sm:$0x7f] }
0x11bb   : > { %v4543_v41 = vld [vmem:[#allocation2] sm:$0x7f]  ;;  %4552 = vst.msk [vmem:[#allocation3 + $0x8] sm:$0x7f] %vm2716_vm15, %v4551_v40  ;;  %v4875_v38 = vld [vmem:[%s6650_s6 + $0x8] sm:$0xff]  ;;  %v4876_v40 = vld [vmem:[%s6650_s6 + $0x10] sm:$0xff] }
0x11bc   : > { %4757 = vst.msk [vmem:[#allocation2 + $0x8] sm:$0x1] %vm3038_vm10, %v6475_v1  ;;  %4755 = vst.msk [vmem:[#allocation2] sm:$0x1] %vm3038_vm10, %v6475_v1  ;;  %v4874_v37 = vld [vmem:[%s6650_s6] sm:$0xff] }
0x11bd   : > { %4544 = vst.msk [vmem:[#allocation3] sm:$0x7f] %vm2716_vm15, %v4543_v41  ;;  %v6350_v39 = vpack.c.bf16 %v4875_v38, %v4874_v37  ;;  %v4877_v41 = vld [vmem:[%s6650_s6 + $0x18] sm:$0xff] }
0x11c1   : > { %v4563_v43 = vld [vmem:[#allocation3 + $0x10] sm:$0x7f] }
0x11c2   : > { %5807 = vmatmul.mubr.msk.f32.vlgmr.msra.gmra.mrb[56].mxu1 %vm2305_vm4, %v4563_v43 }
0x122a   : > { %v4556_v44 = vpop.permute.xlu0 %4555 }
0x122b   : > { %v4548_v6 = vpop.permute.xlu1 %4547  ;;  %4558 = vst.msk [vmem:[#allocation3 + $0x8] sm:$0x7f] %vm2751_vm12, %v4556_v44  ;;  %v6353_v44 = vpack.c.bf16 %v4877_v41, %v4876_v40 }
0x122c   : > { %4550 = vst.msk [vmem:[#allocation3] sm:$0x7f] %vm2751_vm12, %v4548_v6  ;;  %v4878_v6 = vld [vmem:[%s6650_s6 + $0x20] sm:$0xff] }
0x1232   : > { %v4562_v45 = vld [vmem:[#allocation3 + $0x8] sm:$0x7f] }
0x1233   : > { %v4561_v46 = vld [vmem:[#allocation3] sm:$0x7f]  ;;  %4678 = vmatprep.mubr.f32.mxu0 %v4562_v45 }
0x1234   : > { %4679 = vmatmul.mubr.f32.vlgmr.msra.gmra.mrb[40].mxu0 %v4561_v46  ;;  %v4879_v45 = vld [vmem:[%s6650_s6 + $0x28] sm:$0xff] }
0x1235   : > { %6315 = vmatpush1.bf16.msra.mxu0 %v6314_v42  ;;  %v6356_v46 = vpack.c.bf16 %v4879_v45, %v4878_v6  ;;  %v6361_v42 = vadd.f32 %v5202_v52, %v5200_v51 }
0x1236   : > { %6316 = vmatprep.subr.bf16.mxu0 %v6483_v33 }
0x1239   : > { %6318 = vmatpush1.bf16.msra.mxu0 %v6317_v53 }
0x123a   : > { %6319 = vmatprep.subr.bf16.mxu0 %v6483_v33 }
0x123d   : > { %6321 = vmatpush1.bf16.msra.mxu0 %v6320_v54 }
0x123e   : > { %6322 = vmatprep.subr.bf16.mxu0 %v6483_v33 }
0x1241   : > { %6324 = vmatpush1.bf16.msra.mxu0 %v6323_v57 }
0x1242   : > { %6325 = vmatprep.subr.bf16.mxu0 %v6483_v33 }
0x1245   : > { %6327 = vmatpush1.bf16.msra.mxu0 %v6326_v49 }
0x1246   : > { %6328 = vmatprep.subr.bf16.mxu0 %v6483_v33 }
0x1249   : > { %6330 = vmatpush1.bf16.msra.mxu0 %v6329_v62 }
0x124a   : > { %6331 = vmatprep.subr.bf16.mxu0 %v6483_v33 }
0x124d   : > { %6333 = vmatpush1.bf16.msra.mxu0 %v6332_v17 }
0x124e   : > { %6334 = vmatprep.subr.bf16.mxu0 %v6483_v33 }
0x1251   : > { %6336 = vmatpush1.bf16.msra.mxu0 %v6335_v8 }
0x1252   : > { %6337 = vmatprep.subr.bf16.mxu0 %v6483_v33 }
0x1255   : > { %6339 = vmatpush1.bf16.msra.mxu0 %v6338_v12 }
0x1256   : > { %6340 = vmatprep.subr.bf16.mxu0 %v6483_v33 }
0x1259   : > { %6342 = vmatpush1.bf16.msra.mxu0 %v6341_v18 }
0x125a   : > { %6343 = vmatprep.subr.bf16.mxu0 %v6483_v33 }
0x125d   : > { %6345 = vmatpush1.bf16.msra.mxu0 %v6344_v29 }
0x125e   : > { %6346 = vmatprep.subr.bf16.mxu0 %v6483_v33 }
0x1261   : > { %6348 = vmatpush1.bf16.msra.mxu0 %v6347_v32 }
0x1262   : > { %6349 = vmatprep.subr.bf16.mxu0 %v6483_v33 }
0x1295   : > { %v4750_v48 = vpop.f32.mrb[56].mxu1 }
0x1296   : > { %v5808_v50 = vpop.f32.mrb[57].mxu1 }
0x1297   : > { %v4881_v50 = vld [vmem:[%s6650_s6 + $0x38] sm:$0xff] }
0x1307   : > { %v5603_v20 = vpop.f32.mrb[40].mxu0 }
0x1308   : > { %v5604_v2 = vpop.f32.mrb[41].mxu0 }
0x1309   : > { %v5605_v24 = vadd.f32 %v5604_v2, %v5603_v20 }
0x130b   : > { %v4681_v25 = vadd.f32 %v5605_v24, %v5198_v23 }
0x130d   : > { %v4751_v28 = vadd.f32 %v4750_v48, %v4681_v25  ;;  %v4880_v48 = vld [vmem:[%s6650_s6 + $0x30] sm:$0xff] }
0x130e   : > { %v6359_v0 = vpack.c.bf16 %v4881_v50, %v4880_v48 }
0x130f   : > { %v4754_v31 = vmax.f32 %v4751_v28, 0.0 }
0x1311   : > { %4756 = vst.msk [vmem:[#allocation2 + $0x1] sm:$0x7f] %vm2716_vm15, %v4754_v31 }
0x1318   : > { %v4760_v34 = vld [vmem:[#allocation2 + $0x1] sm:$0x7f] }
0x1319   : > { %v4766_v13 = vld [vmem:[#allocation2 + $0x2] sm:$0x7f]  ;;  %4762 = vrot.lane.b32.xlu0 %v4760_v34, %s6484_s26  ;;  %s5133_s26 = sshll.u32 %s7916_s1, 2 }
0x131a   : > { %v4758_v21 = vld [vmem:[#allocation2] sm:$0x7f]  ;;  %4767 = vst.msk [vmem:[#allocation3 + $0x8] sm:$0x7f] %vm2716_vm15, %v4766_v13  ;;  %s984_s11 = scalar_lea.vmem %s6660_s27, %s5133_s26 }
0x131b   : > { %4759 = vst.msk [vmem:[#allocation3] sm:$0x7f] %vm2716_vm15, %v4758_v21 }
0x1321   : > { %v4769_v36 = vld [vmem:[#allocation3 + $0x8] sm:$0x7f] }
0x1322   : > { %5201 = vmatprep.mubr.msk.f32.mxu0 %vm2305_vm4, %v4769_v36 }
0x138b   : > { %v4763_v47 = vpop.permute.xlu0 %4762 }
0x138c   : > { %4765 = vst.msk [vmem:[#allocation3] sm:$0x7f] %vm2751_vm12, %v4763_v47 }
0x1393   : > { %v4768_v43 = vld [vmem:[#allocation3] sm:$0x7f] }
0x1394   : > { %4869 = vmatmul.mubr.f32.vlgmr.msra.gmra.mrb[42].mxu0 %v4768_v43 }
0x1395   : > { %6351 = vmatpush3.bf16.msra.mxu0 %v6350_v39  ;;  %5825 = vmatprep.mubr.msk.f32.mxu0 %vm6491_vm6, %v6475_v1 }
0x1396   : > { %6352 = vmatprep.subr.bf16.mxu0 %v6483_v33 }
0x1399   : > { %6354 = vmatpush3.bf16.msra.mxu0 %v6353_v44 }
0x139a   : > { %6355 = vmatprep.subr.bf16.mxu0 %v6483_v33 }
0x139d   : > { %6357 = vmatpush3.bf16.msra.mxu0 %v6356_v46 }
0x139e   : > { %6358 = vmatprep.subr.bf16.mxu0 %v6483_v33 }
0x13a1   : > { %6360 = vmatpush3.bf16.msra.mxu0 %v6359_v0 }
0x13a2   : > { %5828 = vmatprep.subr.mxu0 %v6475_v1 }
0x13a4   : > { %5826 = vmatmul.mubr.msk.f32.vlgmr.msra.gmra.mrb[42].mxu0 %vm2305_vm4, %v7705_v14 }
0x13a5   : > { %5830 = vmatprep.mubr.msk.f32.mxu0 %vm6491_vm6, %v6475_v1 }
0x1477   : > { %v4958_v11 = vpop.f32.mrb[42].mxu0 }
0x1478   : > { %v6362_v53 = vadd.f32 %v6361_v42, %v4958_v11  ;;  %v5827_v19 = vpop.f32.mrb[43].mxu0 }
0x147a   : > { %v4963_v22 = vmax.f32 %v6362_v53, 0.0 }
0x147c   : > { %5829 = vmatpush3.msk.msra.mxu0 %vm3342_vm13, %v4963_v22 }
0x147d   : > { %5831 = vmatmul.mubr.msk.f32.vlgmr.msra.gmra.mrb[44].mxu0 %vm4964_vm7, %v7058_v59 }
0x1550   : > { %v5036_v33 = vpop.f32.mrb[44].mxu0 }
0x1551   : > { %5040 = vst.msk [vmem:[%s984_s11] sm:$0x7] %vm3421_vm3, %v5036_v33  ;;  %v5832_v14 = vpop.f32.mrb[45].mxu0 }
0x1552 PF: > { %s75_s28 = sadd.s32 1, %s6440_s28  }
0x1553   : > { %p72_p4 = scmp.ge.s32.totalorder %s75_s28, 4  }
0x1555   :  { %74 = sbr.rel (!%p72_p4) target bundleno = 53 (0x35), region = 210 }

</bundles_post_ra>
